<compile_context>
chip_gen: v7x
topology: tpu7x:2x2x1
jax: 0.10.0
libtpu: 0.0.40
codegen_flags: <defaults>
</compile_context>

<pallas_src>
import functools

import jax
import jax.numpy as jnp
from jax.experimental import pallas as pl
from jax.experimental.pallas import tpu as pltpu


# ----------------------------------------------------------------------------
# Fused coupling-layer kernel (pre conv + WN stack + post conv + affine update)
# ----------------------------------------------------------------------------
def _coupling_kernel(x_ref, mask_ref, pre_w_ref, pre_b_ref,
                     in_wt_ref, in_bt_ref, in_ws_ref, in_bs_ref,
                     rs_rw_ref, rs_rb_ref, rs_sw_ref, rs_sb_ref,
                     post_w_ref, post_b_ref, out_ref, hpad_ref,
                     *, n_layers, kernel_size, dilation_rate, hidden, half):
    T = x_ref.shape[1]
    maxpad = (hpad_ref.shape[0] - T) // 2           # sublane-aligned border size

    x_full = x_ref[0]                               # (T, C)  channels on lanes
    mask = mask_ref[0].astype(jnp.float32)          # (T, 1)
    x0 = x_full[:, :half].astype(jnp.float32)       # (T, half)
    x1 = x_full[:, half:].astype(jnp.float32)       # (T, half)

    # pre: 1x1 conv == channel matmul, then sequence mask
    h = (jnp.dot(x0, pre_w_ref[...], preferred_element_type=jnp.float32)
         + pre_b_ref[...]) * mask                   # (T, hidden)

    # zero the padded staging buffer once; borders are never written again
    hpad_ref[...] = jnp.zeros(hpad_ref.shape, hpad_ref.dtype)

    skip = jnp.zeros((T, hidden), jnp.float32)
    for i in range(n_layers):                       # static, unrolled
        dil = dilation_rate ** i
        pad = (kernel_size - 1) * dil // 2
        hpad_ref[maxpad:maxpad + T, :] = h          # interior (aligned) store
        t_acc = jnp.zeros((T, hidden), jnp.float32) + in_bt_ref[i]
        s_acc = jnp.zeros((T, hidden), jnp.float32) + in_bs_ref[i]
        for j in range(kernel_size):                # dilated conv = k shifted matmuls
            start = maxpad + j * dil - pad
            seg = hpad_ref[start:start + T, :]      # zero-padded "same" window
            t_acc = t_acc + jnp.dot(seg, in_wt_ref[i, j],
                                    preferred_element_type=jnp.float32)
            s_acc = s_acc + jnp.dot(seg, in_ws_ref[i, j],
                                    preferred_element_type=jnp.float32)
        # fused_add_tanh_sigmoid_multiply with g == 0
        acts = jnp.tanh(t_acc) * (1.0 / (1.0 + jnp.exp(-s_acc)))
        skip = skip + jnp.dot(acts, rs_sw_ref[i],
                              preferred_element_type=jnp.float32) + rs_sb_ref[i]
        if i < n_layers - 1:                        # last WN layer has no res half
            res = jnp.dot(acts, rs_rw_ref[i],
                          preferred_element_type=jnp.float32) + rs_rb_ref[i]
            h = (h + res) * mask

    out_wn = skip * mask                            # WN output
    # post 1x1 conv (mean_only=True -> stats == m, logs == 0)
    m = (jnp.dot(out_wn, post_w_ref[...], preferred_element_type=jnp.float32)
         + post_b_ref[...]) * mask
    x1_new = m + x1 * mask                          # x1 = m + x1*exp(0)*mask
    # lane-dense full-channel output slab
    out_ref[0] = jnp.concatenate([x0, x1_new], axis=-1).astype(out_ref.dtype)


def _wspec(shape):
    zero_idx = (0,) * len(shape)
    return pl.BlockSpec(shape, lambda b, _z=zero_idx: _z)


def coupling_layer(x_btc, mask_bt1, p, *, kernel_size, dilation_rate,
                   n_layers, hidden):
    """One ResidualCouplingLayer (mean_only) as a single fused pallas_call."""
    B, T, C = x_btc.shape
    half = C // 2
    maxpad = (kernel_size - 1) * (dilation_rate ** max(n_layers - 1, 0)) // 2
    if maxpad > 0:                                  # sublane-align interior store
        maxpad = ((maxpad + 7) // 8) * 8

    kern = functools.partial(
        _coupling_kernel, n_layers=n_layers, kernel_size=kernel_size,
        dilation_rate=dilation_rate, hidden=hidden, half=half)

    weights = (p["pre_w"], p["pre_b"], p["in_wt"], p["in_bt"], p["in_ws"],
               p["in_bs"], p["rs_rw"], p["rs_rb"], p["rs_sw"], p["rs_sb"],
               p["post_w"], p["post_b"])

    return pl.pallas_call(
        kern,
        grid=(B,),
        in_specs=[
            pl.BlockSpec((1, T, C), lambda b: (b, 0, 0)),
            pl.BlockSpec((1, T, 1), lambda b: (b, 0, 0)),
            *[_wspec(w.shape) for w in weights],
        ],
        out_specs=pl.BlockSpec((1, T, C), lambda b: (b, 0, 0)),
        out_shape=jax.ShapeDtypeStruct((B, T, C), x_btc.dtype),
        scratch_shapes=[pltpu.VMEM((T + 2 * maxpad, hidden), jnp.float32)],
        compiler_params=pltpu.CompilerParams(dimension_semantics=("parallel",)),
    )(x_btc, mask_bt1, *weights)


# ----------------------------------------------------------------------------
# Block forward (forward direction, reverse=False)
# ----------------------------------------------------------------------------
def residual_coupling_block_forward(params, x_nct, x_mask_n1t, *,
                                    kernel_size, dilation_rate, n_layers, hidden):
    """x: (B, C, T), x_mask: (B, 1, T) -> (B, C, T), PyTorch layout."""
    x = jnp.transpose(x_nct, (0, 2, 1))             # (B, T, C)
    mask = jnp.transpose(x_mask_n1t, (0, 2, 1))     # (B, T, 1)
    for p in params["flows"]:
        x = coupling_layer(x, mask, p, kernel_size=kernel_size,
                           dilation_rate=dilation_rate, n_layers=n_layers,
                           hidden=hidden)
        x = jnp.flip(x, axis=-1)                    # modules.Flip (channel axis)
    return jnp.transpose(x, (0, 2, 1))              # back to (B, C, T)


# ----------------------------------------------------------------------------
# Pure-JAX reference (same weight layout) for correctness checking
# ----------------------------------------------------------------------------
def _sigmoid(v):
    return 1.0 / (1.0 + jnp.exp(-v))


def _ref_coupling(x, mask, p, *, kernel_size, dilation_rate, n_layers):
    T = x.shape[1]
    half = x.shape[-1] // 2
    x0, x1 = x[..., :half], x[..., half:]
    h = (jnp.einsum("btc,cd->btd", x0, p["pre_w"]) + p["pre_b"]) * mask
    skip = jnp.zeros_like(h)
    for i in range(n_layers):
        dil = dilation_rate ** i
        pad = (kernel_size - 1) * dil // 2
        hp = jnp.pad(h, ((0, 0), (pad, pad), (0, 0)))
        t_acc = jnp.zeros_like(h) + p["in_bt"][i]
        s_acc = jnp.zeros_like(h) + p["in_bs"][i]
        for j in range(kernel_size):
            seg = hp[:, j * dil:j * dil + T, :]
            t_acc = t_acc + jnp.einsum("btc,cd->btd", seg, p["in_wt"][i, j])
            s_acc = s_acc + jnp.einsum("btc,cd->btd", seg, p["in_ws"][i, j])
        acts = jnp.tanh(t_acc) * _sigmoid(s_acc)
        skip = skip + jnp.einsum("btc,cd->btd", acts, p["rs_sw"][i]) + p["rs_sb"][i]
        if i < n_layers - 1:
            h = (h + jnp.einsum("btc,cd->btd", acts, p["rs_rw"][i])
                 + p["rs_rb"][i]) * mask
    m = (jnp.einsum("btc,cd->btd", skip * mask, p["post_w"]) + p["post_b"]) * mask
    x1n = m + x1 * mask
    return jnp.concatenate([x0, x1n], axis=-1)


def reference_forward(params, x_nct, x_mask_n1t, *, kernel_size, dilation_rate,
                      n_layers):
    x = jnp.transpose(x_nct, (0, 2, 1))
    mask = jnp.transpose(x_mask_n1t, (0, 2, 1))
    for p in params["flows"]:
        x = _ref_coupling(x, mask, p, kernel_size=kernel_size,
                          dilation_rate=dilation_rate, n_layers=n_layers)
        x = jnp.flip(x, axis=-1)
    return jnp.transpose(x, (0, 2, 1))


# ----------------------------------------------------------------------------
# Deterministic synthetic parameters
# ----------------------------------------------------------------------------
def init_params(key, channels, hidden, kernel_size, n_layers, n_flows):
    half = channels // 2

    def w(k, shape, scale=0.1):
        return scale * jax.random.normal(k, shape, jnp.float32)

    flows = []
    for fk in jax.random.split(key, n_flows):
        ks = jax.random.split(fk, 12)
        flows.append({
            "pre_w": w(ks[0], (half, hidden)),
            "pre_b": w(ks[1], (1, hidden), 0.01),
            # WN dilated-conv weights, split into tanh / sigmoid output halves,
            # stacked over layers: (n_layers, kernel_size, hidden, hidden)
            "in_wt": w(ks[2], (n_layers, kernel_size, hidden, hidden), 0.05),
            "in_bt": w(ks[3], (n_layers, 1, hidden), 0.01),
            "in_ws": w(ks[4], (n_layers, kernel_size, hidden, hidden), 0.05),
            "in_bs": w(ks[5], (n_layers, 1, hidden), 0.01),
            # res/skip 1x1 convs; the last layer's res half is unused (as in WN)
            "rs_rw": w(ks[6], (n_layers, hidden, hidden), 0.05),
            "rs_rb": w(ks[7], (n_layers, 1, hidden), 0.01),
            "rs_sw": w(ks[8], (n_layers, hidden, hidden), 0.05),
            "rs_sb": w(ks[9], (n_layers, 1, hidden), 0.01),
            # NOTE: VITS zero-initializes `post`; small random weights here so
            # the full compute path is actually exercised.
            "post_w": w(ks[10], (hidden, half), 0.02),
            "post_b": w(ks[11], (1, half), 0.01),
        })
    return {"flows": flows}


# ----------------------------------------------------------------------------
if __name__ == "__main__":
    B, C, T = 2, 4, 16
    hidden, kernel_size, dilation_rate = 32, 5, 1
    n_layers, n_flows = 4, 4

    key = jax.random.PRNGKey(0)
    kx, kp = jax.random.split(key)
    x = jax.random.normal(kx, (B, C, T), jnp.float32)
    lengths = jnp.array([T, T - 5], jnp.int32)
    x_mask = (jnp.arange(T)[None, :] < lengths[:, None]).astype(
        jnp.float32)[:, None, :]                    # (B, 1, T), 1 = valid

    params = init_params(kp, C, hidden, kernel_size, n_layers, n_flows)

    fwd = jax.jit(functools.partial(
        residual_coupling_block_forward, kernel_size=kernel_size,
        dilation_rate=dilation_rate, n_layers=n_layers, hidden=hidden))
    y = jax.block_until_ready(fwd(params, x, x_mask))
    assert y.shape == (B, C, T)

    y_ref = reference_forward(params, x, x_mask, kernel_size=kernel_size,
                              dilation_rate=dilation_rate, n_layers=n_layers)
    err = float(jnp.max(jnp.abs(y - y_ref)))
    assert err < 1e-3, f"mismatch vs pure-JAX reference: {err}"
    print("KERNEL_OK")
</pallas_src>

<mosaic_0001>
module attributes {stable_mosaic.version = 11 : i64} {
  func.func @_coupling_kernel(%arg0: i32, %arg1: memref<1x16x4xf32, #tpu.memory_space<vmem>>, %arg2: memref<1x16x1xf32, #tpu.memory_space<vmem>>, %arg3: memref<2x32xf32, #tpu.memory_space<vmem>>, %arg4: memref<1x32xf32, #tpu.memory_space<vmem>>, %arg5: memref<4x5x32x32xf32, #tpu.memory_space<vmem>>, %arg6: memref<4x1x32xf32, #tpu.memory_space<vmem>>, %arg7: memref<4x5x32x32xf32, #tpu.memory_space<vmem>>, %arg8: memref<4x1x32xf32, #tpu.memory_space<vmem>>, %arg9: memref<4x32x32xf32, #tpu.memory_space<vmem>>, %arg10: memref<4x1x32xf32, #tpu.memory_space<vmem>>, %arg11: memref<4x32x32xf32, #tpu.memory_space<vmem>>, %arg12: memref<4x1x32xf32, #tpu.memory_space<vmem>>, %arg13: memref<32x2xf32, #tpu.memory_space<vmem>>, %arg14: memref<1x2xf32, #tpu.memory_space<vmem>>, %arg15: memref<1x16x4xf32, #tpu.memory_space<vmem>>, %arg16: memref<32x32xf32, #tpu.memory_space<vmem>>) attributes {dimension_semantics = [#tpu.dimension_semantics<parallel>], iteration_bounds = array<i64: 2>, scalar_prefetch = 0 : i64, scratch_operands = 1 : i64, tpu.core_type = #tpu.core_type<tc>, window_params = [{transform_indices = @transform_0, window_bounds = array<i64: 1, 16, 4>}, {transform_indices = @transform_1, window_bounds = array<i64: 1, 16, 1>}, {pipeline_mode = #tpu.pipeline_mode<synchronous>, transform_indices = @transform_2, window_bounds = array<i64: 2, 32>}, {pipeline_mode = #tpu.pipeline_mode<synchronous>, transform_indices = @transform_3, window_bounds = array<i64: 1, 32>}, {pipeline_mode = #tpu.pipeline_mode<synchronous>, transform_indices = @transform_4, window_bounds = array<i64: 4, 5, 32, 32>}, {pipeline_mode = #tpu.pipeline_mode<synchronous>, transform_indices = @transform_5, window_bounds = array<i64: 4, 1, 32>}, {pipeline_mode = #tpu.pipeline_mode<synchronous>, transform_indices = @transform_6, window_bounds = array<i64: 4, 5, 32, 32>}, {pipeline_mode = #tpu.pipeline_mode<synchronous>, transform_indices = @transform_7, window_bounds = array<i64: 4, 1, 32>}, {pipeline_mode = #tpu.pipeline_mode<synchronous>, transform_indices = @transform_8, window_bounds = array<i64: 4, 32, 32>}, {pipeline_mode = #tpu.pipeline_mode<synchronous>, transform_indices = @transform_9, window_bounds = array<i64: 4, 1, 32>}, {pipeline_mode = #tpu.pipeline_mode<synchronous>, transform_indices = @transform_10, window_bounds = array<i64: 4, 32, 32>}, {pipeline_mode = #tpu.pipeline_mode<synchronous>, transform_indices = @transform_11, window_bounds = array<i64: 4, 1, 32>}, {pipeline_mode = #tpu.pipeline_mode<synchronous>, transform_indices = @transform_12, window_bounds = array<i64: 32, 2>}, {pipeline_mode = #tpu.pipeline_mode<synchronous>, transform_indices = @transform_13, window_bounds = array<i64: 1, 2>}, {transform_indices = @transform_14, window_bounds = array<i64: 1, 16, 4>}]} {
    %c0 = arith.constant 0 : index
    %c0_0 = arith.constant 0 : index
    %c0_1 = arith.constant 0 : index
    %0 = vector.load %arg1[%c0, %c0_0, %c0_1] : memref<1x16x4xf32, #tpu.memory_space<vmem>>, vector<1x16x4xf32>
    %1 = vector.shape_cast %0 : vector<1x16x4xf32> to vector<16x4xf32>
    %c0_2 = arith.constant 0 : index
    %c0_3 = arith.constant 0 : index
    %c0_4 = arith.constant 0 : index
    %2 = vector.load %arg2[%c0_2, %c0_3, %c0_4] : memref<1x16x1xf32, #tpu.memory_space<vmem>>, vector<1x16x1xf32>
    %3 = vector.shape_cast %2 : vector<1x16x1xf32> to vector<16x1xf32>
    %4 = vector.extract_strided_slice %1 {offsets = [0, 0], sizes = [16, 2], strides = [1, 1]} : vector<16x4xf32> to vector<16x2xf32>
    %5 = vector.extract_strided_slice %1 {offsets = [0, 2], sizes = [16, 2], strides = [1, 1]} : vector<16x4xf32> to vector<16x2xf32>
    %c0_5 = arith.constant 0 : index
    %c0_6 = arith.constant 0 : index
    %6 = vector.load %arg3[%c0_5, %c0_6] : memref<2x32xf32, #tpu.memory_space<vmem>>, vector<2x32xf32>
    %cst = arith.constant dense<0.000000e+00> : vector<16x32xf32>
    %7 = tpu.matmul %4, %6, %cst {dimension_numbers = #tpu.dot_dimension_numbers<[1], [0], [0], [1], [0, 0, 1, 1], [], []>} : vector<16x2xf32>, vector<2x32xf32>, vector<16x32xf32> -> vector<16x32xf32>
    %c0_7 = arith.constant 0 : index
    %c0_8 = arith.constant 0 : index
    %8 = vector.load %arg4[%c0_7, %c0_8] : memref<1x32xf32, #tpu.memory_space<vmem>>, vector<1x32xf32>
    %9 = vector.broadcast %8 : vector<1x32xf32> to vector<16x32xf32>
    %10 = arith.addf %7, %9 : vector<16x32xf32>
    %11 = vector.broadcast %3 : vector<16x1xf32> to vector<16x32xf32>
    %12 = arith.mulf %10, %11 : vector<16x32xf32>
    %cst_9 = arith.constant 0.000000e+00 : f32
    %13 = vector.broadcast %cst_9 : f32 to vector<32x32xf32>
    %c0_10 = arith.constant 0 : index
    %c0_11 = arith.constant 0 : index
    %14 = vector.load %arg16[%c0_10, %c0_11] : memref<32x32xf32, #tpu.memory_space<vmem>>, vector<32x32xf32>
    tpu.vector_store %arg16[%c0_10, %c0_11], %13 {strides = array<i32>} : memref<32x32xf32, #tpu.memory_space<vmem>>, vector<32x32xf32>,
    %cst_12 = arith.constant 0.000000e+00 : f32
    %15 = vector.broadcast %cst_12 : f32 to vector<16x32xf32>
    %c8 = arith.constant 8 : index
    %c0_13 = arith.constant 0 : index
    %16 = vector.load %arg16[%c8, %c0_13] : memref<32x32xf32, #tpu.memory_space<vmem>>, vector<16x32xf32>
    tpu.vector_store %arg16[%c8, %c0_13], %12 {strides = array<i32>} : memref<32x32xf32, #tpu.memory_space<vmem>>, vector<16x32xf32>,
    %cst_14 = arith.constant 0.000000e+00 : f32
    %17 = vector.broadcast %cst_14 : f32 to vector<16x32xf32>
    %c0_15 = arith.constant 0 : index
    %c0_16 = arith.constant 0 : index
    %c0_17 = arith.constant 0 : index
    %18 = vector.load %arg6[%c0_15, %c0_16, %c0_17] : memref<4x1x32xf32, #tpu.memory_space<vmem>>, vector<1x1x32xf32>
    %19 = vector.shape_cast %18 : vector<1x1x32xf32> to vector<1x32xf32>
    %20 = vector.broadcast %19 : vector<1x32xf32> to vector<16x32xf32>
    %21 = arith.addf %17, %20 : vector<16x32xf32>
    %cst_18 = arith.constant 0.000000e+00 : f32
    %22 = vector.broadcast %cst_18 : f32 to vector<16x32xf32>
    %c0_19 = arith.constant 0 : index
    %c0_20 = arith.constant 0 : index
    %c0_21 = arith.constant 0 : index
    %23 = vector.load %arg8[%c0_19, %c0_20, %c0_21] : memref<4x1x32xf32, #tpu.memory_space<vmem>>, vector<1x1x32xf32>
    %24 = vector.shape_cast %23 : vector<1x1x32xf32> to vector<1x32xf32>
    %25 = vector.broadcast %24 : vector<1x32xf32> to vector<16x32xf32>
    %26 = arith.addf %22, %25 : vector<16x32xf32>
    %c6 = arith.constant 6 : index
    %c0_22 = arith.constant 0 : index
    %27 = vector.load %arg16[%c6, %c0_22] : memref<32x32xf32, #tpu.memory_space<vmem>>, vector<16x32xf32>
    %c0_23 = arith.constant 0 : index
    %c0_24 = arith.constant 0 : index
    %c0_25 = arith.constant 0 : index
    %c0_26 = arith.constant 0 : index
    %28 = vector.load %arg5[%c0_23, %c0_24, %c0_25, %c0_26] : memref<4x5x32x32xf32, #tpu.memory_space<vmem>>, vector<1x1x32x32xf32>
    %29 = vector.shape_cast %28 : vector<1x1x32x32xf32> to vector<32x32xf32>
    %cst_27 = arith.constant dense<0.000000e+00> : vector<16x32xf32>
    %30 = tpu.matmul %27, %29, %cst_27 {dimension_numbers = #tpu.dot_dimension_numbers<[1], [0], [0], [1], [0, 0, 1, 1], [], []>} : vector<16x32xf32>, vector<32x32xf32>, vector<16x32xf32> -> vector<16x32xf32>
    %31 = arith.addf %21, %30 : vector<16x32xf32>
    %c0_28 = arith.constant 0 : index
    %c0_29 = arith.constant 0 : index
    %c0_30 = arith.constant 0 : index
    %c0_31 = arith.constant 0 : index
    %32 = vector.load %arg7[%c0_28, %c0_29, %c0_30, %c0_31] : memref<4x5x32x32xf32, #tpu.memory_space<vmem>>, vector<1x1x32x32xf32>
    %33 = vector.shape_cast %32 : vector<1x1x32x32xf32> to vector<32x32xf32>
    %cst_32 = arith.constant dense<0.000000e+00> : vector<16x32xf32>
    %34 = tpu.matmul %27, %33, %cst_32 {dimension_numbers = #tpu.dot_dimension_numbers<[1], [0], [0], [1], [0, 0, 1, 1], [], []>} : vector<16x32xf32>, vector<32x32xf32>, vector<16x32xf32> -> vector<16x32xf32>
    %35 = arith.addf %26, %34 : vector<16x32xf32>
    %c7 = arith.constant 7 : index
    %c0_33 = arith.constant 0 : index
    %36 = vector.load %arg16[%c7, %c0_33] : memref<32x32xf32, #tpu.memory_space<vmem>>, vector<16x32xf32>
    %c0_34 = arith.constant 0 : index
    %c1 = arith.constant 1 : index
    %c0_35 = arith.constant 0 : index
    %c0_36 = arith.constant 0 : index
    %37 = vector.load %arg5[%c0_34, %c1, %c0_35, %c0_36] : memref<4x5x32x32xf32, #tpu.memory_space<vmem>>, vector<1x1x32x32xf32>
    %38 = vector.shape_cast %37 : vector<1x1x32x32xf32> to vector<32x32xf32>
    %cst_37 = arith.constant dense<0.000000e+00> : vector<16x32xf32>
    %39 = tpu.matmul %36, %38, %cst_37 {dimension_numbers = #tpu.dot_dimension_numbers<[1], [0], [0], [1], [0, 0, 1, 1], [], []>} : vector<16x32xf32>, vector<32x32xf32>, vector<16x32xf32> -> vector<16x32xf32>
    %40 = arith.addf %31, %39 : vector<16x32xf32>
    %c0_38 = arith.constant 0 : index
    %c1_39 = arith.constant 1 : index
    %c0_40 = arith.constant 0 : index
    %c0_41 = arith.constant 0 : index
    %41 = vector.load %arg7[%c0_38, %c1_39, %c0_40, %c0_41] : memref<4x5x32x32xf32, #tpu.memory_space<vmem>>, vector<1x1x32x32xf32>
    %42 = vector.shape_cast %41 : vector<1x1x32x32xf32> to vector<32x32xf32>
    %cst_42 = arith.constant dense<0.000000e+00> : vector<16x32xf32>
    %43 = tpu.matmul %36, %42, %cst_42 {dimension_numbers = #tpu.dot_dimension_numbers<[1], [0], [0], [1], [0, 0, 1, 1], [], []>} : vector<16x32xf32>, vector<32x32xf32>, vector<16x32xf32> -> vector<16x32xf32>
    %44 = arith.addf %35, %43 : vector<16x32xf32>
    %c8_43 = arith.constant 8 : index
    %c0_44 = arith.constant 0 : index
    %45 = vector.load %arg16[%c8_43, %c0_44] : memref<32x32xf32, #tpu.memory_space<vmem>>, vector<16x32xf32>
    %c0_45 = arith.constant 0 : index
    %c2 = arith.constant 2 : index
    %c0_46 = arith.constant 0 : index
    %c0_47 = arith.constant 0 : index
    %46 = vector.load %arg5[%c0_45, %c2, %c0_46, %c0_47] : memref<4x5x32x32xf32, #tpu.memory_space<vmem>>, vector<1x1x32x32xf32>
    %47 = vector.shape_cast %46 : vector<1x1x32x32xf32> to vector<32x32xf32>
    %cst_48 = arith.constant dense<0.000000e+00> : vector<16x32xf32>
    %48 = tpu.matmul %45, %47, %cst_48 {dimension_numbers = #tpu.dot_dimension_numbers<[1], [0], [0], [1], [0, 0, 1, 1], [], []>} : vector<16x32xf32>, vector<32x32xf32>, vector<16x32xf32> -> vector<16x32xf32>
    %49 = arith.addf %40, %48 : vector<16x32xf32>
    %c0_49 = arith.constant 0 : index
    %c2_50 = arith.constant 2 : index
    %c0_51 = arith.constant 0 : index
    %c0_52 = arith.constant 0 : index
    %50 = vector.load %arg7[%c0_49, %c2_50, %c0_51, %c0_52] : memref<4x5x32x32xf32, #tpu.memory_space<vmem>>, vector<1x1x32x32xf32>
    %51 = vector.shape_cast %50 : vector<1x1x32x32xf32> to vector<32x32xf32>
    %cst_53 = arith.constant dense<0.000000e+00> : vector<16x32xf32>
    %52 = tpu.matmul %45, %51, %cst_53 {dimension_numbers = #tpu.dot_dimension_numbers<[1], [0], [0], [1], [0, 0, 1, 1], [], []>} : vector<16x32xf32>, vector<32x32xf32>, vector<16x32xf32> -> vector<16x32xf32>
    %53 = arith.addf %44, %52 : vector<16x32xf32>
    %c9 = arith.constant 9 : index
    %c0_54 = arith.constant 0 : index
    %54 = vector.load %arg16[%c9, %c0_54] : memref<32x32xf32, #tpu.memory_space<vmem>>, vector<16x32xf32>
    %c0_55 = arith.constant 0 : index
    %c3 = arith.constant 3 : index
    %c0_56 = arith.constant 0 : index
    %c0_57 = arith.constant 0 : index
    %55 = vector.load %arg5[%c0_55, %c3, %c0_56, %c0_57] : memref<4x5x32x32xf32, #tpu.memory_space<vmem>>, vector<1x1x32x32xf32>
    %56 = vector.shape_cast %55 : vector<1x1x32x32xf32> to vector<32x32xf32>
    %cst_58 = arith.constant dense<0.000000e+00> : vector<16x32xf32>
    %57 = tpu.matmul %54, %56, %cst_58 {dimension_numbers = #tpu.dot_dimension_numbers<[1], [0], [0], [1], [0, 0, 1, 1], [], []>} : vector<16x32xf32>, vector<32x32xf32>, vector<16x32xf32> -> vector<16x32xf32>
    %58 = arith.addf %49, %57 : vector<16x32xf32>
    %c0_59 = arith.constant 0 : index
    %c3_60 = arith.constant 3 : index
    %c0_61 = arith.constant 0 : index
    %c0_62 = arith.constant 0 : index
    %59 = vector.load %arg7[%c0_59, %c3_60, %c0_61, %c0_62] : memref<4x5x32x32xf32, #tpu.memory_space<vmem>>, vector<1x1x32x32xf32>
    %60 = vector.shape_cast %59 : vector<1x1x32x32xf32> to vector<32x32xf32>
    %cst_63 = arith.constant dense<0.000000e+00> : vector<16x32xf32>
    %61 = tpu.matmul %54, %60, %cst_63 {dimension_numbers = #tpu.dot_dimension_numbers<[1], [0], [0], [1], [0, 0, 1, 1], [], []>} : vector<16x32xf32>, vector<32x32xf32>, vector<16x32xf32> -> vector<16x32xf32>
    %62 = arith.addf %53, %61 : vector<16x32xf32>
    %c10 = arith.constant 10 : index
    %c0_64 = arith.constant 0 : index
    %63 = vector.load %arg16[%c10, %c0_64] : memref<32x32xf32, #tpu.memory_space<vmem>>, vector<16x32xf32>
    %c0_65 = arith.constant 0 : index
    %c4 = arith.constant 4 : index
    %c0_66 = arith.constant 0 : index
    %c0_67 = arith.constant 0 : index
    %64 = vector.load %arg5[%c0_65, %c4, %c0_66, %c0_67] : memref<4x5x32x32xf32, #tpu.memory_space<vmem>>, vector<1x1x32x32xf32>
    %65 = vector.shape_cast %64 : vector<1x1x32x32xf32> to vector<32x32xf32>
    %cst_68 = arith.constant dense<0.000000e+00> : vector<16x32xf32>
    %66 = tpu.matmul %63, %65, %cst_68 {dimension_numbers = #tpu.dot_dimension_numbers<[1], [0], [0], [1], [0, 0, 1, 1], [], []>} : vector<16x32xf32>, vector<32x32xf32>, vector<16x32xf32> -> vector<16x32xf32>
    %67 = arith.addf %58, %66 : vector<16x32xf32>
    %c0_69 = arith.constant 0 : index
    %c4_70 = arith.constant 4 : index
    %c0_71 = arith.constant 0 : index
    %c0_72 = arith.constant 0 : index
    %68 = vector.load %arg7[%c0_69, %c4_70, %c0_71, %c0_72] : memref<4x5x32x32xf32, #tpu.memory_space<vmem>>, vector<1x1x32x32xf32>
    %69 = vector.shape_cast %68 : vector<1x1x32x32xf32> to vector<32x32xf32>
    %cst_73 = arith.constant dense<0.000000e+00> : vector<16x32xf32>
    %70 = tpu.matmul %63, %69, %cst_73 {dimension_numbers = #tpu.dot_dimension_numbers<[1], [0], [0], [1], [0, 0, 1, 1], [], []>} : vector<16x32xf32>, vector<32x32xf32>, vector<16x32xf32> -> vector<16x32xf32>
    %71 = arith.addf %62, %70 : vector<16x32xf32>
    %72 = math.tanh %67 : vector<16x32xf32>
    %cst_74 = arith.constant 0.000000e+00 : f32
    %73 = vector.broadcast %cst_74 : f32 to vector<16x32xf32>
    %74 = arith.subf %73, %71 : vector<16x32xf32>
    %75 = math.exp %74 : vector<16x32xf32>
    %cst_75 = arith.constant 1.000000e+00 : f32
    %76 = vector.broadcast %cst_75 : f32 to vector<16x32xf32>
    %77 = arith.addf %76, %75 : vector<16x32xf32>
    %cst_76 = arith.constant 1.000000e+00 : f32
    %78 = vector.broadcast %cst_76 : f32 to vector<16x32xf32>
    %79 = arith.divf %78, %77 : vector<16x32xf32>
    %80 = arith.mulf %72, %79 : vector<16x32xf32>
    %c0_77 = arith.constant 0 : index
    %c0_78 = arith.constant 0 : index
    %c0_79 = arith.constant 0 : index
    %81 = vector.load %arg11[%c0_77, %c0_78, %c0_79] : memref<4x32x32xf32, #tpu.memory_space<vmem>>, vector<1x32x32xf32>
    %82 = vector.shape_cast %81 : vector<1x32x32xf32> to vector<32x32xf32>
    %cst_80 = arith.constant dense<0.000000e+00> : vector<16x32xf32>
    %83 = tpu.matmul %80, %82, %cst_80 {dimension_numbers = #tpu.dot_dimension_numbers<[1], [0], [0], [1], [0, 0, 1, 1], [], []>} : vector<16x32xf32>, vector<32x32xf32>, vector<16x32xf32> -> vector<16x32xf32>
    %84 = arith.addf %15, %83 : vector<16x32xf32>
    %c0_81 = arith.constant 0 : index
    %c0_82 = arith.constant 0 : index
    %c0_83 = arith.constant 0 : index
    %85 = vector.load %arg12[%c0_81, %c0_82, %c0_83] : memref<4x1x32xf32, #tpu.memory_space<vmem>>, vector<1x1x32xf32>
    %86 = vector.shape_cast %85 : vector<1x1x32xf32> to vector<1x32xf32>
    %87 = vector.broadcast %86 : vector<1x32xf32> to vector<16x32xf32>
    %88 = arith.addf %84, %87 : vector<16x32xf32>
    %c0_84 = arith.constant 0 : index
    %c0_85 = arith.constant 0 : index
    %c0_86 = arith.constant 0 : index
    %89 = vector.load %arg9[%c0_84, %c0_85, %c0_86] : memref<4x32x32xf32, #tpu.memory_space<vmem>>, vector<1x32x32xf32>
    %90 = vector.shape_cast %89 : vector<1x32x32xf32> to vector<32x32xf32>
    %cst_87 = arith.constant dense<0.000000e+00> : vector<16x32xf32>
    %91 = tpu.matmul %80, %90, %cst_87 {dimension_numbers = #tpu.dot_dimension_numbers<[1], [0], [0], [1], [0, 0, 1, 1], [], []>} : vector<16x32xf32>, vector<32x32xf32>, vector<16x32xf32> -> vector<16x32xf32>
    %c0_88 = arith.constant 0 : index
    %c0_89 = arith.constant 0 : index
    %c0_90 = arith.constant 0 : index
    %92 = vector.load %arg10[%c0_88, %c0_89, %c0_90] : memref<4x1x32xf32, #tpu.memory_space<vmem>>, vector<1x1x32xf32>
    %93 = vector.shape_cast %92 : vector<1x1x32xf32> to vector<1x32xf32>
    %94 = vector.broadcast %93 : vector<1x32xf32> to vector<16x32xf32>
    %95 = arith.addf %91, %94 : vector<16x32xf32>
    %96 = arith.addf %12, %95 : vector<16x32xf32>
    %97 = vector.broadcast %3 : vector<16x1xf32> to vector<16x32xf32>
    %98 = arith.mulf %96, %97 : vector<16x32xf32>
    %c8_91 = arith.constant 8 : index
    %c0_92 = arith.constant 0 : index
    %99 = vector.load %arg16[%c8_91, %c0_92] : memref<32x32xf32, #tpu.memory_space<vmem>>, vector<16x32xf32>
    tpu.vector_store %arg16[%c8_91, %c0_92], %98 {strides = array<i32>} : memref<32x32xf32, #tpu.memory_space<vmem>>, vector<16x32xf32>,
    %cst_93 = arith.constant 0.000000e+00 : f32
    %100 = vector.broadcast %cst_93 : f32 to vector<16x32xf32>
    %c1_94 = arith.constant 1 : index
    %c0_95 = arith.constant 0 : index
    %c0_96 = arith.constant 0 : index
    %101 = vector.load %arg6[%c1_94, %c0_95, %c0_96] : memref<4x1x32xf32, #tpu.memory_space<vmem>>, vector<1x1x32xf32>
    %102 = vector.shape_cast %101 : vector<1x1x32xf32> to vector<1x32xf32>
    %103 = vector.broadcast %102 : vector<1x32xf32> to vector<16x32xf32>
    %104 = arith.addf %100, %103 : vector<16x32xf32>
    %cst_97 = arith.constant 0.000000e+00 : f32
    %105 = vector.broadcast %cst_97 : f32 to vector<16x32xf32>
    %c1_98 = arith.constant 1 : index
    %c0_99 = arith.constant 0 : index
    %c0_100 = arith.constant 0 : index
    %106 = vector.load %arg8[%c1_98, %c0_99, %c0_100] : memref<4x1x32xf32, #tpu.memory_space<vmem>>, vector<1x1x32xf32>
    %107 = vector.shape_cast %106 : vector<1x1x32xf32> to vector<1x32xf32>
    %108 = vector.broadcast %107 : vector<1x32xf32> to vector<16x32xf32>
    %109 = arith.addf %105, %108 : vector<16x32xf32>
    %c6_101 = arith.constant 6 : index
    %c0_102 = arith.constant 0 : index
    %110 = vector.load %arg16[%c6_101, %c0_102] : memref<32x32xf32, #tpu.memory_space<vmem>>, vector<16x32xf32>
    %c1_103 = arith.constant 1 : index
    %c0_104 = arith.constant 0 : index
    %c0_105 = arith.constant 0 : index
    %c0_106 = arith.constant 0 : index
    %111 = vector.load %arg5[%c1_103, %c0_104, %c0_105, %c0_106] : memref<4x5x32x32xf32, #tpu.memory_space<vmem>>, vector<1x1x32x32xf32>
    %112 = vector.shape_cast %111 : vector<1x1x32x32xf32> to vector<32x32xf32>
    %cst_107 = arith.constant dense<0.000000e+00> : vector<16x32xf32>
    %113 = tpu.matmul %110, %112, %cst_107 {dimension_numbers = #tpu.dot_dimension_numbers<[1], [0], [0], [1], [0, 0, 1, 1], [], []>} : vector<16x32xf32>, vector<32x32xf32>, vector<16x32xf32> -> vector<16x32xf32>
    %114 = arith.addf %104, %113 : vector<16x32xf32>
    %c1_108 = arith.constant 1 : index
    %c0_109 = arith.constant 0 : index
    %c0_110 = arith.constant 0 : index
    %c0_111 = arith.constant 0 : index
    %115 = vector.load %arg7[%c1_108, %c0_109, %c0_110, %c0_111] : memref<4x5x32x32xf32, #tpu.memory_space<vmem>>, vector<1x1x32x32xf32>
    %116 = vector.shape_cast %115 : vector<1x1x32x32xf32> to vector<32x32xf32>
    %cst_112 = arith.constant dense<0.000000e+00> : vector<16x32xf32>
    %117 = tpu.matmul %110, %116, %cst_112 {dimension_numbers = #tpu.dot_dimension_numbers<[1], [0], [0], [1], [0, 0, 1, 1], [], []>} : vector<16x32xf32>, vector<32x32xf32>, vector<16x32xf32> -> vector<16x32xf32>
    %118 = arith.addf %109, %117 : vector<16x32xf32>
    %c7_113 = arith.constant 7 : index
    %c0_114 = arith.constant 0 : index
    %119 = vector.load %arg16[%c7_113, %c0_114] : memref<32x32xf32, #tpu.memory_space<vmem>>, vector<16x32xf32>
    %c1_115 = arith.constant 1 : index
    %c1_116 = arith.constant 1 : index
    %c0_117 = arith.constant 0 : index
    %c0_118 = arith.constant 0 : index
    %120 = vector.load %arg5[%c1_115, %c1_116, %c0_117, %c0_118] : memref<4x5x32x32xf32, #tpu.memory_space<vmem>>, vector<1x1x32x32xf32>
    %121 = vector.shape_cast %120 : vector<1x1x32x32xf32> to vector<32x32xf32>
    %cst_119 = arith.constant dense<0.000000e+00> : vector<16x32xf32>
    %122 = tpu.matmul %119, %121, %cst_119 {dimension_numbers = #tpu.dot_dimension_numbers<[1], [0], [0], [1], [0, 0, 1, 1], [], []>} : vector<16x32xf32>, vector<32x32xf32>, vector<16x32xf32> -> vector<16x32xf32>
    %123 = arith.addf %114, %122 : vector<16x32xf32>
    %c1_120 = arith.constant 1 : index
    %c1_121 = arith.constant 1 : index
    %c0_122 = arith.constant 0 : index
    %c0_123 = arith.constant 0 : index
    %124 = vector.load %arg7[%c1_120, %c1_121, %c0_122, %c0_123] : memref<4x5x32x32xf32, #tpu.memory_space<vmem>>, vector<1x1x32x32xf32>
    %125 = vector.shape_cast %124 : vector<1x1x32x32xf32> to vector<32x32xf32>
    %cst_124 = arith.constant dense<0.000000e+00> : vector<16x32xf32>
    %126 = tpu.matmul %119, %125, %cst_124 {dimension_numbers = #tpu.dot_dimension_numbers<[1], [0], [0], [1], [0, 0, 1, 1], [], []>} : vector<16x32xf32>, vector<32x32xf32>, vector<16x32xf32> -> vector<16x32xf32>
    %127 = arith.addf %118, %126 : vector<16x32xf32>
    %c8_125 = arith.constant 8 : index
    %c0_126 = arith.constant 0 : index
    %128 = vector.load %arg16[%c8_125, %c0_126] : memref<32x32xf32, #tpu.memory_space<vmem>>, vector<16x32xf32>
    %c1_127 = arith.constant 1 : index
    %c2_128 = arith.constant 2 : index
    %c0_129 = arith.constant 0 : index
    %c0_130 = arith.constant 0 : index
    %129 = vector.load %arg5[%c1_127, %c2_128, %c0_129, %c0_130] : memref<4x5x32x32xf32, #tpu.memory_space<vmem>>, vector<1x1x32x32xf32>
    %130 = vector.shape_cast %129 : vector<1x1x32x32xf32> to vector<32x32xf32>
    %cst_131 = arith.constant dense<0.000000e+00> : vector<16x32xf32>
    %131 = tpu.matmul %128, %130, %cst_131 {dimension_numbers = #tpu.dot_dimension_numbers<[1], [0], [0], [1], [0, 0, 1, 1], [], []>} : vector<16x32xf32>, vector<32x32xf32>, vector<16x32xf32> -> vector<16x32xf32>
    %132 = arith.addf %123, %131 : vector<16x32xf32>
    %c1_132 = arith.constant 1 : index
    %c2_133 = arith.constant 2 : index
    %c0_134 = arith.constant 0 : index
    %c0_135 = arith.constant 0 : index
    %133 = vector.load %arg7[%c1_132, %c2_133, %c0_134, %c0_135] : memref<4x5x32x32xf32, #tpu.memory_space<vmem>>, vector<1x1x32x32xf32>
    %134 = vector.shape_cast %133 : vector<1x1x32x32xf32> to vector<32x32xf32>
    %cst_136 = arith.constant dense<0.000000e+00> : vector<16x32xf32>
    %135 = tpu.matmul %128, %134, %cst_136 {dimension_numbers = #tpu.dot_dimension_numbers<[1], [0], [0], [1], [0, 0, 1, 1], [], []>} : vector<16x32xf32>, vector<32x32xf32>, vector<16x32xf32> -> vector<16x32xf32>
    %136 = arith.addf %127, %135 : vector<16x32xf32>
    %c9_137 = arith.constant 9 : index
    %c0_138 = arith.constant 0 : index
    %137 = vector.load %arg16[%c9_137, %c0_138] : memref<32x32xf32, #tpu.memory_space<vmem>>, vector<16x32xf32>
    %c1_139 = arith.constant 1 : index
    %c3_140 = arith.constant 3 : index
    %c0_141 = arith.constant 0 : index
    %c0_142 = arith.constant 0 : index
    %138 = vector.load %arg5[%c1_139, %c3_140, %c0_141, %c0_142] : memref<4x5x32x32xf32, #tpu.memory_space<vmem>>, vector<1x1x32x32xf32>
    %139 = vector.shape_cast %138 : vector<1x1x32x32xf32> to vector<32x32xf32>
    %cst_143 = arith.constant dense<0.000000e+00> : vector<16x32xf32>
    %140 = tpu.matmul %137, %139, %cst_143 {dimension_numbers = #tpu.dot_dimension_numbers<[1], [0], [0], [1], [0, 0, 1, 1], [], []>} : vector<16x32xf32>, vector<32x32xf32>, vector<16x32xf32> -> vector<16x32xf32>
    %141 = arith.addf %132, %140 : vector<16x32xf32>
    %c1_144 = arith.constant 1 : index
    %c3_145 = arith.constant 3 : index
    %c0_146 = arith.constant 0 : index
    %c0_147 = arith.constant 0 : index
    %142 = vector.load %arg7[%c1_144, %c3_145, %c0_146, %c0_147] : memref<4x5x32x32xf32, #tpu.memory_space<vmem>>, vector<1x1x32x32xf32>
    %143 = vector.shape_cast %142 : vector<1x1x32x32xf32> to vector<32x32xf32>
    %cst_148 = arith.constant dense<0.000000e+00> : vector<16x32xf32>
    %144 = tpu.matmul %137, %143, %cst_148 {dimension_numbers = #tpu.dot_dimension_numbers<[1], [0], [0], [1], [0, 0, 1, 1], [], []>} : vector<16x32xf32>, vector<32x32xf32>, vector<16x32xf32> -> vector<16x32xf32>
    %145 = arith.addf %136, %144 : vector<16x32xf32>
    %c10_149 = arith.constant 10 : index
    %c0_150 = arith.constant 0 : index
    %146 = vector.load %arg16[%c10_149, %c0_150] : memref<32x32xf32, #tpu.memory_space<vmem>>, vector<16x32xf32>
    %c1_151 = arith.constant 1 : index
    %c4_152 = arith.constant 4 : index
    %c0_153 = arith.constant 0 : index
    %c0_154 = arith.constant 0 : index
    %147 = vector.load %arg5[%c1_151, %c4_152, %c0_153, %c0_154] : memref<4x5x32x32xf32, #tpu.memory_space<vmem>>, vector<1x1x32x32xf32>
    %148 = vector.shape_cast %147 : vector<1x1x32x32xf32> to vector<32x32xf32>
    %cst_155 = arith.constant dense<0.000000e+00> : vector<16x32xf32>
    %149 = tpu.matmul %146, %148, %cst_155 {dimension_numbers = #tpu.dot_dimension_numbers<[1], [0], [0], [1], [0, 0, 1, 1], [], []>} : vector<16x32xf32>, vector<32x32xf32>, vector<16x32xf32> -> vector<16x32xf32>
    %150 = arith.addf %141, %149 : vector<16x32xf32>
    %c1_156 = arith.constant 1 : index
    %c4_157 = arith.constant 4 : index
    %c0_158 = arith.constant 0 : index
    %c0_159 = arith.constant 0 : index
    %151 = vector.load %arg7[%c1_156, %c4_157, %c0_158, %c0_159] : memref<4x5x32x32xf32, #tpu.memory_space<vmem>>, vector<1x1x32x32xf32>
    %152 = vector.shape_cast %151 : vector<1x1x32x32xf32> to vector<32x32xf32>
    %cst_160 = arith.constant dense<0.000000e+00> : vector<16x32xf32>
    %153 = tpu.matmul %146, %152, %cst_160 {dimension_numbers = #tpu.dot_dimension_numbers<[1], [0], [0], [1], [0, 0, 1, 1], [], []>} : vector<16x32xf32>, vector<32x32xf32>, vector<16x32xf32> -> vector<16x32xf32>
    %154 = arith.addf %145, %153 : vector<16x32xf32>
    %155 = math.tanh %150 : vector<16x32xf32>
    %cst_161 = arith.constant 0.000000e+00 : f32
    %156 = vector.broadcast %cst_161 : f32 to vector<16x32xf32>
    %157 = arith.subf %156, %154 : vector<16x32xf32>
    %158 = math.exp %157 : vector<16x32xf32>
    %cst_162 = arith.constant 1.000000e+00 : f32
    %159 = vector.broadcast %cst_162 : f32 to vector<16x32xf32>
    %160 = arith.addf %159, %158 : vector<16x32xf32>
    %cst_163 = arith.constant 1.000000e+00 : f32
    %161 = vector.broadcast %cst_163 : f32 to vector<16x32xf32>
    %162 = arith.divf %161, %160 : vector<16x32xf32>
    %163 = arith.mulf %155, %162 : vector<16x32xf32>
    %c1_164 = arith.constant 1 : index
    %c0_165 = arith.constant 0 : index
    %c0_166 = arith.constant 0 : index
    %164 = vector.load %arg11[%c1_164, %c0_165, %c0_166] : memref<4x32x32xf32, #tpu.memory_space<vmem>>, vector<1x32x32xf32>
    %165 = vector.shape_cast %164 : vector<1x32x32xf32> to vector<32x32xf32>
    %cst_167 = arith.constant dense<0.000000e+00> : vector<16x32xf32>
    %166 = tpu.matmul %163, %165, %cst_167 {dimension_numbers = #tpu.dot_dimension_numbers<[1], [0], [0], [1], [0, 0, 1, 1], [], []>} : vector<16x32xf32>, vector<32x32xf32>, vector<16x32xf32> -> vector<16x32xf32>
    %167 = arith.addf %88, %166 : vector<16x32xf32>
    %c1_168 = arith.constant 1 : index
    %c0_169 = arith.constant 0 : index
    %c0_170 = arith.constant 0 : index
    %168 = vector.load %arg12[%c1_168, %c0_169, %c0_170] : memref<4x1x32xf32, #tpu.memory_space<vmem>>, vector<1x1x32xf32>
    %169 = vector.shape_cast %168 : vector<1x1x32xf32> to vector<1x32xf32>
    %170 = vector.broadcast %169 : vector<1x32xf32> to vector<16x32xf32>
    %171 = arith.addf %167, %170 : vector<16x32xf32>
    %c1_171 = arith.constant 1 : index
    %c0_172 = arith.constant 0 : index
    %c0_173 = arith.constant 0 : index
    %172 = vector.load %arg9[%c1_171, %c0_172, %c0_173] : memref<4x32x32xf32, #tpu.memory_space<vmem>>, vector<1x32x32xf32>
    %173 = vector.shape_cast %172 : vector<1x32x32xf32> to vector<32x32xf32>
    %cst_174 = arith.constant dense<0.000000e+00> : vector<16x32xf32>
    %174 = tpu.matmul %163, %173, %cst_174 {dimension_numbers = #tpu.dot_dimension_numbers<[1], [0], [0], [1], [0, 0, 1, 1], [], []>} : vector<16x32xf32>, vector<32x32xf32>, vector<16x32xf32> -> vector<16x32xf32>
    %c1_175 = arith.constant 1 : index
    %c0_176 = arith.constant 0 : index
    %c0_177 = arith.constant 0 : index
    %175 = vector.load %arg10[%c1_175, %c0_176, %c0_177] : memref<4x1x32xf32, #tpu.memory_space<vmem>>, vector<1x1x32xf32>
    %176 = vector.shape_cast %175 : vector<1x1x32xf32> to vector<1x32xf32>
    %177 = vector.broadcast %176 : vector<1x32xf32> to vector<16x32xf32>
    %178 = arith.addf %174, %177 : vector<16x32xf32>
    %179 = arith.addf %98, %178 : vector<16x32xf32>
    %180 = vector.broadcast %3 : vector<16x1xf32> to vector<16x32xf32>
    %181 = arith.mulf %179, %180 : vector<16x32xf32>
    %c8_178 = arith.constant 8 : index
    %c0_179 = arith.constant 0 : index
    %182 = vector.load %arg16[%c8_178, %c0_179] : memref<32x32xf32, #tpu.memory_space<vmem>>, vector<16x32xf32>
    tpu.vector_store %arg16[%c8_178, %c0_179], %181 {strides = array<i32>} : memref<32x32xf32, #tpu.memory_space<vmem>>, vector<16x32xf32>,
    %cst_180 = arith.constant 0.000000e+00 : f32
    %183 = vector.broadcast %cst_180 : f32 to vector<16x32xf32>
    %c2_181 = arith.constant 2 : index
    %c0_182 = arith.constant 0 : index
    %c0_183 = arith.constant 0 : index
    %184 = vector.load %arg6[%c2_181, %c0_182, %c0_183] : memref<4x1x32xf32, #tpu.memory_space<vmem>>, vector<1x1x32xf32>
    %185 = vector.shape_cast %184 : vector<1x1x32xf32> to vector<1x32xf32>
    %186 = vector.broadcast %185 : vector<1x32xf32> to vector<16x32xf32>
    %187 = arith.addf %183, %186 : vector<16x32xf32>
    %cst_184 = arith.constant 0.000000e+00 : f32
    %188 = vector.broadcast %cst_184 : f32 to vector<16x32xf32>
    %c2_185 = arith.constant 2 : index
    %c0_186 = arith.constant 0 : index
    %c0_187 = arith.constant 0 : index
    %189 = vector.load %arg8[%c2_185, %c0_186, %c0_187] : memref<4x1x32xf32, #tpu.memory_space<vmem>>, vector<1x1x32xf32>
    %190 = vector.shape_cast %189 : vector<1x1x32xf32> to vector<1x32xf32>
    %191 = vector.broadcast %190 : vector<1x32xf32> to vector<16x32xf32>
    %192 = arith.addf %188, %191 : vector<16x32xf32>
    %c6_188 = arith.constant 6 : index
    %c0_189 = arith.constant 0 : index
    %193 = vector.load %arg16[%c6_188, %c0_189] : memref<32x32xf32, #tpu.memory_space<vmem>>, vector<16x32xf32>
    %c2_190 = arith.constant 2 : index
    %c0_191 = arith.constant 0 : index
    %c0_192 = arith.constant 0 : index
    %c0_193 = arith.constant 0 : index
    %194 = vector.load %arg5[%c2_190, %c0_191, %c0_192, %c0_193] : memref<4x5x32x32xf32, #tpu.memory_space<vmem>>, vector<1x1x32x32xf32>
    %195 = vector.shape_cast %194 : vector<1x1x32x32xf32> to vector<32x32xf32>
    %cst_194 = arith.constant dense<0.000000e+00> : vector<16x32xf32>
    %196 = tpu.matmul %193, %195, %cst_194 {dimension_numbers = #tpu.dot_dimension_numbers<[1], [0], [0], [1], [0, 0, 1, 1], [], []>} : vector<16x32xf32>, vector<32x32xf32>, vector<16x32xf32> -> vector<16x32xf32>
    %197 = arith.addf %187, %196 : vector<16x32xf32>
    %c2_195 = arith.constant 2 : index
    %c0_196 = arith.constant 0 : index
    %c0_197 = arith.constant 0 : index
    %c0_198 = arith.constant 0 : index
    %198 = vector.load %arg7[%c2_195, %c0_196, %c0_197, %c0_198] : memref<4x5x32x32xf32, #tpu.memory_space<vmem>>, vector<1x1x32x32xf32>
    %199 = vector.shape_cast %198 : vector<1x1x32x32xf32> to vector<32x32xf32>
    %cst_199 = arith.constant dense<0.000000e+00> : vector<16x32xf32>
    %200 = tpu.matmul %193, %199, %cst_199 {dimension_numbers = #tpu.dot_dimension_numbers<[1], [0], [0], [1], [0, 0, 1, 1], [], []>} : vector<16x32xf32>, vector<32x32xf32>, vector<16x32xf32> -> vector<16x32xf32>
    %201 = arith.addf %192, %200 : vector<16x32xf32>
    %c7_200 = arith.constant 7 : index
    %c0_201 = arith.constant 0 : index
    %202 = vector.load %arg16[%c7_200, %c0_201] : memref<32x32xf32, #tpu.memory_space<vmem>>, vector<16x32xf32>
    %c2_202 = arith.constant 2 : index
    %c1_203 = arith.constant 1 : index
    %c0_204 = arith.constant 0 : index
    %c0_205 = arith.constant 0 : index
    %203 = vector.load %arg5[%c2_202, %c1_203, %c0_204, %c0_205] : memref<4x5x32x32xf32, #tpu.memory_space<vmem>>, vector<1x1x32x32xf32>
    %204 = vector.shape_cast %203 : vector<1x1x32x32xf32> to vector<32x32xf32>
    %cst_206 = arith.constant dense<0.000000e+00> : vector<16x32xf32>
    %205 = tpu.matmul %202, %204, %cst_206 {dimension_numbers = #tpu.dot_dimension_numbers<[1], [0], [0], [1], [0, 0, 1, 1], [], []>} : vector<16x32xf32>, vector<32x32xf32>, vector<16x32xf32> -> vector<16x32xf32>
    %206 = arith.addf %197, %205 : vector<16x32xf32>
    %c2_207 = arith.constant 2 : index
    %c1_208 = arith.constant 1 : index
    %c0_209 = arith.constant 0 : index
    %c0_210 = arith.constant 0 : index
    %207 = vector.load %arg7[%c2_207, %c1_208, %c0_209, %c0_210] : memref<4x5x32x32xf32, #tpu.memory_space<vmem>>, vector<1x1x32x32xf32>
    %208 = vector.shape_cast %207 : vector<1x1x32x32xf32> to vector<32x32xf32>
    %cst_211 = arith.constant dense<0.000000e+00> : vector<16x32xf32>
    %209 = tpu.matmul %202, %208, %cst_211 {dimension_numbers = #tpu.dot_dimension_numbers<[1], [0], [0], [1], [0, 0, 1, 1], [], []>} : vector<16x32xf32>, vector<32x32xf32>, vector<16x32xf32> -> vector<16x32xf32>
    %210 = arith.addf %201, %209 : vector<16x32xf32>
    %c8_212 = arith.constant 8 : index
    %c0_213 = arith.constant 0 : index
    %211 = vector.load %arg16[%c8_212, %c0_213] : memref<32x32xf32, #tpu.memory_space<vmem>>, vector<16x32xf32>
    %c2_214 = arith.constant 2 : index
    %c2_215 = arith.constant 2 : index
    %c0_216 = arith.constant 0 : index
    %c0_217 = arith.constant 0 : index
    %212 = vector.load %arg5[%c2_214, %c2_215, %c0_216, %c0_217] : memref<4x5x32x32xf32, #tpu.memory_space<vmem>>, vector<1x1x32x32xf32>
    %213 = vector.shape_cast %212 : vector<1x1x32x32xf32> to vector<32x32xf32>
    %cst_218 = arith.constant dense<0.000000e+00> : vector<16x32xf32>
    %214 = tpu.matmul %211, %213, %cst_218 {dimension_numbers = #tpu.dot_dimension_numbers<[1], [0], [0], [1], [0, 0, 1, 1], [], []>} : vector<16x32xf32>, vector<32x32xf32>, vector<16x32xf32> -> vector<16x32xf32>
    %215 = arith.addf %206, %214 : vector<16x32xf32>
    %c2_219 = arith.constant 2 : index
    %c2_220 = arith.constant 2 : index
    %c0_221 = arith.constant 0 : index
    %c0_222 = arith.constant 0 : index
    %216 = vector.load %arg7[%c2_219, %c2_220, %c0_221, %c0_222] : memref<4x5x32x32xf32, #tpu.memory_space<vmem>>, vector<1x1x32x32xf32>
    %217 = vector.shape_cast %216 : vector<1x1x32x32xf32> to vector<32x32xf32>
    %cst_223 = arith.constant dense<0.000000e+00> : vector<16x32xf32>
    %218 = tpu.matmul %211, %217, %cst_223 {dimension_numbers = #tpu.dot_dimension_numbers<[1], [0], [0], [1], [0, 0, 1, 1], [], []>} : vector<16x32xf32>, vector<32x32xf32>, vector<16x32xf32> -> vector<16x32xf32>
    %219 = arith.addf %210, %218 : vector<16x32xf32>
    %c9_224 = arith.constant 9 : index
    %c0_225 = arith.constant 0 : index
    %220 = vector.load %arg16[%c9_224, %c0_225] : memref<32x32xf32, #tpu.memory_space<vmem>>, vector<16x32xf32>
    %c2_226 = arith.constant 2 : index
    %c3_227 = arith.constant 3 : index
    %c0_228 = arith.constant 0 : index
    %c0_229 = arith.constant 0 : index
    %221 = vector.load %arg5[%c2_226, %c3_227, %c0_228, %c0_229] : memref<4x5x32x32xf32, #tpu.memory_space<vmem>>, vector<1x1x32x32xf32>
    %222 = vector.shape_cast %221 : vector<1x1x32x32xf32> to vector<32x32xf32>
    %cst_230 = arith.constant dense<0.000000e+00> : vector<16x32xf32>
    %223 = tpu.matmul %220, %222, %cst_230 {dimension_numbers = #tpu.dot_dimension_numbers<[1], [0], [0], [1], [0, 0, 1, 1], [], []>} : vector<16x32xf32>, vector<32x32xf32>, vector<16x32xf32> -> vector<16x32xf32>
    %224 = arith.addf %215, %223 : vector<16x32xf32>
    %c2_231 = arith.constant 2 : index
    %c3_232 = arith.constant 3 : index
    %c0_233 = arith.constant 0 : index
    %c0_234 = arith.constant 0 : index
    %225 = vector.load %arg7[%c2_231, %c3_232, %c0_233, %c0_234] : memref<4x5x32x32xf32, #tpu.memory_space<vmem>>, vector<1x1x32x32xf32>
    %226 = vector.shape_cast %225 : vector<1x1x32x32xf32> to vector<32x32xf32>
    %cst_235 = arith.constant dense<0.000000e+00> : vector<16x32xf32>
    %227 = tpu.matmul %220, %226, %cst_235 {dimension_numbers = #tpu.dot_dimension_numbers<[1], [0], [0], [1], [0, 0, 1, 1], [], []>} : vector<16x32xf32>, vector<32x32xf32>, vector<16x32xf32> -> vector<16x32xf32>
    %228 = arith.addf %219, %227 : vector<16x32xf32>
    %c10_236 = arith.constant 10 : index
    %c0_237 = arith.constant 0 : index
    %229 = vector.load %arg16[%c10_236, %c0_237] : memref<32x32xf32, #tpu.memory_space<vmem>>, vector<16x32xf32>
    %c2_238 = arith.constant 2 : index
    %c4_239 = arith.constant 4 : index
    %c0_240 = arith.constant 0 : index
    %c0_241 = arith.constant 0 : index
    %230 = vector.load %arg5[%c2_238, %c4_239, %c0_240, %c0_241] : memref<4x5x32x32xf32, #tpu.memory_space<vmem>>, vector<1x1x32x32xf32>
    %231 = vector.shape_cast %230 : vector<1x1x32x32xf32> to vector<32x32xf32>
    %cst_242 = arith.constant dense<0.000000e+00> : vector<16x32xf32>
    %232 = tpu.matmul %229, %231, %cst_242 {dimension_numbers = #tpu.dot_dimension_numbers<[1], [0], [0], [1], [0, 0, 1, 1], [], []>} : vector<16x32xf32>, vector<32x32xf32>, vector<16x32xf32> -> vector<16x32xf32>
    %233 = arith.addf %224, %232 : vector<16x32xf32>
    %c2_243 = arith.constant 2 : index
    %c4_244 = arith.constant 4 : index
    %c0_245 = arith.constant 0 : index
    %c0_246 = arith.constant 0 : index
    %234 = vector.load %arg7[%c2_243, %c4_244, %c0_245, %c0_246] : memref<4x5x32x32xf32, #tpu.memory_space<vmem>>, vector<1x1x32x32xf32>
    %235 = vector.shape_cast %234 : vector<1x1x32x32xf32> to vector<32x32xf32>
    %cst_247 = arith.constant dense<0.000000e+00> : vector<16x32xf32>
    %236 = tpu.matmul %229, %235, %cst_247 {dimension_numbers = #tpu.dot_dimension_numbers<[1], [0], [0], [1], [0, 0, 1, 1], [], []>} : vector<16x32xf32>, vector<32x32xf32>, vector<16x32xf32> -> vector<16x32xf32>
    %237 = arith.addf %228, %236 : vector<16x32xf32>
    %238 = math.tanh %233 : vector<16x32xf32>
    %cst_248 = arith.constant 0.000000e+00 : f32
    %239 = vector.broadcast %cst_248 : f32 to vector<16x32xf32>
    %240 = arith.subf %239, %237 : vector<16x32xf32>
    %241 = math.exp %240 : vector<16x32xf32>
    %cst_249 = arith.constant 1.000000e+00 : f32
    %242 = vector.broadcast %cst_249 : f32 to vector<16x32xf32>
    %243 = arith.addf %242, %241 : vector<16x32xf32>
    %cst_250 = arith.constant 1.000000e+00 : f32
    %244 = vector.broadcast %cst_250 : f32 to vector<16x32xf32>
    %245 = arith.divf %244, %243 : vector<16x32xf32>
    %246 = arith.mulf %238, %245 : vector<16x32xf32>
    %c2_251 = arith.constant 2 : index
    %c0_252 = arith.constant 0 : index
    %c0_253 = arith.constant 0 : index
    %247 = vector.load %arg11[%c2_251, %c0_252, %c0_253] : memref<4x32x32xf32, #tpu.memory_space<vmem>>, vector<1x32x32xf32>
    %248 = vector.shape_cast %247 : vector<1x32x32xf32> to vector<32x32xf32>
    %cst_254 = arith.constant dense<0.000000e+00> : vector<16x32xf32>
    %249 = tpu.matmul %246, %248, %cst_254 {dimension_numbers = #tpu.dot_dimension_numbers<[1], [0], [0], [1], [0, 0, 1, 1], [], []>} : vector<16x32xf32>, vector<32x32xf32>, vector<16x32xf32> -> vector<16x32xf32>
    %250 = arith.addf %171, %249 : vector<16x32xf32>
    %c2_255 = arith.constant 2 : index
    %c0_256 = arith.constant 0 : index
    %c0_257 = arith.constant 0 : index
    %251 = vector.load %arg12[%c2_255, %c0_256, %c0_257] : memref<4x1x32xf32, #tpu.memory_space<vmem>>, vector<1x1x32xf32>
    %252 = vector.shape_cast %251 : vector<1x1x32xf32> to vector<1x32xf32>
    %253 = vector.broadcast %252 : vector<1x32xf32> to vector<16x32xf32>
    %254 = arith.addf %250, %253 : vector<16x32xf32>
    %c2_258 = arith.constant 2 : index
    %c0_259 = arith.constant 0 : index
    %c0_260 = arith.constant 0 : index
    %255 = vector.load %arg9[%c2_258, %c0_259, %c0_260] : memref<4x32x32xf32, #tpu.memory_space<vmem>>, vector<1x32x32xf32>
    %256 = vector.shape_cast %255 : vector<1x32x32xf32> to vector<32x32xf32>
    %cst_261 = arith.constant dense<0.000000e+00> : vector<16x32xf32>
    %257 = tpu.matmul %246, %256, %cst_261 {dimension_numbers = #tpu.dot_dimension_numbers<[1], [0], [0], [1], [0, 0, 1, 1], [], []>} : vector<16x32xf32>, vector<32x32xf32>, vector<16x32xf32> -> vector<16x32xf32>
    %c2_262 = arith.constant 2 : index
    %c0_263 = arith.constant 0 : index
    %c0_264 = arith.constant 0 : index
    %258 = vector.load %arg10[%c2_262, %c0_263, %c0_264] : memref<4x1x32xf32, #tpu.memory_space<vmem>>, vector<1x1x32xf32>
    %259 = vector.shape_cast %258 : vector<1x1x32xf32> to vector<1x32xf32>
    %260 = vector.broadcast %259 : vector<1x32xf32> to vector<16x32xf32>
    %261 = arith.addf %257, %260 : vector<16x32xf32>
    %262 = arith.addf %181, %261 : vector<16x32xf32>
    %263 = vector.broadcast %3 : vector<16x1xf32> to vector<16x32xf32>
    %264 = arith.mulf %262, %263 : vector<16x32xf32>
    %c8_265 = arith.constant 8 : index
    %c0_266 = arith.constant 0 : index
    %265 = vector.load %arg16[%c8_265, %c0_266] : memref<32x32xf32, #tpu.memory_space<vmem>>, vector<16x32xf32>
    tpu.vector_store %arg16[%c8_265, %c0_266], %264 {strides = array<i32>} : memref<32x32xf32, #tpu.memory_space<vmem>>, vector<16x32xf32>,
    %cst_267 = arith.constant 0.000000e+00 : f32
    %266 = vector.broadcast %cst_267 : f32 to vector<16x32xf32>
    %c3_268 = arith.constant 3 : index
    %c0_269 = arith.constant 0 : index
    %c0_270 = arith.constant 0 : index
    %267 = vector.load %arg6[%c3_268, %c0_269, %c0_270] : memref<4x1x32xf32, #tpu.memory_space<vmem>>, vector<1x1x32xf32>
    %268 = vector.shape_cast %267 : vector<1x1x32xf32> to vector<1x32xf32>
    %269 = vector.broadcast %268 : vector<1x32xf32> to vector<16x32xf32>
    %270 = arith.addf %266, %269 : vector<16x32xf32>
    %cst_271 = arith.constant 0.000000e+00 : f32
    %271 = vector.broadcast %cst_271 : f32 to vector<16x32xf32>
    %c3_272 = arith.constant 3 : index
    %c0_273 = arith.constant 0 : index
    %c0_274 = arith.constant 0 : index
    %272 = vector.load %arg8[%c3_272, %c0_273, %c0_274] : memref<4x1x32xf32, #tpu.memory_space<vmem>>, vector<1x1x32xf32>
    %273 = vector.shape_cast %272 : vector<1x1x32xf32> to vector<1x32xf32>
    %274 = vector.broadcast %273 : vector<1x32xf32> to vector<16x32xf32>
    %275 = arith.addf %271, %274 : vector<16x32xf32>
    %c6_275 = arith.constant 6 : index
    %c0_276 = arith.constant 0 : index
    %276 = vector.load %arg16[%c6_275, %c0_276] : memref<32x32xf32, #tpu.memory_space<vmem>>, vector<16x32xf32>
    %c3_277 = arith.constant 3 : index
    %c0_278 = arith.constant 0 : index
    %c0_279 = arith.constant 0 : index
    %c0_280 = arith.constant 0 : index
    %277 = vector.load %arg5[%c3_277, %c0_278, %c0_279, %c0_280] : memref<4x5x32x32xf32, #tpu.memory_space<vmem>>, vector<1x1x32x32xf32>
    %278 = vector.shape_cast %277 : vector<1x1x32x32xf32> to vector<32x32xf32>
    %cst_281 = arith.constant dense<0.000000e+00> : vector<16x32xf32>
    %279 = tpu.matmul %276, %278, %cst_281 {dimension_numbers = #tpu.dot_dimension_numbers<[1], [0], [0], [1], [0, 0, 1, 1], [], []>} : vector<16x32xf32>, vector<32x32xf32>, vector<16x32xf32> -> vector<16x32xf32>
    %280 = arith.addf %270, %279 : vector<16x32xf32>
    %c3_282 = arith.constant 3 : index
    %c0_283 = arith.constant 0 : index
    %c0_284 = arith.constant 0 : index
    %c0_285 = arith.constant 0 : index
    %281 = vector.load %arg7[%c3_282, %c0_283, %c0_284, %c0_285] : memref<4x5x32x32xf32, #tpu.memory_space<vmem>>, vector<1x1x32x32xf32>
    %282 = vector.shape_cast %281 : vector<1x1x32x32xf32> to vector<32x32xf32>
    %cst_286 = arith.constant dense<0.000000e+00> : vector<16x32xf32>
    %283 = tpu.matmul %276, %282, %cst_286 {dimension_numbers = #tpu.dot_dimension_numbers<[1], [0], [0], [1], [0, 0, 1, 1], [], []>} : vector<16x32xf32>, vector<32x32xf32>, vector<16x32xf32> -> vector<16x32xf32>
    %284 = arith.addf %275, %283 : vector<16x32xf32>
    %c7_287 = arith.constant 7 : index
    %c0_288 = arith.constant 0 : index
    %285 = vector.load %arg16[%c7_287, %c0_288] : memref<32x32xf32, #tpu.memory_space<vmem>>, vector<16x32xf32>
    %c3_289 = arith.constant 3 : index
    %c1_290 = arith.constant 1 : index
    %c0_291 = arith.constant 0 : index
    %c0_292 = arith.constant 0 : index
    %286 = vector.load %arg5[%c3_289, %c1_290, %c0_291, %c0_292] : memref<4x5x32x32xf32, #tpu.memory_space<vmem>>, vector<1x1x32x32xf32>
    %287 = vector.shape_cast %286 : vector<1x1x32x32xf32> to vector<32x32xf32>
    %cst_293 = arith.constant dense<0.000000e+00> : vector<16x32xf32>
    %288 = tpu.matmul %285, %287, %cst_293 {dimension_numbers = #tpu.dot_dimension_numbers<[1], [0], [0], [1], [0, 0, 1, 1], [], []>} : vector<16x32xf32>, vector<32x32xf32>, vector<16x32xf32> -> vector<16x32xf32>
    %289 = arith.addf %280, %288 : vector<16x32xf32>
    %c3_294 = arith.constant 3 : index
    %c1_295 = arith.constant 1 : index
    %c0_296 = arith.constant 0 : index
    %c0_297 = arith.constant 0 : index
    %290 = vector.load %arg7[%c3_294, %c1_295, %c0_296, %c0_297] : memref<4x5x32x32xf32, #tpu.memory_space<vmem>>, vector<1x1x32x32xf32>
    %291 = vector.shape_cast %290 : vector<1x1x32x32xf32> to vector<32x32xf32>
    %cst_298 = arith.constant dense<0.000000e+00> : vector<16x32xf32>
    %292 = tpu.matmul %285, %291, %cst_298 {dimension_numbers = #tpu.dot_dimension_numbers<[1], [0], [0], [1], [0, 0, 1, 1], [], []>} : vector<16x32xf32>, vector<32x32xf32>, vector<16x32xf32> -> vector<16x32xf32>
    %293 = arith.addf %284, %292 : vector<16x32xf32>
    %c8_299 = arith.constant 8 : index
    %c0_300 = arith.constant 0 : index
    %294 = vector.load %arg16[%c8_299, %c0_300] : memref<32x32xf32, #tpu.memory_space<vmem>>, vector<16x32xf32>
    %c3_301 = arith.constant 3 : index
    %c2_302 = arith.constant 2 : index
    %c0_303 = arith.constant 0 : index
    %c0_304 = arith.constant 0 : index
    %295 = vector.load %arg5[%c3_301, %c2_302, %c0_303, %c0_304] : memref<4x5x32x32xf32, #tpu.memory_space<vmem>>, vector<1x1x32x32xf32>
    %296 = vector.shape_cast %295 : vector<1x1x32x32xf32> to vector<32x32xf32>
    %cst_305 = arith.constant dense<0.000000e+00> : vector<16x32xf32>
    %297 = tpu.matmul %294, %296, %cst_305 {dimension_numbers = #tpu.dot_dimension_numbers<[1], [0], [0], [1], [0, 0, 1, 1], [], []>} : vector<16x32xf32>, vector<32x32xf32>, vector<16x32xf32> -> vector<16x32xf32>
    %298 = arith.addf %289, %297 : vector<16x32xf32>
    %c3_306 = arith.constant 3 : index
    %c2_307 = arith.constant 2 : index
    %c0_308 = arith.constant 0 : index
    %c0_309 = arith.constant 0 : index
    %299 = vector.load %arg7[%c3_306, %c2_307, %c0_308, %c0_309] : memref<4x5x32x32xf32, #tpu.memory_space<vmem>>, vector<1x1x32x32xf32>
    %300 = vector.shape_cast %299 : vector<1x1x32x32xf32> to vector<32x32xf32>
    %cst_310 = arith.constant dense<0.000000e+00> : vector<16x32xf32>
    %301 = tpu.matmul %294, %300, %cst_310 {dimension_numbers = #tpu.dot_dimension_numbers<[1], [0], [0], [1], [0, 0, 1, 1], [], []>} : vector<16x32xf32>, vector<32x32xf32>, vector<16x32xf32> -> vector<16x32xf32>
    %302 = arith.addf %293, %301 : vector<16x32xf32>
    %c9_311 = arith.constant 9 : index
    %c0_312 = arith.constant 0 : index
    %303 = vector.load %arg16[%c9_311, %c0_312] : memref<32x32xf32, #tpu.memory_space<vmem>>, vector<16x32xf32>
    %c3_313 = arith.constant 3 : index
    %c3_314 = arith.constant 3 : index
    %c0_315 = arith.constant 0 : index
    %c0_316 = arith.constant 0 : index
    %304 = vector.load %arg5[%c3_313, %c3_314, %c0_315, %c0_316] : memref<4x5x32x32xf32, #tpu.memory_space<vmem>>, vector<1x1x32x32xf32>
    %305 = vector.shape_cast %304 : vector<1x1x32x32xf32> to vector<32x32xf32>
    %cst_317 = arith.constant dense<0.000000e+00> : vector<16x32xf32>
    %306 = tpu.matmul %303, %305, %cst_317 {dimension_numbers = #tpu.dot_dimension_numbers<[1], [0], [0], [1], [0, 0, 1, 1], [], []>} : vector<16x32xf32>, vector<32x32xf32>, vector<16x32xf32> -> vector<16x32xf32>
    %307 = arith.addf %298, %306 : vector<16x32xf32>
    %c3_318 = arith.constant 3 : index
    %c3_319 = arith.constant 3 : index
    %c0_320 = arith.constant 0 : index
    %c0_321 = arith.constant 0 : index
    %308 = vector.load %arg7[%c3_318, %c3_319, %c0_320, %c0_321] : memref<4x5x32x32xf32, #tpu.memory_space<vmem>>, vector<1x1x32x32xf32>
    %309 = vector.shape_cast %308 : vector<1x1x32x32xf32> to vector<32x32xf32>
    %cst_322 = arith.constant dense<0.000000e+00> : vector<16x32xf32>
    %310 = tpu.matmul %303, %309, %cst_322 {dimension_numbers = #tpu.dot_dimension_numbers<[1], [0], [0], [1], [0, 0, 1, 1], [], []>} : vector<16x32xf32>, vector<32x32xf32>, vector<16x32xf32> -> vector<16x32xf32>
    %311 = arith.addf %302, %310 : vector<16x32xf32>
    %c10_323 = arith.constant 10 : index
    %c0_324 = arith.constant 0 : index
    %312 = vector.load %arg16[%c10_323, %c0_324] : memref<32x32xf32, #tpu.memory_space<vmem>>, vector<16x32xf32>
    %c3_325 = arith.constant 3 : index
    %c4_326 = arith.constant 4 : index
    %c0_327 = arith.constant 0 : index
    %c0_328 = arith.constant 0 : index
    %313 = vector.load %arg5[%c3_325, %c4_326, %c0_327, %c0_328] : memref<4x5x32x32xf32, #tpu.memory_space<vmem>>, vector<1x1x32x32xf32>
    %314 = vector.shape_cast %313 : vector<1x1x32x32xf32> to vector<32x32xf32>
    %cst_329 = arith.constant dense<0.000000e+00> : vector<16x32xf32>
    %315 = tpu.matmul %312, %314, %cst_329 {dimension_numbers = #tpu.dot_dimension_numbers<[1], [0], [0], [1], [0, 0, 1, 1], [], []>} : vector<16x32xf32>, vector<32x32xf32>, vector<16x32xf32> -> vector<16x32xf32>
    %316 = arith.addf %307, %315 : vector<16x32xf32>
    %c3_330 = arith.constant 3 : index
    %c4_331 = arith.constant 4 : index
    %c0_332 = arith.constant 0 : index
    %c0_333 = arith.constant 0 : index
    %317 = vector.load %arg7[%c3_330, %c4_331, %c0_332, %c0_333] : memref<4x5x32x32xf32, #tpu.memory_space<vmem>>, vector<1x1x32x32xf32>
    %318 = vector.shape_cast %317 : vector<1x1x32x32xf32> to vector<32x32xf32>
    %cst_334 = arith.constant dense<0.000000e+00> : vector<16x32xf32>
    %319 = tpu.matmul %312, %318, %cst_334 {dimension_numbers = #tpu.dot_dimension_numbers<[1], [0], [0], [1], [0, 0, 1, 1], [], []>} : vector<16x32xf32>, vector<32x32xf32>, vector<16x32xf32> -> vector<16x32xf32>
    %320 = arith.addf %311, %319 : vector<16x32xf32>
    %321 = math.tanh %316 : vector<16x32xf32>
    %cst_335 = arith.constant 0.000000e+00 : f32
    %322 = vector.broadcast %cst_335 : f32 to vector<16x32xf32>
    %323 = arith.subf %322, %320 : vector<16x32xf32>
    %324 = math.exp %323 : vector<16x32xf32>
    %cst_336 = arith.constant 1.000000e+00 : f32
    %325 = vector.broadcast %cst_336 : f32 to vector<16x32xf32>
    %326 = arith.addf %325, %324 : vector<16x32xf32>
    %cst_337 = arith.constant 1.000000e+00 : f32
    %327 = vector.broadcast %cst_337 : f32 to vector<16x32xf32>
    %328 = arith.divf %327, %326 : vector<16x32xf32>
    %329 = arith.mulf %321, %328 : vector<16x32xf32>
    %c3_338 = arith.constant 3 : index
    %c0_339 = arith.constant 0 : index
    %c0_340 = arith.constant 0 : index
    %330 = vector.load %arg11[%c3_338, %c0_339, %c0_340] : memref<4x32x32xf32, #tpu.memory_space<vmem>>, vector<1x32x32xf32>
    %331 = vector.shape_cast %330 : vector<1x32x32xf32> to vector<32x32xf32>
    %cst_341 = arith.constant dense<0.000000e+00> : vector<16x32xf32>
    %332 = tpu.matmul %329, %331, %cst_341 {dimension_numbers = #tpu.dot_dimension_numbers<[1], [0], [0], [1], [0, 0, 1, 1], [], []>} : vector<16x32xf32>, vector<32x32xf32>, vector<16x32xf32> -> vector<16x32xf32>
    %333 = arith.addf %254, %332 : vector<16x32xf32>
    %c3_342 = arith.constant 3 : index
    %c0_343 = arith.constant 0 : index
    %c0_344 = arith.constant 0 : index
    %334 = vector.load %arg12[%c3_342, %c0_343, %c0_344] : memref<4x1x32xf32, #tpu.memory_space<vmem>>, vector<1x1x32xf32>
    %335 = vector.shape_cast %334 : vector<1x1x32xf32> to vector<1x32xf32>
    %336 = vector.broadcast %335 : vector<1x32xf32> to vector<16x32xf32>
    %337 = arith.addf %333, %336 : vector<16x32xf32>
    %338 = vector.broadcast %3 : vector<16x1xf32> to vector<16x32xf32>
    %339 = arith.mulf %337, %338 : vector<16x32xf32>
    %c0_345 = arith.constant 0 : index
    %c0_346 = arith.constant 0 : index
    %340 = vector.load %arg13[%c0_345, %c0_346] : memref<32x2xf32, #tpu.memory_space<vmem>>, vector<32x2xf32>
    %cst_347 = arith.constant dense<0.000000e+00> : vector<16x2xf32>
    %341 = tpu.matmul %339, %340, %cst_347 {dimension_numbers = #tpu.dot_dimension_numbers<[1], [0], [0], [1], [0, 0, 1, 1], [], []>} : vector<16x32xf32>, vector<32x2xf32>, vector<16x2xf32> -> vector<16x2xf32>
    %c0_348 = arith.constant 0 : index
    %c0_349 = arith.constant 0 : index
    %342 = vector.load %arg14[%c0_348, %c0_349] : memref<1x2xf32, #tpu.memory_space<vmem>>, vector<1x2xf32>
    %343 = vector.broadcast %342 : vector<1x2xf32> to vector<16x2xf32>
    %344 = arith.addf %341, %343 : vector<16x2xf32>
    %345 = vector.broadcast %3 : vector<16x1xf32> to vector<16x2xf32>
    %346 = arith.mulf %344, %345 : vector<16x2xf32>
    %347 = vector.broadcast %3 : vector<16x1xf32> to vector<16x2xf32>
    %348 = arith.mulf %5, %347 : vector<16x2xf32>
    %349 = arith.addf %346, %348 : vector<16x2xf32>
    %350 = tpu.concatenate %4, %349 in 1 : vector<16x2xf32>, vector<16x2xf32> -> vector<16x4xf32>
    %c0_350 = arith.constant 0 : index
    %c0_351 = arith.constant 0 : index
    %c0_352 = arith.constant 0 : index
    %351 = vector.load %arg15[%c0_350, %c0_351, %c0_352] : memref<1x16x4xf32, #tpu.memory_space<vmem>>, vector<1x16x4xf32>
    %352 = vector.shape_cast %351 : vector<1x16x4xf32> to vector<16x4xf32>
    %353 = vector.shape_cast %350 : vector<16x4xf32> to vector<1x16x4xf32>
    tpu.vector_store %arg15[%c0_350, %c0_351, %c0_352], %353 {strides = array<i32>} : memref<1x16x4xf32, #tpu.memory_space<vmem>>, vector<1x16x4xf32>,
    return
  }
  func.func @transform_0(%arg0: i32) -> (i32, i32, i32) {
    %c0_i32 = arith.constant 0 : i32
    %c0_i32_0 = arith.constant 0 : i32
    %c0_i32_1 = arith.constant 0 : i32
    return %arg0, %c0_i32, %c0_i32_0 : i32, i32, i32
  }
  func.func @transform_1(%arg0: i32) -> (i32, i32, i32) {
    %c0_i32 = arith.constant 0 : i32
    %c0_i32_0 = arith.constant 0 : i32
    %c0_i32_1 = arith.constant 0 : i32
    return %arg0, %c0_i32, %c0_i32_0 : i32, i32, i32
  }
  func.func @transform_2(%arg0: i32) -> (i32, i32) {
    %c0_i32 = arith.constant 0 : i32
    %c0_i32_0 = arith.constant 0 : i32
    %c0_i32_1 = arith.constant 0 : i32
    return %c0_i32, %c0_i32_0 : i32, i32
  }
  func.func @transform_3(%arg0: i32) -> (i32, i32) {
    %c0_i32 = arith.constant 0 : i32
    %c0_i32_0 = arith.constant 0 : i32
    %c0_i32_1 = arith.constant 0 : i32
    return %c0_i32, %c0_i32_0 : i32, i32
  }
  func.func @transform_4(%arg0: i32) -> (i32, i32, i32, i32) {
    %c0_i32 = arith.constant 0 : i32
    %c0_i32_0 = arith.constant 0 : i32
    %c0_i32_1 = arith.constant 0 : i32
    %c0_i32_2 = arith.constant 0 : i32
    %c0_i32_3 = arith.constant 0 : i32
    return %c0_i32, %c0_i32_0, %c0_i32_1, %c0_i32_2 : i32, i32, i32, i32
  }
  func.func @transform_5(%arg0: i32) -> (i32, i32, i32) {
    %c0_i32 = arith.constant 0 : i32
    %c0_i32_0 = arith.constant 0 : i32
    %c0_i32_1 = arith.constant 0 : i32
    %c0_i32_2 = arith.constant 0 : i32
    return %c0_i32, %c0_i32_0, %c0_i32_1 : i32, i32, i32
  }
  func.func @transform_6(%arg0: i32) -> (i32, i32, i32, i32) {
    %c0_i32 = arith.constant 0 : i32
    %c0_i32_0 = arith.constant 0 : i32
    %c0_i32_1 = arith.constant 0 : i32
    %c0_i32_2 = arith.constant 0 : i32
    %c0_i32_3 = arith.constant 0 : i32
    return %c0_i32, %c0_i32_0, %c0_i32_1, %c0_i32_2 : i32, i32, i32, i32
  }
  func.func @transform_7(%arg0: i32) -> (i32, i32, i32) {
    %c0_i32 = arith.constant 0 : i32
    %c0_i32_0 = arith.constant 0 : i32
    %c0_i32_1 = arith.constant 0 : i32
    %c0_i32_2 = arith.constant 0 : i32
    return %c0_i32, %c0_i32_0, %c0_i32_1 : i32, i32, i32
  }
  func.func @transform_8(%arg0: i32) -> (i32, i32, i32) {
    %c0_i32 = arith.constant 0 : i32
    %c0_i32_0 = arith.constant 0 : i32
    %c0_i32_1 = arith.constant 0 : i32
    %c0_i32_2 = arith.constant 0 : i32
    return %c0_i32, %c0_i32_0, %c0_i32_1 : i32, i32, i32
  }
  func.func @transform_9(%arg0: i32) -> (i32, i32, i32) {
    %c0_i32 = arith.constant 0 : i32
    %c0_i32_0 = arith.constant 0 : i32
    %c0_i32_1 = arith.constant 0 : i32
    %c0_i32_2 = arith.constant 0 : i32
    return %c0_i32, %c0_i32_0, %c0_i32_1 : i32, i32, i32
  }
  func.func @transform_10(%arg0: i32) -> (i32, i32, i32) {
    %c0_i32 = arith.constant 0 : i32
    %c0_i32_0 = arith.constant 0 : i32
    %c0_i32_1 = arith.constant 0 : i32
    %c0_i32_2 = arith.constant 0 : i32
    return %c0_i32, %c0_i32_0, %c0_i32_1 : i32, i32, i32
  }
  func.func @transform_11(%arg0: i32) -> (i32, i32, i32) {
    %c0_i32 = arith.constant 0 : i32
    %c0_i32_0 = arith.constant 0 : i32
    %c0_i32_1 = arith.constant 0 : i32
    %c0_i32_2 = arith.constant 0 : i32
    return %c0_i32, %c0_i32_0, %c0_i32_1 : i32, i32, i32
  }
  func.func @transform_12(%arg0: i32) -> (i32, i32) {
    %c0_i32 = arith.constant 0 : i32
    %c0_i32_0 = arith.constant 0 : i32
    %c0_i32_1 = arith.constant 0 : i32
    return %c0_i32, %c0_i32_0 : i32, i32
  }
  func.func @transform_13(%arg0: i32) -> (i32, i32) {
    %c0_i32 = arith.constant 0 : i32
    %c0_i32_0 = arith.constant 0 : i32
    %c0_i32_1 = arith.constant 0 : i32
    return %c0_i32, %c0_i32_0 : i32, i32
  }
  func.func @transform_14(%arg0: i32) -> (i32, i32, i32) {
    %c0_i32 = arith.constant 0 : i32
    %c0_i32_0 = arith.constant 0 : i32
    %c0_i32_1 = arith.constant 0 : i32
    return %arg0, %c0_i32, %c0_i32_0 : i32, i32, i32
  }
}

module attributes {stable_mosaic.version = 11 : i64} {
  func.func @_coupling_kernel(%arg0: i32, %arg1: memref<1x16x4xf32, #tpu.memory_space<vmem>>, %arg2: memref<1x16x1xf32, #tpu.memory_space<vmem>>, %arg3: memref<2x32xf32, #tpu.memory_space<vmem>>, %arg4: memref<1x32xf32, #tpu.memory_space<vmem>>, %arg5: memref<4x5x32x32xf32, #tpu.memory_space<vmem>>, %arg6: memref<4x1x32xf32, #tpu.memory_space<vmem>>, %arg7: memref<4x5x32x32xf32, #tpu.memory_space<vmem>>, %arg8: memref<4x1x32xf32, #tpu.memory_space<vmem>>, %arg9: memref<4x32x32xf32, #tpu.memory_space<vmem>>, %arg10: memref<4x1x32xf32, #tpu.memory_space<vmem>>, %arg11: memref<4x32x32xf32, #tpu.memory_space<vmem>>, %arg12: memref<4x1x32xf32, #tpu.memory_space<vmem>>, %arg13: memref<32x2xf32, #tpu.memory_space<vmem>>, %arg14: memref<1x2xf32, #tpu.memory_space<vmem>>, %arg15: memref<1x16x4xf32, #tpu.memory_space<vmem>>, %arg16: memref<32x32xf32, #tpu.memory_space<vmem>>) attributes {dimension_semantics = [#tpu.dimension_semantics<parallel>], iteration_bounds = array<i64: 2>, scalar_prefetch = 0 : i64, scratch_operands = 1 : i64, tpu.core_type = #tpu.core_type<tc>, window_params = [{transform_indices = @transform_0, window_bounds = array<i64: 1, 16, 4>}, {transform_indices = @transform_1, window_bounds = array<i64: 1, 16, 1>}, {pipeline_mode = #tpu.pipeline_mode<synchronous>, transform_indices = @transform_2, window_bounds = array<i64: 2, 32>}, {pipeline_mode = #tpu.pipeline_mode<synchronous>, transform_indices = @transform_3, window_bounds = array<i64: 1, 32>}, {pipeline_mode = #tpu.pipeline_mode<synchronous>, transform_indices = @transform_4, window_bounds = array<i64: 4, 5, 32, 32>}, {pipeline_mode = #tpu.pipeline_mode<synchronous>, transform_indices = @transform_5, window_bounds = array<i64: 4, 1, 32>}, {pipeline_mode = #tpu.pipeline_mode<synchronous>, transform_indices = @transform_6, window_bounds = array<i64: 4, 5, 32, 32>}, {pipeline_mode = #tpu.pipeline_mode<synchronous>, transform_indices = @transform_7, window_bounds = array<i64: 4, 1, 32>}, {pipeline_mode = #tpu.pipeline_mode<synchronous>, transform_indices = @transform_8, window_bounds = array<i64: 4, 32, 32>}, {pipeline_mode = #tpu.pipeline_mode<synchronous>, transform_indices = @transform_9, window_bounds = array<i64: 4, 1, 32>}, {pipeline_mode = #tpu.pipeline_mode<synchronous>, transform_indices = @transform_10, window_bounds = array<i64: 4, 32, 32>}, {pipeline_mode = #tpu.pipeline_mode<synchronous>, transform_indices = @transform_11, window_bounds = array<i64: 4, 1, 32>}, {pipeline_mode = #tpu.pipeline_mode<synchronous>, transform_indices = @transform_12, window_bounds = array<i64: 32, 2>}, {pipeline_mode = #tpu.pipeline_mode<synchronous>, transform_indices = @transform_13, window_bounds = array<i64: 1, 2>}, {transform_indices = @transform_14, window_bounds = array<i64: 1, 16, 4>}]} {
    %c0 = arith.constant 0 : index
    %c0_0 = arith.constant 0 : index
    %c0_1 = arith.constant 0 : index
    %0 = vector.load %arg1[%c0, %c0_0, %c0_1] : memref<1x16x4xf32, #tpu.memory_space<vmem>>, vector<1x16x4xf32>
    %1 = vector.shape_cast %0 : vector<1x16x4xf32> to vector<16x4xf32>
    %c0_2 = arith.constant 0 : index
    %c0_3 = arith.constant 0 : index
    %c0_4 = arith.constant 0 : index
    %2 = vector.load %arg2[%c0_2, %c0_3, %c0_4] : memref<1x16x1xf32, #tpu.memory_space<vmem>>, vector<1x16x1xf32>
    %3 = vector.shape_cast %2 : vector<1x16x1xf32> to vector<16x1xf32>
    %4 = vector.extract_strided_slice %1 {offsets = [0, 0], sizes = [16, 2], strides = [1, 1]} : vector<16x4xf32> to vector<16x2xf32>
    %5 = vector.extract_strided_slice %1 {offsets = [0, 2], sizes = [16, 2], strides = [1, 1]} : vector<16x4xf32> to vector<16x2xf32>
    %c0_5 = arith.constant 0 : index
    %c0_6 = arith.constant 0 : index
    %6 = vector.load %arg3[%c0_5, %c0_6] : memref<2x32xf32, #tpu.memory_space<vmem>>, vector<2x32xf32>
    %cst = arith.constant dense<0.000000e+00> : vector<16x32xf32>
    %7 = tpu.matmul %4, %6, %cst {dimension_numbers = #tpu.dot_dimension_numbers<[1], [0], [0], [1], [0, 0, 1, 1], [], []>} : vector<16x2xf32>, vector<2x32xf32>, vector<16x32xf32> -> vector<16x32xf32>
    %c0_7 = arith.constant 0 : index
    %c0_8 = arith.constant 0 : index
    %8 = vector.load %arg4[%c0_7, %c0_8] : memref<1x32xf32, #tpu.memory_space<vmem>>, vector<1x32xf32>
    %9 = vector.broadcast %8 : vector<1x32xf32> to vector<16x32xf32>
    %10 = arith.addf %7, %9 : vector<16x32xf32>
    %11 = vector.broadcast %3 : vector<16x1xf32> to vector<16x32xf32>
    %12 = arith.mulf %10, %11 : vector<16x32xf32>
    %cst_9 = arith.constant 0.000000e+00 : f32
    %13 = vector.broadcast %cst_9 : f32 to vector<32x32xf32>
    %c0_10 = arith.constant 0 : index
    %c0_11 = arith.constant 0 : index
    %14 = vector.load %arg16[%c0_10, %c0_11] : memref<32x32xf32, #tpu.memory_space<vmem>>, vector<32x32xf32>
    tpu.vector_store %arg16[%c0_10, %c0_11], %13 {strides = array<i32>} : memref<32x32xf32, #tpu.memory_space<vmem>>, vector<32x32xf32>,
    %cst_12 = arith.constant 0.000000e+00 : f32
    %15 = vector.broadcast %cst_12 : f32 to vector<16x32xf32>
    %c8 = arith.constant 8 : index
    %c0_13 = arith.constant 0 : index
    %16 = vector.load %arg16[%c8, %c0_13] : memref<32x32xf32, #tpu.memory_space<vmem>>, vector<16x32xf32>
    tpu.vector_store %arg16[%c8, %c0_13], %12 {strides = array<i32>} : memref<32x32xf32, #tpu.memory_space<vmem>>, vector<16x32xf32>,
    %cst_14 = arith.constant 0.000000e+00 : f32
    %17 = vector.broadcast %cst_14 : f32 to vector<16x32xf32>
    %c0_15 = arith.constant 0 : index
    %c0_16 = arith.constant 0 : index
    %c0_17 = arith.constant 0 : index
    %18 = vector.load %arg6[%c0_15, %c0_16, %c0_17] : memref<4x1x32xf32, #tpu.memory_space<vmem>>, vector<1x1x32xf32>
    %19 = vector.shape_cast %18 : vector<1x1x32xf32> to vector<1x32xf32>
    %20 = vector.broadcast %19 : vector<1x32xf32> to vector<16x32xf32>
    %21 = arith.addf %17, %20 : vector<16x32xf32>
    %cst_18 = arith.constant 0.000000e+00 : f32
    %22 = vector.broadcast %cst_18 : f32 to vector<16x32xf32>
    %c0_19 = arith.constant 0 : index
    %c0_20 = arith.constant 0 : index
    %c0_21 = arith.constant 0 : index
    %23 = vector.load %arg8[%c0_19, %c0_20, %c0_21] : memref<4x1x32xf32, #tpu.memory_space<vmem>>, vector<1x1x32xf32>
    %24 = vector.shape_cast %23 : vector<1x1x32xf32> to vector<1x32xf32>
    %25 = vector.broadcast %24 : vector<1x32xf32> to vector<16x32xf32>
    %26 = arith.addf %22, %25 : vector<16x32xf32>
    %c6 = arith.constant 6 : index
    %c0_22 = arith.constant 0 : index
    %27 = vector.load %arg16[%c6, %c0_22] : memref<32x32xf32, #tpu.memory_space<vmem>>, vector<16x32xf32>
    %c0_23 = arith.constant 0 : index
    %c0_24 = arith.constant 0 : index
    %c0_25 = arith.constant 0 : index
    %c0_26 = arith.constant 0 : index
    %28 = vector.load %arg5[%c0_23, %c0_24, %c0_25, %c0_26] : memref<4x5x32x32xf32, #tpu.memory_space<vmem>>, vector<1x1x32x32xf32>
    %29 = vector.shape_cast %28 : vector<1x1x32x32xf32> to vector<32x32xf32>
    %cst_27 = arith.constant dense<0.000000e+00> : vector<16x32xf32>
    %30 = tpu.matmul %27, %29, %cst_27 {dimension_numbers = #tpu.dot_dimension_numbers<[1], [0], [0], [1], [0, 0, 1, 1], [], []>} : vector<16x32xf32>, vector<32x32xf32>, vector<16x32xf32> -> vector<16x32xf32>
    %31 = arith.addf %21, %30 : vector<16x32xf32>
    %c0_28 = arith.constant 0 : index
    %c0_29 = arith.constant 0 : index
    %c0_30 = arith.constant 0 : index
    %c0_31 = arith.constant 0 : index
    %32 = vector.load %arg7[%c0_28, %c0_29, %c0_30, %c0_31] : memref<4x5x32x32xf32, #tpu.memory_space<vmem>>, vector<1x1x32x32xf32>
    %33 = vector.shape_cast %32 : vector<1x1x32x32xf32> to vector<32x32xf32>
    %cst_32 = arith.constant dense<0.000000e+00> : vector<16x32xf32>
    %34 = tpu.matmul %27, %33, %cst_32 {dimension_numbers = #tpu.dot_dimension_numbers<[1], [0], [0], [1], [0, 0, 1, 1], [], []>} : vector<16x32xf32>, vector<32x32xf32>, vector<16x32xf32> -> vector<16x32xf32>
    %35 = arith.addf %26, %34 : vector<16x32xf32>
    %c7 = arith.constant 7 : index
    %c0_33 = arith.constant 0 : index
    %36 = vector.load %arg16[%c7, %c0_33] : memref<32x32xf32, #tpu.memory_space<vmem>>, vector<16x32xf32>
    %c0_34 = arith.constant 0 : index
    %c1 = arith.constant 1 : index
    %c0_35 = arith.constant 0 : index
    %c0_36 = arith.constant 0 : index
    %37 = vector.load %arg5[%c0_34, %c1, %c0_35, %c0_36] : memref<4x5x32x32xf32, #tpu.memory_space<vmem>>, vector<1x1x32x32xf32>
    %38 = vector.shape_cast %37 : vector<1x1x32x32xf32> to vector<32x32xf32>
    %cst_37 = arith.constant dense<0.000000e+00> : vector<16x32xf32>
    %39 = tpu.matmul %36, %38, %cst_37 {dimension_numbers = #tpu.dot_dimension_numbers<[1], [0], [0], [1], [0, 0, 1, 1], [], []>} : vector<16x32xf32>, vector<32x32xf32>, vector<16x32xf32> -> vector<16x32xf32>
    %40 = arith.addf %31, %39 : vector<16x32xf32>
    %c0_38 = arith.constant 0 : index
    %c1_39 = arith.constant 1 : index
    %c0_40 = arith.constant 0 : index
    %c0_41 = arith.constant 0 : index
    %41 = vector.load %arg7[%c0_38, %c1_39, %c0_40, %c0_41] : memref<4x5x32x32xf32, #tpu.memory_space<vmem>>, vector<1x1x32x32xf32>
    %42 = vector.shape_cast %41 : vector<1x1x32x32xf32> to vector<32x32xf32>
    %cst_42 = arith.constant dense<0.000000e+00> : vector<16x32xf32>
    %43 = tpu.matmul %36, %42, %cst_42 {dimension_numbers = #tpu.dot_dimension_numbers<[1], [0], [0], [1], [0, 0, 1, 1], [], []>} : vector<16x32xf32>, vector<32x32xf32>, vector<16x32xf32> -> vector<16x32xf32>
    %44 = arith.addf %35, %43 : vector<16x32xf32>
    %c8_43 = arith.constant 8 : index
    %c0_44 = arith.constant 0 : index
    %45 = vector.load %arg16[%c8_43, %c0_44] : memref<32x32xf32, #tpu.memory_space<vmem>>, vector<16x32xf32>
    %c0_45 = arith.constant 0 : index
    %c2 = arith.constant 2 : index
    %c0_46 = arith.constant 0 : index
    %c0_47 = arith.constant 0 : index
    %46 = vector.load %arg5[%c0_45, %c2, %c0_46, %c0_47] : memref<4x5x32x32xf32, #tpu.memory_space<vmem>>, vector<1x1x32x32xf32>
    %47 = vector.shape_cast %46 : vector<1x1x32x32xf32> to vector<32x32xf32>
    %cst_48 = arith.constant dense<0.000000e+00> : vector<16x32xf32>
    %48 = tpu.matmul %45, %47, %cst_48 {dimension_numbers = #tpu.dot_dimension_numbers<[1], [0], [0], [1], [0, 0, 1, 1], [], []>} : vector<16x32xf32>, vector<32x32xf32>, vector<16x32xf32> -> vector<16x32xf32>
    %49 = arith.addf %40, %48 : vector<16x32xf32>
    %c0_49 = arith.constant 0 : index
    %c2_50 = arith.constant 2 : index
    %c0_51 = arith.constant 0 : index
    %c0_52 = arith.constant 0 : index
    %50 = vector.load %arg7[%c0_49, %c2_50, %c0_51, %c0_52] : memref<4x5x32x32xf32, #tpu.memory_space<vmem>>, vector<1x1x32x32xf32>
    %51 = vector.shape_cast %50 : vector<1x1x32x32xf32> to vector<32x32xf32>
    %cst_53 = arith.constant dense<0.000000e+00> : vector<16x32xf32>
    %52 = tpu.matmul %45, %51, %cst_53 {dimension_numbers = #tpu.dot_dimension_numbers<[1], [0], [0], [1], [0, 0, 1, 1], [], []>} : vector<16x32xf32>, vector<32x32xf32>, vector<16x32xf32> -> vector<16x32xf32>
    %53 = arith.addf %44, %52 : vector<16x32xf32>
    %c9 = arith.constant 9 : index
    %c0_54 = arith.constant 0 : index
    %54 = vector.load %arg16[%c9, %c0_54] : memref<32x32xf32, #tpu.memory_space<vmem>>, vector<16x32xf32>
    %c0_55 = arith.constant 0 : index
    %c3 = arith.constant 3 : index
    %c0_56 = arith.constant 0 : index
    %c0_57 = arith.constant 0 : index
    %55 = vector.load %arg5[%c0_55, %c3, %c0_56, %c0_57] : memref<4x5x32x32xf32, #tpu.memory_space<vmem>>, vector<1x1x32x32xf32>
    %56 = vector.shape_cast %55 : vector<1x1x32x32xf32> to vector<32x32xf32>
    %cst_58 = arith.constant dense<0.000000e+00> : vector<16x32xf32>
    %57 = tpu.matmul %54, %56, %cst_58 {dimension_numbers = #tpu.dot_dimension_numbers<[1], [0], [0], [1], [0, 0, 1, 1], [], []>} : vector<16x32xf32>, vector<32x32xf32>, vector<16x32xf32> -> vector<16x32xf32>
    %58 = arith.addf %49, %57 : vector<16x32xf32>
    %c0_59 = arith.constant 0 : index
    %c3_60 = arith.constant 3 : index
    %c0_61 = arith.constant 0 : index
    %c0_62 = arith.constant 0 : index
    %59 = vector.load %arg7[%c0_59, %c3_60, %c0_61, %c0_62] : memref<4x5x32x32xf32, #tpu.memory_space<vmem>>, vector<1x1x32x32xf32>
    %60 = vector.shape_cast %59 : vector<1x1x32x32xf32> to vector<32x32xf32>
    %cst_63 = arith.constant dense<0.000000e+00> : vector<16x32xf32>
    %61 = tpu.matmul %54, %60, %cst_63 {dimension_numbers = #tpu.dot_dimension_numbers<[1], [0], [0], [1], [0, 0, 1, 1], [], []>} : vector<16x32xf32>, vector<32x32xf32>, vector<16x32xf32> -> vector<16x32xf32>
    %62 = arith.addf %53, %61 : vector<16x32xf32>
    %c10 = arith.constant 10 : index
    %c0_64 = arith.constant 0 : index
    %63 = vector.load %arg16[%c10, %c0_64] : memref<32x32xf32, #tpu.memory_space<vmem>>, vector<16x32xf32>
    %c0_65 = arith.constant 0 : index
    %c4 = arith.constant 4 : index
    %c0_66 = arith.constant 0 : index
    %c0_67 = arith.constant 0 : index
    %64 = vector.load %arg5[%c0_65, %c4, %c0_66, %c0_67] : memref<4x5x32x32xf32, #tpu.memory_space<vmem>>, vector<1x1x32x32xf32>
    %65 = vector.shape_cast %64 : vector<1x1x32x32xf32> to vector<32x32xf32>
    %cst_68 = arith.constant dense<0.000000e+00> : vector<16x32xf32>
    %66 = tpu.matmul %63, %65, %cst_68 {dimension_numbers = #tpu.dot_dimension_numbers<[1], [0], [0], [1], [0, 0, 1, 1], [], []>} : vector<16x32xf32>, vector<32x32xf32>, vector<16x32xf32> -> vector<16x32xf32>
    %67 = arith.addf %58, %66 : vector<16x32xf32>
    %c0_69 = arith.constant 0 : index
    %c4_70 = arith.constant 4 : index
    %c0_71 = arith.constant 0 : index
    %c0_72 = arith.constant 0 : index
    %68 = vector.load %arg7[%c0_69, %c4_70, %c0_71, %c0_72] : memref<4x5x32x32xf32, #tpu.memory_space<vmem>>, vector<1x1x32x32xf32>
    %69 = vector.shape_cast %68 : vector<1x1x32x32xf32> to vector<32x32xf32>
    %cst_73 = arith.constant dense<0.000000e+00> : vector<16x32xf32>
    %70 = tpu.matmul %63, %69, %cst_73 {dimension_numbers = #tpu.dot_dimension_numbers<[1], [0], [0], [1], [0, 0, 1, 1], [], []>} : vector<16x32xf32>, vector<32x32xf32>, vector<16x32xf32> -> vector<16x32xf32>
    %71 = arith.addf %62, %70 : vector<16x32xf32>
    %72 = math.tanh %67 : vector<16x32xf32>
    %cst_74 = arith.constant 0.000000e+00 : f32
    %73 = vector.broadcast %cst_74 : f32 to vector<16x32xf32>
    %74 = arith.subf %73, %71 : vector<16x32xf32>
    %75 = math.exp %74 : vector<16x32xf32>
    %cst_75 = arith.constant 1.000000e+00 : f32
    %76 = vector.broadcast %cst_75 : f32 to vector<16x32xf32>
    %77 = arith.addf %76, %75 : vector<16x32xf32>
    %cst_76 = arith.constant 1.000000e+00 : f32
    %78 = vector.broadcast %cst_76 : f32 to vector<16x32xf32>
    %79 = arith.divf %78, %77 : vector<16x32xf32>
    %80 = arith.mulf %72, %79 : vector<16x32xf32>
    %c0_77 = arith.constant 0 : index
    %c0_78 = arith.constant 0 : index
    %c0_79 = arith.constant 0 : index
    %81 = vector.load %arg11[%c0_77, %c0_78, %c0_79] : memref<4x32x32xf32, #tpu.memory_space<vmem>>, vector<1x32x32xf32>
    %82 = vector.shape_cast %81 : vector<1x32x32xf32> to vector<32x32xf32>
    %cst_80 = arith.constant dense<0.000000e+00> : vector<16x32xf32>
    %83 = tpu.matmul %80, %82, %cst_80 {dimension_numbers = #tpu.dot_dimension_numbers<[1], [0], [0], [1], [0, 0, 1, 1], [], []>} : vector<16x32xf32>, vector<32x32xf32>, vector<16x32xf32> -> vector<16x32xf32>
    %84 = arith.addf %15, %83 : vector<16x32xf32>
    %c0_81 = arith.constant 0 : index
    %c0_82 = arith.constant 0 : index
    %c0_83 = arith.constant 0 : index
    %85 = vector.load %arg12[%c0_81, %c0_82, %c0_83] : memref<4x1x32xf32, #tpu.memory_space<vmem>>, vector<1x1x32xf32>
    %86 = vector.shape_cast %85 : vector<1x1x32xf32> to vector<1x32xf32>
    %87 = vector.broadcast %86 : vector<1x32xf32> to vector<16x32xf32>
    %88 = arith.addf %84, %87 : vector<16x32xf32>
    %c0_84 = arith.constant 0 : index
    %c0_85 = arith.constant 0 : index
    %c0_86 = arith.constant 0 : index
    %89 = vector.load %arg9[%c0_84, %c0_85, %c0_86] : memref<4x32x32xf32, #tpu.memory_space<vmem>>, vector<1x32x32xf32>
    %90 = vector.shape_cast %89 : vector<1x32x32xf32> to vector<32x32xf32>
    %cst_87 = arith.constant dense<0.000000e+00> : vector<16x32xf32>
    %91 = tpu.matmul %80, %90, %cst_87 {dimension_numbers = #tpu.dot_dimension_numbers<[1], [0], [0], [1], [0, 0, 1, 1], [], []>} : vector<16x32xf32>, vector<32x32xf32>, vector<16x32xf32> -> vector<16x32xf32>
    %c0_88 = arith.constant 0 : index
    %c0_89 = arith.constant 0 : index
    %c0_90 = arith.constant 0 : index
    %92 = vector.load %arg10[%c0_88, %c0_89, %c0_90] : memref<4x1x32xf32, #tpu.memory_space<vmem>>, vector<1x1x32xf32>
    %93 = vector.shape_cast %92 : vector<1x1x32xf32> to vector<1x32xf32>
    %94 = vector.broadcast %93 : vector<1x32xf32> to vector<16x32xf32>
    %95 = arith.addf %91, %94 : vector<16x32xf32>
    %96 = arith.addf %12, %95 : vector<16x32xf32>
    %97 = vector.broadcast %3 : vector<16x1xf32> to vector<16x32xf32>
    %98 = arith.mulf %96, %97 : vector<16x32xf32>
    %c8_91 = arith.constant 8 : index
    %c0_92 = arith.constant 0 : index
    %99 = vector.load %arg16[%c8_91, %c0_92] : memref<32x32xf32, #tpu.memory_space<vmem>>, vector<16x32xf32>
    tpu.vector_store %arg16[%c8_91, %c0_92], %98 {strides = array<i32>} : memref<32x32xf32, #tpu.memory_space<vmem>>, vector<16x32xf32>,
    %cst_93 = arith.constant 0.000000e+00 : f32
    %100 = vector.broadcast %cst_93 : f32 to vector<16x32xf32>
    %c1_94 = arith.constant 1 : index
    %c0_95 = arith.constant 0 : index
    %c0_96 = arith.constant 0 : index
    %101 = vector.load %arg6[%c1_94, %c0_95, %c0_96] : memref<4x1x32xf32, #tpu.memory_space<vmem>>, vector<1x1x32xf32>
    %102 = vector.shape_cast %101 : vector<1x1x32xf32> to vector<1x32xf32>
    %103 = vector.broadcast %102 : vector<1x32xf32> to vector<16x32xf32>
    %104 = arith.addf %100, %103 : vector<16x32xf32>
    %cst_97 = arith.constant 0.000000e+00 : f32
    %105 = vector.broadcast %cst_97 : f32 to vector<16x32xf32>
    %c1_98 = arith.constant 1 : index
    %c0_99 = arith.constant 0 : index
    %c0_100 = arith.constant 0 : index
    %106 = vector.load %arg8[%c1_98, %c0_99, %c0_100] : memref<4x1x32xf32, #tpu.memory_space<vmem>>, vector<1x1x32xf32>
    %107 = vector.shape_cast %106 : vector<1x1x32xf32> to vector<1x32xf32>
    %108 = vector.broadcast %107 : vector<1x32xf32> to vector<16x32xf32>
    %109 = arith.addf %105, %108 : vector<16x32xf32>
    %c6_101 = arith.constant 6 : index
    %c0_102 = arith.constant 0 : index
    %110 = vector.load %arg16[%c6_101, %c0_102] : memref<32x32xf32, #tpu.memory_space<vmem>>, vector<16x32xf32>
    %c1_103 = arith.constant 1 : index
    %c0_104 = arith.constant 0 : index
    %c0_105 = arith.constant 0 : index
    %c0_106 = arith.constant 0 : index
    %111 = vector.load %arg5[%c1_103, %c0_104, %c0_105, %c0_106] : memref<4x5x32x32xf32, #tpu.memory_space<vmem>>, vector<1x1x32x32xf32>
    %112 = vector.shape_cast %111 : vector<1x1x32x32xf32> to vector<32x32xf32>
    %cst_107 = arith.constant dense<0.000000e+00> : vector<16x32xf32>
    %113 = tpu.matmul %110, %112, %cst_107 {dimension_numbers = #tpu.dot_dimension_numbers<[1], [0], [0], [1], [0, 0, 1, 1], [], []>} : vector<16x32xf32>, vector<32x32xf32>, vector<16x32xf32> -> vector<16x32xf32>
    %114 = arith.addf %104, %113 : vector<16x32xf32>
    %c1_108 = arith.constant 1 : index
    %c0_109 = arith.constant 0 : index
    %c0_110 = arith.constant 0 : index
    %c0_111 = arith.constant 0 : index
    %115 = vector.load %arg7[%c1_108, %c0_109, %c0_110, %c0_111] : memref<4x5x32x32xf32, #tpu.memory_space<vmem>>, vector<1x1x32x32xf32>
    %116 = vector.shape_cast %115 : vector<1x1x32x32xf32> to vector<32x32xf32>
    %cst_112 = arith.constant dense<0.000000e+00> : vector<16x32xf32>
    %117 = tpu.matmul %110, %116, %cst_112 {dimension_numbers = #tpu.dot_dimension_numbers<[1], [0], [0], [1], [0, 0, 1, 1], [], []>} : vector<16x32xf32>, vector<32x32xf32>, vector<16x32xf32> -> vector<16x32xf32>
    %118 = arith.addf %109, %117 : vector<16x32xf32>
    %c7_113 = arith.constant 7 : index
    %c0_114 = arith.constant 0 : index
    %119 = vector.load %arg16[%c7_113, %c0_114] : memref<32x32xf32, #tpu.memory_space<vmem>>, vector<16x32xf32>
    %c1_115 = arith.constant 1 : index
    %c1_116 = arith.constant 1 : index
    %c0_117 = arith.constant 0 : index
    %c0_118 = arith.constant 0 : index
    %120 = vector.load %arg5[%c1_115, %c1_116, %c0_117, %c0_118] : memref<4x5x32x32xf32, #tpu.memory_space<vmem>>, vector<1x1x32x32xf32>
    %121 = vector.shape_cast %120 : vector<1x1x32x32xf32> to vector<32x32xf32>
    %cst_119 = arith.constant dense<0.000000e+00> : vector<16x32xf32>
    %122 = tpu.matmul %119, %121, %cst_119 {dimension_numbers = #tpu.dot_dimension_numbers<[1], [0], [0], [1], [0, 0, 1, 1], [], []>} : vector<16x32xf32>, vector<32x32xf32>, vector<16x32xf32> -> vector<16x32xf32>
    %123 = arith.addf %114, %122 : vector<16x32xf32>
    %c1_120 = arith.constant 1 : index
    %c1_121 = arith.constant 1 : index
    %c0_122 = arith.constant 0 : index
    %c0_123 = arith.constant 0 : index
    %124 = vector.load %arg7[%c1_120, %c1_121, %c0_122, %c0_123] : memref<4x5x32x32xf32, #tpu.memory_space<vmem>>, vector<1x1x32x32xf32>
    %125 = vector.shape_cast %124 : vector<1x1x32x32xf32> to vector<32x32xf32>
    %cst_124 = arith.constant dense<0.000000e+00> : vector<16x32xf32>
    %126 = tpu.matmul %119, %125, %cst_124 {dimension_numbers = #tpu.dot_dimension_numbers<[1], [0], [0], [1], [0, 0, 1, 1], [], []>} : vector<16x32xf32>, vector<32x32xf32>, vector<16x32xf32> -> vector<16x32xf32>
    %127 = arith.addf %118, %126 : vector<16x32xf32>
    %c8_125 = arith.constant 8 : index
    %c0_126 = arith.constant 0 : index
    %128 = vector.load %arg16[%c8_125, %c0_126] : memref<32x32xf32, #tpu.memory_space<vmem>>, vector<16x32xf32>
    %c1_127 = arith.constant 1 : index
    %c2_128 = arith.constant 2 : index
    %c0_129 = arith.constant 0 : index
    %c0_130 = arith.constant 0 : index
    %129 = vector.load %arg5[%c1_127, %c2_128, %c0_129, %c0_130] : memref<4x5x32x32xf32, #tpu.memory_space<vmem>>, vector<1x1x32x32xf32>
    %130 = vector.shape_cast %129 : vector<1x1x32x32xf32> to vector<32x32xf32>
    %cst_131 = arith.constant dense<0.000000e+00> : vector<16x32xf32>
    %131 = tpu.matmul %128, %130, %cst_131 {dimension_numbers = #tpu.dot_dimension_numbers<[1], [0], [0], [1], [0, 0, 1, 1], [], []>} : vector<16x32xf32>, vector<32x32xf32>, vector<16x32xf32> -> vector<16x32xf32>
    %132 = arith.addf %123, %131 : vector<16x32xf32>
    %c1_132 = arith.constant 1 : index
    %c2_133 = arith.constant 2 : index
    %c0_134 = arith.constant 0 : index
    %c0_135 = arith.constant 0 : index
    %133 = vector.load %arg7[%c1_132, %c2_133, %c0_134, %c0_135] : memref<4x5x32x32xf32, #tpu.memory_space<vmem>>, vector<1x1x32x32xf32>
    %134 = vector.shape_cast %133 : vector<1x1x32x32xf32> to vector<32x32xf32>
    %cst_136 = arith.constant dense<0.000000e+00> : vector<16x32xf32>
    %135 = tpu.matmul %128, %134, %cst_136 {dimension_numbers = #tpu.dot_dimension_numbers<[1], [0], [0], [1], [0, 0, 1, 1], [], []>} : vector<16x32xf32>, vector<32x32xf32>, vector<16x32xf32> -> vector<16x32xf32>
    %136 = arith.addf %127, %135 : vector<16x32xf32>
    %c9_137 = arith.constant 9 : index
    %c0_138 = arith.constant 0 : index
    %137 = vector.load %arg16[%c9_137, %c0_138] : memref<32x32xf32, #tpu.memory_space<vmem>>, vector<16x32xf32>
    %c1_139 = arith.constant 1 : index
    %c3_140 = arith.constant 3 : index
    %c0_141 = arith.constant 0 : index
    %c0_142 = arith.constant 0 : index
    %138 = vector.load %arg5[%c1_139, %c3_140, %c0_141, %c0_142] : memref<4x5x32x32xf32, #tpu.memory_space<vmem>>, vector<1x1x32x32xf32>
    %139 = vector.shape_cast %138 : vector<1x1x32x32xf32> to vector<32x32xf32>
    %cst_143 = arith.constant dense<0.000000e+00> : vector<16x32xf32>
    %140 = tpu.matmul %137, %139, %cst_143 {dimension_numbers = #tpu.dot_dimension_numbers<[1], [0], [0], [1], [0, 0, 1, 1], [], []>} : vector<16x32xf32>, vector<32x32xf32>, vector<16x32xf32> -> vector<16x32xf32>
    %141 = arith.addf %132, %140 : vector<16x32xf32>
    %c1_144 = arith.constant 1 : index
    %c3_145 = arith.constant 3 : index
    %c0_146 = arith.constant 0 : index
    %c0_147 = arith.constant 0 : index
    %142 = vector.load %arg7[%c1_144, %c3_145, %c0_146, %c0_147] : memref<4x5x32x32xf32, #tpu.memory_space<vmem>>, vector<1x1x32x32xf32>
    %143 = vector.shape_cast %142 : vector<1x1x32x32xf32> to vector<32x32xf32>
    %cst_148 = arith.constant dense<0.000000e+00> : vector<16x32xf32>
    %144 = tpu.matmul %137, %143, %cst_148 {dimension_numbers = #tpu.dot_dimension_numbers<[1], [0], [0], [1], [0, 0, 1, 1], [], []>} : vector<16x32xf32>, vector<32x32xf32>, vector<16x32xf32> -> vector<16x32xf32>
    %145 = arith.addf %136, %144 : vector<16x32xf32>
    %c10_149 = arith.constant 10 : index
    %c0_150 = arith.constant 0 : index
    %146 = vector.load %arg16[%c10_149, %c0_150] : memref<32x32xf32, #tpu.memory_space<vmem>>, vector<16x32xf32>
    %c1_151 = arith.constant 1 : index
    %c4_152 = arith.constant 4 : index
    %c0_153 = arith.constant 0 : index
    %c0_154 = arith.constant 0 : index
    %147 = vector.load %arg5[%c1_151, %c4_152, %c0_153, %c0_154] : memref<4x5x32x32xf32, #tpu.memory_space<vmem>>, vector<1x1x32x32xf32>
    %148 = vector.shape_cast %147 : vector<1x1x32x32xf32> to vector<32x32xf32>
    %cst_155 = arith.constant dense<0.000000e+00> : vector<16x32xf32>
    %149 = tpu.matmul %146, %148, %cst_155 {dimension_numbers = #tpu.dot_dimension_numbers<[1], [0], [0], [1], [0, 0, 1, 1], [], []>} : vector<16x32xf32>, vector<32x32xf32>, vector<16x32xf32> -> vector<16x32xf32>
    %150 = arith.addf %141, %149 : vector<16x32xf32>
    %c1_156 = arith.constant 1 : index
    %c4_157 = arith.constant 4 : index
    %c0_158 = arith.constant 0 : index
    %c0_159 = arith.constant 0 : index
    %151 = vector.load %arg7[%c1_156, %c4_157, %c0_158, %c0_159] : memref<4x5x32x32xf32, #tpu.memory_space<vmem>>, vector<1x1x32x32xf32>
    %152 = vector.shape_cast %151 : vector<1x1x32x32xf32> to vector<32x32xf32>
    %cst_160 = arith.constant dense<0.000000e+00> : vector<16x32xf32>
    %153 = tpu.matmul %146, %152, %cst_160 {dimension_numbers = #tpu.dot_dimension_numbers<[1], [0], [0], [1], [0, 0, 1, 1], [], []>} : vector<16x32xf32>, vector<32x32xf32>, vector<16x32xf32> -> vector<16x32xf32>
    %154 = arith.addf %145, %153 : vector<16x32xf32>
    %155 = math.tanh %150 : vector<16x32xf32>
    %cst_161 = arith.constant 0.000000e+00 : f32
    %156 = vector.broadcast %cst_161 : f32 to vector<16x32xf32>
    %157 = arith.subf %156, %154 : vector<16x32xf32>
    %158 = math.exp %157 : vector<16x32xf32>
    %cst_162 = arith.constant 1.000000e+00 : f32
    %159 = vector.broadcast %cst_162 : f32 to vector<16x32xf32>
    %160 = arith.addf %159, %158 : vector<16x32xf32>
    %cst_163 = arith.constant 1.000000e+00 : f32
    %161 = vector.broadcast %cst_163 : f32 to vector<16x32xf32>
    %162 = arith.divf %161, %160 : vector<16x32xf32>
    %163 = arith.mulf %155, %162 : vector<16x32xf32>
    %c1_164 = arith.constant 1 : index
    %c0_165 = arith.constant 0 : index
    %c0_166 = arith.constant 0 : index
    %164 = vector.load %arg11[%c1_164, %c0_165, %c0_166] : memref<4x32x32xf32, #tpu.memory_space<vmem>>, vector<1x32x32xf32>
    %165 = vector.shape_cast %164 : vector<1x32x32xf32> to vector<32x32xf32>
    %cst_167 = arith.constant dense<0.000000e+00> : vector<16x32xf32>
    %166 = tpu.matmul %163, %165, %cst_167 {dimension_numbers = #tpu.dot_dimension_numbers<[1], [0], [0], [1], [0, 0, 1, 1], [], []>} : vector<16x32xf32>, vector<32x32xf32>, vector<16x32xf32> -> vector<16x32xf32>
    %167 = arith.addf %88, %166 : vector<16x32xf32>
    %c1_168 = arith.constant 1 : index
    %c0_169 = arith.constant 0 : index
    %c0_170 = arith.constant 0 : index
    %168 = vector.load %arg12[%c1_168, %c0_169, %c0_170] : memref<4x1x32xf32, #tpu.memory_space<vmem>>, vector<1x1x32xf32>
    %169 = vector.shape_cast %168 : vector<1x1x32xf32> to vector<1x32xf32>
    %170 = vector.broadcast %169 : vector<1x32xf32> to vector<16x32xf32>
    %171 = arith.addf %167, %170 : vector<16x32xf32>
    %c1_171 = arith.constant 1 : index
    %c0_172 = arith.constant 0 : index
    %c0_173 = arith.constant 0 : index
    %172 = vector.load %arg9[%c1_171, %c0_172, %c0_173] : memref<4x32x32xf32, #tpu.memory_space<vmem>>, vector<1x32x32xf32>
    %173 = vector.shape_cast %172 : vector<1x32x32xf32> to vector<32x32xf32>
    %cst_174 = arith.constant dense<0.000000e+00> : vector<16x32xf32>
    %174 = tpu.matmul %163, %173, %cst_174 {dimension_numbers = #tpu.dot_dimension_numbers<[1], [0], [0], [1], [0, 0, 1, 1], [], []>} : vector<16x32xf32>, vector<32x32xf32>, vector<16x32xf32> -> vector<16x32xf32>
    %c1_175 = arith.constant 1 : index
    %c0_176 = arith.constant 0 : index
    %c0_177 = arith.constant 0 : index
    %175 = vector.load %arg10[%c1_175, %c0_176, %c0_177] : memref<4x1x32xf32, #tpu.memory_space<vmem>>, vector<1x1x32xf32>
    %176 = vector.shape_cast %175 : vector<1x1x32xf32> to vector<1x32xf32>
    %177 = vector.broadcast %176 : vector<1x32xf32> to vector<16x32xf32>
    %178 = arith.addf %174, %177 : vector<16x32xf32>
    %179 = arith.addf %98, %178 : vector<16x32xf32>
    %180 = vector.broadcast %3 : vector<16x1xf32> to vector<16x32xf32>
    %181 = arith.mulf %179, %180 : vector<16x32xf32>
    %c8_178 = arith.constant 8 : index
    %c0_179 = arith.constant 0 : index
    %182 = vector.load %arg16[%c8_178, %c0_179] : memref<32x32xf32, #tpu.memory_space<vmem>>, vector<16x32xf32>
    tpu.vector_store %arg16[%c8_178, %c0_179], %181 {strides = array<i32>} : memref<32x32xf32, #tpu.memory_space<vmem>>, vector<16x32xf32>,
    %cst_180 = arith.constant 0.000000e+00 : f32
    %183 = vector.broadcast %cst_180 : f32 to vector<16x32xf32>
    %c2_181 = arith.constant 2 : index
    %c0_182 = arith.constant 0 : index
    %c0_183 = arith.constant 0 : index
    %184 = vector.load %arg6[%c2_181, %c0_182, %c0_183] : memref<4x1x32xf32, #tpu.memory_space<vmem>>, vector<1x1x32xf32>
    %185 = vector.shape_cast %184 : vector<1x1x32xf32> to vector<1x32xf32>
    %186 = vector.broadcast %185 : vector<1x32xf32> to vector<16x32xf32>
    %187 = arith.addf %183, %186 : vector<16x32xf32>
    %cst_184 = arith.constant 0.000000e+00 : f32
    %188 = vector.broadcast %cst_184 : f32 to vector<16x32xf32>
    %c2_185 = arith.constant 2 : index
    %c0_186 = arith.constant 0 : index
    %c0_187 = arith.constant 0 : index
    %189 = vector.load %arg8[%c2_185, %c0_186, %c0_187] : memref<4x1x32xf32, #tpu.memory_space<vmem>>, vector<1x1x32xf32>
    %190 = vector.shape_cast %189 : vector<1x1x32xf32> to vector<1x32xf32>
    %191 = vector.broadcast %190 : vector<1x32xf32> to vector<16x32xf32>
    %192 = arith.addf %188, %191 : vector<16x32xf32>
    %c6_188 = arith.constant 6 : index
    %c0_189 = arith.constant 0 : index
    %193 = vector.load %arg16[%c6_188, %c0_189] : memref<32x32xf32, #tpu.memory_space<vmem>>, vector<16x32xf32>
    %c2_190 = arith.constant 2 : index
    %c0_191 = arith.constant 0 : index
    %c0_192 = arith.constant 0 : index
    %c0_193 = arith.constant 0 : index
    %194 = vector.load %arg5[%c2_190, %c0_191, %c0_192, %c0_193] : memref<4x5x32x32xf32, #tpu.memory_space<vmem>>, vector<1x1x32x32xf32>
    %195 = vector.shape_cast %194 : vector<1x1x32x32xf32> to vector<32x32xf32>
    %cst_194 = arith.constant dense<0.000000e+00> : vector<16x32xf32>
    %196 = tpu.matmul %193, %195, %cst_194 {dimension_numbers = #tpu.dot_dimension_numbers<[1], [0], [0], [1], [0, 0, 1, 1], [], []>} : vector<16x32xf32>, vector<32x32xf32>, vector<16x32xf32> -> vector<16x32xf32>
    %197 = arith.addf %187, %196 : vector<16x32xf32>
    %c2_195 = arith.constant 2 : index
    %c0_196 = arith.constant 0 : index
    %c0_197 = arith.constant 0 : index
    %c0_198 = arith.constant 0 : index
    %198 = vector.load %arg7[%c2_195, %c0_196, %c0_197, %c0_198] : memref<4x5x32x32xf32, #tpu.memory_space<vmem>>, vector<1x1x32x32xf32>
    %199 = vector.shape_cast %198 : vector<1x1x32x32xf32> to vector<32x32xf32>
    %cst_199 = arith.constant dense<0.000000e+00> : vector<16x32xf32>
    %200 = tpu.matmul %193, %199, %cst_199 {dimension_numbers = #tpu.dot_dimension_numbers<[1], [0], [0], [1], [0, 0, 1, 1], [], []>} : vector<16x32xf32>, vector<32x32xf32>, vector<16x32xf32> -> vector<16x32xf32>
    %201 = arith.addf %192, %200 : vector<16x32xf32>
    %c7_200 = arith.constant 7 : index
    %c0_201 = arith.constant 0 : index
    %202 = vector.load %arg16[%c7_200, %c0_201] : memref<32x32xf32, #tpu.memory_space<vmem>>, vector<16x32xf32>
    %c2_202 = arith.constant 2 : index
    %c1_203 = arith.constant 1 : index
    %c0_204 = arith.constant 0 : index
    %c0_205 = arith.constant 0 : index
    %203 = vector.load %arg5[%c2_202, %c1_203, %c0_204, %c0_205] : memref<4x5x32x32xf32, #tpu.memory_space<vmem>>, vector<1x1x32x32xf32>
    %204 = vector.shape_cast %203 : vector<1x1x32x32xf32> to vector<32x32xf32>
    %cst_206 = arith.constant dense<0.000000e+00> : vector<16x32xf32>
    %205 = tpu.matmul %202, %204, %cst_206 {dimension_numbers = #tpu.dot_dimension_numbers<[1], [0], [0], [1], [0, 0, 1, 1], [], []>} : vector<16x32xf32>, vector<32x32xf32>, vector<16x32xf32> -> vector<16x32xf32>
    %206 = arith.addf %197, %205 : vector<16x32xf32>
    %c2_207 = arith.constant 2 : index
    %c1_208 = arith.constant 1 : index
    %c0_209 = arith.constant 0 : index
    %c0_210 = arith.constant 0 : index
    %207 = vector.load %arg7[%c2_207, %c1_208, %c0_209, %c0_210] : memref<4x5x32x32xf32, #tpu.memory_space<vmem>>, vector<1x1x32x32xf32>
    %208 = vector.shape_cast %207 : vector<1x1x32x32xf32> to vector<32x32xf32>
    %cst_211 = arith.constant dense<0.000000e+00> : vector<16x32xf32>
    %209 = tpu.matmul %202, %208, %cst_211 {dimension_numbers = #tpu.dot_dimension_numbers<[1], [0], [0], [1], [0, 0, 1, 1], [], []>} : vector<16x32xf32>, vector<32x32xf32>, vector<16x32xf32> -> vector<16x32xf32>
    %210 = arith.addf %201, %209 : vector<16x32xf32>
    %c8_212 = arith.constant 8 : index
    %c0_213 = arith.constant 0 : index
    %211 = vector.load %arg16[%c8_212, %c0_213] : memref<32x32xf32, #tpu.memory_space<vmem>>, vector<16x32xf32>
    %c2_214 = arith.constant 2 : index
    %c2_215 = arith.constant 2 : index
    %c0_216 = arith.constant 0 : index
    %c0_217 = arith.constant 0 : index
    %212 = vector.load %arg5[%c2_214, %c2_215, %c0_216, %c0_217] : memref<4x5x32x32xf32, #tpu.memory_space<vmem>>, vector<1x1x32x32xf32>
    %213 = vector.shape_cast %212 : vector<1x1x32x32xf32> to vector<32x32xf32>
    %cst_218 = arith.constant dense<0.000000e+00> : vector<16x32xf32>
    %214 = tpu.matmul %211, %213, %cst_218 {dimension_numbers = #tpu.dot_dimension_numbers<[1], [0], [0], [1], [0, 0, 1, 1], [], []>} : vector<16x32xf32>, vector<32x32xf32>, vector<16x32xf32> -> vector<16x32xf32>
    %215 = arith.addf %206, %214 : vector<16x32xf32>
    %c2_219 = arith.constant 2 : index
    %c2_220 = arith.constant 2 : index
    %c0_221 = arith.constant 0 : index
    %c0_222 = arith.constant 0 : index
    %216 = vector.load %arg7[%c2_219, %c2_220, %c0_221, %c0_222] : memref<4x5x32x32xf32, #tpu.memory_space<vmem>>, vector<1x1x32x32xf32>
    %217 = vector.shape_cast %216 : vector<1x1x32x32xf32> to vector<32x32xf32>
    %cst_223 = arith.constant dense<0.000000e+00> : vector<16x32xf32>
    %218 = tpu.matmul %211, %217, %cst_223 {dimension_numbers = #tpu.dot_dimension_numbers<[1], [0], [0], [1], [0, 0, 1, 1], [], []>} : vector<16x32xf32>, vector<32x32xf32>, vector<16x32xf32> -> vector<16x32xf32>
    %219 = arith.addf %210, %218 : vector<16x32xf32>
    %c9_224 = arith.constant 9 : index
    %c0_225 = arith.constant 0 : index
    %220 = vector.load %arg16[%c9_224, %c0_225] : memref<32x32xf32, #tpu.memory_space<vmem>>, vector<16x32xf32>
    %c2_226 = arith.constant 2 : index
    %c3_227 = arith.constant 3 : index
    %c0_228 = arith.constant 0 : index
    %c0_229 = arith.constant 0 : index
    %221 = vector.load %arg5[%c2_226, %c3_227, %c0_228, %c0_229] : memref<4x5x32x32xf32, #tpu.memory_space<vmem>>, vector<1x1x32x32xf32>
    %222 = vector.shape_cast %221 : vector<1x1x32x32xf32> to vector<32x32xf32>
    %cst_230 = arith.constant dense<0.000000e+00> : vector<16x32xf32>
    %223 = tpu.matmul %220, %222, %cst_230 {dimension_numbers = #tpu.dot_dimension_numbers<[1], [0], [0], [1], [0, 0, 1, 1], [], []>} : vector<16x32xf32>, vector<32x32xf32>, vector<16x32xf32> -> vector<16x32xf32>
    %224 = arith.addf %215, %223 : vector<16x32xf32>
    %c2_231 = arith.constant 2 : index
    %c3_232 = arith.constant 3 : index
    %c0_233 = arith.constant 0 : index
    %c0_234 = arith.constant 0 : index
    %225 = vector.load %arg7[%c2_231, %c3_232, %c0_233, %c0_234] : memref<4x5x32x32xf32, #tpu.memory_space<vmem>>, vector<1x1x32x32xf32>
    %226 = vector.shape_cast %225 : vector<1x1x32x32xf32> to vector<32x32xf32>
    %cst_235 = arith.constant dense<0.000000e+00> : vector<16x32xf32>
    %227 = tpu.matmul %220, %226, %cst_235 {dimension_numbers = #tpu.dot_dimension_numbers<[1], [0], [0], [1], [0, 0, 1, 1], [], []>} : vector<16x32xf32>, vector<32x32xf32>, vector<16x32xf32> -> vector<16x32xf32>
    %228 = arith.addf %219, %227 : vector<16x32xf32>
    %c10_236 = arith.constant 10 : index
    %c0_237 = arith.constant 0 : index
    %229 = vector.load %arg16[%c10_236, %c0_237] : memref<32x32xf32, #tpu.memory_space<vmem>>, vector<16x32xf32>
    %c2_238 = arith.constant 2 : index
    %c4_239 = arith.constant 4 : index
    %c0_240 = arith.constant 0 : index
    %c0_241 = arith.constant 0 : index
    %230 = vector.load %arg5[%c2_238, %c4_239, %c0_240, %c0_241] : memref<4x5x32x32xf32, #tpu.memory_space<vmem>>, vector<1x1x32x32xf32>
    %231 = vector.shape_cast %230 : vector<1x1x32x32xf32> to vector<32x32xf32>
    %cst_242 = arith.constant dense<0.000000e+00> : vector<16x32xf32>
    %232 = tpu.matmul %229, %231, %cst_242 {dimension_numbers = #tpu.dot_dimension_numbers<[1], [0], [0], [1], [0, 0, 1, 1], [], []>} : vector<16x32xf32>, vector<32x32xf32>, vector<16x32xf32> -> vector<16x32xf32>
    %233 = arith.addf %224, %232 : vector<16x32xf32>
    %c2_243 = arith.constant 2 : index
    %c4_244 = arith.constant 4 : index
    %c0_245 = arith.constant 0 : index
    %c0_246 = arith.constant 0 : index
    %234 = vector.load %arg7[%c2_243, %c4_244, %c0_245, %c0_246] : memref<4x5x32x32xf32, #tpu.memory_space<vmem>>, vector<1x1x32x32xf32>
    %235 = vector.shape_cast %234 : vector<1x1x32x32xf32> to vector<32x32xf32>
    %cst_247 = arith.constant dense<0.000000e+00> : vector<16x32xf32>
    %236 = tpu.matmul %229, %235, %cst_247 {dimension_numbers = #tpu.dot_dimension_numbers<[1], [0], [0], [1], [0, 0, 1, 1], [], []>} : vector<16x32xf32>, vector<32x32xf32>, vector<16x32xf32> -> vector<16x32xf32>
    %237 = arith.addf %228, %236 : vector<16x32xf32>
    %238 = math.tanh %233 : vector<16x32xf32>
    %cst_248 = arith.constant 0.000000e+00 : f32
    %239 = vector.broadcast %cst_248 : f32 to vector<16x32xf32>
    %240 = arith.subf %239, %237 : vector<16x32xf32>
    %241 = math.exp %240 : vector<16x32xf32>
    %cst_249 = arith.constant 1.000000e+00 : f32
    %242 = vector.broadcast %cst_249 : f32 to vector<16x32xf32>
    %243 = arith.addf %242, %241 : vector<16x32xf32>
    %cst_250 = arith.constant 1.000000e+00 : f32
    %244 = vector.broadcast %cst_250 : f32 to vector<16x32xf32>
    %245 = arith.divf %244, %243 : vector<16x32xf32>
    %246 = arith.mulf %238, %245 : vector<16x32xf32>
    %c2_251 = arith.constant 2 : index
    %c0_252 = arith.constant 0 : index
    %c0_253 = arith.constant 0 : index
    %247 = vector.load %arg11[%c2_251, %c0_252, %c0_253] : memref<4x32x32xf32, #tpu.memory_space<vmem>>, vector<1x32x32xf32>
    %248 = vector.shape_cast %247 : vector<1x32x32xf32> to vector<32x32xf32>
    %cst_254 = arith.constant dense<0.000000e+00> : vector<16x32xf32>
    %249 = tpu.matmul %246, %248, %cst_254 {dimension_numbers = #tpu.dot_dimension_numbers<[1], [0], [0], [1], [0, 0, 1, 1], [], []>} : vector<16x32xf32>, vector<32x32xf32>, vector<16x32xf32> -> vector<16x32xf32>
    %250 = arith.addf %171, %249 : vector<16x32xf32>
    %c2_255 = arith.constant 2 : index
    %c0_256 = arith.constant 0 : index
    %c0_257 = arith.constant 0 : index
    %251 = vector.load %arg12[%c2_255, %c0_256, %c0_257] : memref<4x1x32xf32, #tpu.memory_space<vmem>>, vector<1x1x32xf32>
    %252 = vector.shape_cast %251 : vector<1x1x32xf32> to vector<1x32xf32>
    %253 = vector.broadcast %252 : vector<1x32xf32> to vector<16x32xf32>
    %254 = arith.addf %250, %253 : vector<16x32xf32>
    %c2_258 = arith.constant 2 : index
    %c0_259 = arith.constant 0 : index
    %c0_260 = arith.constant 0 : index
    %255 = vector.load %arg9[%c2_258, %c0_259, %c0_260] : memref<4x32x32xf32, #tpu.memory_space<vmem>>, vector<1x32x32xf32>
    %256 = vector.shape_cast %255 : vector<1x32x32xf32> to vector<32x32xf32>
    %cst_261 = arith.constant dense<0.000000e+00> : vector<16x32xf32>
    %257 = tpu.matmul %246, %256, %cst_261 {dimension_numbers = #tpu.dot_dimension_numbers<[1], [0], [0], [1], [0, 0, 1, 1], [], []>} : vector<16x32xf32>, vector<32x32xf32>, vector<16x32xf32> -> vector<16x32xf32>
    %c2_262 = arith.constant 2 : index
    %c0_263 = arith.constant 0 : index
    %c0_264 = arith.constant 0 : index
    %258 = vector.load %arg10[%c2_262, %c0_263, %c0_264] : memref<4x1x32xf32, #tpu.memory_space<vmem>>, vector<1x1x32xf32>
    %259 = vector.shape_cast %258 : vector<1x1x32xf32> to vector<1x32xf32>
    %260 = vector.broadcast %259 : vector<1x32xf32> to vector<16x32xf32>
    %261 = arith.addf %257, %260 : vector<16x32xf32>
    %262 = arith.addf %181, %261 : vector<16x32xf32>
    %263 = vector.broadcast %3 : vector<16x1xf32> to vector<16x32xf32>
    %264 = arith.mulf %262, %263 : vector<16x32xf32>
    %c8_265 = arith.constant 8 : index
    %c0_266 = arith.constant 0 : index
    %265 = vector.load %arg16[%c8_265, %c0_266] : memref<32x32xf32, #tpu.memory_space<vmem>>, vector<16x32xf32>
    tpu.vector_store %arg16[%c8_265, %c0_266], %264 {strides = array<i32>} : memref<32x32xf32, #tpu.memory_space<vmem>>, vector<16x32xf32>,
    %cst_267 = arith.constant 0.000000e+00 : f32
    %266 = vector.broadcast %cst_267 : f32 to vector<16x32xf32>
    %c3_268 = arith.constant 3 : index
    %c0_269 = arith.constant 0 : index
    %c0_270 = arith.constant 0 : index
    %267 = vector.load %arg6[%c3_268, %c0_269, %c0_270] : memref<4x1x32xf32, #tpu.memory_space<vmem>>, vector<1x1x32xf32>
    %268 = vector.shape_cast %267 : vector<1x1x32xf32> to vector<1x32xf32>
    %269 = vector.broadcast %268 : vector<1x32xf32> to vector<16x32xf32>
    %270 = arith.addf %266, %269 : vector<16x32xf32>
    %cst_271 = arith.constant 0.000000e+00 : f32
    %271 = vector.broadcast %cst_271 : f32 to vector<16x32xf32>
    %c3_272 = arith.constant 3 : index
    %c0_273 = arith.constant 0 : index
    %c0_274 = arith.constant 0 : index
    %272 = vector.load %arg8[%c3_272, %c0_273, %c0_274] : memref<4x1x32xf32, #tpu.memory_space<vmem>>, vector<1x1x32xf32>
    %273 = vector.shape_cast %272 : vector<1x1x32xf32> to vector<1x32xf32>
    %274 = vector.broadcast %273 : vector<1x32xf32> to vector<16x32xf32>
    %275 = arith.addf %271, %274 : vector<16x32xf32>
    %c6_275 = arith.constant 6 : index
    %c0_276 = arith.constant 0 : index
    %276 = vector.load %arg16[%c6_275, %c0_276] : memref<32x32xf32, #tpu.memory_space<vmem>>, vector<16x32xf32>
    %c3_277 = arith.constant 3 : index
    %c0_278 = arith.constant 0 : index
    %c0_279 = arith.constant 0 : index
    %c0_280 = arith.constant 0 : index
    %277 = vector.load %arg5[%c3_277, %c0_278, %c0_279, %c0_280] : memref<4x5x32x32xf32, #tpu.memory_space<vmem>>, vector<1x1x32x32xf32>
    %278 = vector.shape_cast %277 : vector<1x1x32x32xf32> to vector<32x32xf32>
    %cst_281 = arith.constant dense<0.000000e+00> : vector<16x32xf32>
    %279 = tpu.matmul %276, %278, %cst_281 {dimension_numbers = #tpu.dot_dimension_numbers<[1], [0], [0], [1], [0, 0, 1, 1], [], []>} : vector<16x32xf32>, vector<32x32xf32>, vector<16x32xf32> -> vector<16x32xf32>
    %280 = arith.addf %270, %279 : vector<16x32xf32>
    %c3_282 = arith.constant 3 : index
    %c0_283 = arith.constant 0 : index
    %c0_284 = arith.constant 0 : index
    %c0_285 = arith.constant 0 : index
    %281 = vector.load %arg7[%c3_282, %c0_283, %c0_284, %c0_285] : memref<4x5x32x32xf32, #tpu.memory_space<vmem>>, vector<1x1x32x32xf32>
    %282 = vector.shape_cast %281 : vector<1x1x32x32xf32> to vector<32x32xf32>
    %cst_286 = arith.constant dense<0.000000e+00> : vector<16x32xf32>
    %283 = tpu.matmul %276, %282, %cst_286 {dimension_numbers = #tpu.dot_dimension_numbers<[1], [0], [0], [1], [0, 0, 1, 1], [], []>} : vector<16x32xf32>, vector<32x32xf32>, vector<16x32xf32> -> vector<16x32xf32>
    %284 = arith.addf %275, %283 : vector<16x32xf32>
    %c7_287 = arith.constant 7 : index
    %c0_288 = arith.constant 0 : index
    %285 = vector.load %arg16[%c7_287, %c0_288] : memref<32x32xf32, #tpu.memory_space<vmem>>, vector<16x32xf32>
    %c3_289 = arith.constant 3 : index
    %c1_290 = arith.constant 1 : index
    %c0_291 = arith.constant 0 : index
    %c0_292 = arith.constant 0 : index
    %286 = vector.load %arg5[%c3_289, %c1_290, %c0_291, %c0_292] : memref<4x5x32x32xf32, #tpu.memory_space<vmem>>, vector<1x1x32x32xf32>
    %287 = vector.shape_cast %286 : vector<1x1x32x32xf32> to vector<32x32xf32>
    %cst_293 = arith.constant dense<0.000000e+00> : vector<16x32xf32>
    %288 = tpu.matmul %285, %287, %cst_293 {dimension_numbers = #tpu.dot_dimension_numbers<[1], [0], [0], [1], [0, 0, 1, 1], [], []>} : vector<16x32xf32>, vector<32x32xf32>, vector<16x32xf32> -> vector<16x32xf32>
    %289 = arith.addf %280, %288 : vector<16x32xf32>
    %c3_294 = arith.constant 3 : index
    %c1_295 = arith.constant 1 : index
    %c0_296 = arith.constant 0 : index
    %c0_297 = arith.constant 0 : index
    %290 = vector.load %arg7[%c3_294, %c1_295, %c0_296, %c0_297] : memref<4x5x32x32xf32, #tpu.memory_space<vmem>>, vector<1x1x32x32xf32>
    %291 = vector.shape_cast %290 : vector<1x1x32x32xf32> to vector<32x32xf32>
    %cst_298 = arith.constant dense<0.000000e+00> : vector<16x32xf32>
    %292 = tpu.matmul %285, %291, %cst_298 {dimension_numbers = #tpu.dot_dimension_numbers<[1], [0], [0], [1], [0, 0, 1, 1], [], []>} : vector<16x32xf32>, vector<32x32xf32>, vector<16x32xf32> -> vector<16x32xf32>
    %293 = arith.addf %284, %292 : vector<16x32xf32>
    %c8_299 = arith.constant 8 : index
    %c0_300 = arith.constant 0 : index
    %294 = vector.load %arg16[%c8_299, %c0_300] : memref<32x32xf32, #tpu.memory_space<vmem>>, vector<16x32xf32>
    %c3_301 = arith.constant 3 : index
    %c2_302 = arith.constant 2 : index
    %c0_303 = arith.constant 0 : index
    %c0_304 = arith.constant 0 : index
    %295 = vector.load %arg5[%c3_301, %c2_302, %c0_303, %c0_304] : memref<4x5x32x32xf32, #tpu.memory_space<vmem>>, vector<1x1x32x32xf32>
    %296 = vector.shape_cast %295 : vector<1x1x32x32xf32> to vector<32x32xf32>
    %cst_305 = arith.constant dense<0.000000e+00> : vector<16x32xf32>
    %297 = tpu.matmul %294, %296, %cst_305 {dimension_numbers = #tpu.dot_dimension_numbers<[1], [0], [0], [1], [0, 0, 1, 1], [], []>} : vector<16x32xf32>, vector<32x32xf32>, vector<16x32xf32> -> vector<16x32xf32>
    %298 = arith.addf %289, %297 : vector<16x32xf32>
    %c3_306 = arith.constant 3 : index
    %c2_307 = arith.constant 2 : index
    %c0_308 = arith.constant 0 : index
    %c0_309 = arith.constant 0 : index
    %299 = vector.load %arg7[%c3_306, %c2_307, %c0_308, %c0_309] : memref<4x5x32x32xf32, #tpu.memory_space<vmem>>, vector<1x1x32x32xf32>
    %300 = vector.shape_cast %299 : vector<1x1x32x32xf32> to vector<32x32xf32>
    %cst_310 = arith.constant dense<0.000000e+00> : vector<16x32xf32>
    %301 = tpu.matmul %294, %300, %cst_310 {dimension_numbers = #tpu.dot_dimension_numbers<[1], [0], [0], [1], [0, 0, 1, 1], [], []>} : vector<16x32xf32>, vector<32x32xf32>, vector<16x32xf32> -> vector<16x32xf32>
    %302 = arith.addf %293, %301 : vector<16x32xf32>
    %c9_311 = arith.constant 9 : index
    %c0_312 = arith.constant 0 : index
    %303 = vector.load %arg16[%c9_311, %c0_312] : memref<32x32xf32, #tpu.memory_space<vmem>>, vector<16x32xf32>
    %c3_313 = arith.constant 3 : index
    %c3_314 = arith.constant 3 : index
    %c0_315 = arith.constant 0 : index
    %c0_316 = arith.constant 0 : index
    %304 = vector.load %arg5[%c3_313, %c3_314, %c0_315, %c0_316] : memref<4x5x32x32xf32, #tpu.memory_space<vmem>>, vector<1x1x32x32xf32>
    %305 = vector.shape_cast %304 : vector<1x1x32x32xf32> to vector<32x32xf32>
    %cst_317 = arith.constant dense<0.000000e+00> : vector<16x32xf32>
    %306 = tpu.matmul %303, %305, %cst_317 {dimension_numbers = #tpu.dot_dimension_numbers<[1], [0], [0], [1], [0, 0, 1, 1], [], []>} : vector<16x32xf32>, vector<32x32xf32>, vector<16x32xf32> -> vector<16x32xf32>
    %307 = arith.addf %298, %306 : vector<16x32xf32>
    %c3_318 = arith.constant 3 : index
    %c3_319 = arith.constant 3 : index
    %c0_320 = arith.constant 0 : index
    %c0_321 = arith.constant 0 : index
    %308 = vector.load %arg7[%c3_318, %c3_319, %c0_320, %c0_321] : memref<4x5x32x32xf32, #tpu.memory_space<vmem>>, vector<1x1x32x32xf32>
    %309 = vector.shape_cast %308 : vector<1x1x32x32xf32> to vector<32x32xf32>
    %cst_322 = arith.constant dense<0.000000e+00> : vector<16x32xf32>
    %310 = tpu.matmul %303, %309, %cst_322 {dimension_numbers = #tpu.dot_dimension_numbers<[1], [0], [0], [1], [0, 0, 1, 1], [], []>} : vector<16x32xf32>, vector<32x32xf32>, vector<16x32xf32> -> vector<16x32xf32>
    %311 = arith.addf %302, %310 : vector<16x32xf32>
    %c10_323 = arith.constant 10 : index
    %c0_324 = arith.constant 0 : index
    %312 = vector.load %arg16[%c10_323, %c0_324] : memref<32x32xf32, #tpu.memory_space<vmem>>, vector<16x32xf32>
    %c3_325 = arith.constant 3 : index
    %c4_326 = arith.constant 4 : index
    %c0_327 = arith.constant 0 : index
    %c0_328 = arith.constant 0 : index
    %313 = vector.load %arg5[%c3_325, %c4_326, %c0_327, %c0_328] : memref<4x5x32x32xf32, #tpu.memory_space<vmem>>, vector<1x1x32x32xf32>
    %314 = vector.shape_cast %313 : vector<1x1x32x32xf32> to vector<32x32xf32>
    %cst_329 = arith.constant dense<0.000000e+00> : vector<16x32xf32>
    %315 = tpu.matmul %312, %314, %cst_329 {dimension_numbers = #tpu.dot_dimension_numbers<[1], [0], [0], [1], [0, 0, 1, 1], [], []>} : vector<16x32xf32>, vector<32x32xf32>, vector<16x32xf32> -> vector<16x32xf32>
    %316 = arith.addf %307, %315 : vector<16x32xf32>
    %c3_330 = arith.constant 3 : index
    %c4_331 = arith.constant 4 : index
    %c0_332 = arith.constant 0 : index
    %c0_333 = arith.constant 0 : index
    %317 = vector.load %arg7[%c3_330, %c4_331, %c0_332, %c0_333] : memref<4x5x32x32xf32, #tpu.memory_space<vmem>>, vector<1x1x32x32xf32>
    %318 = vector.shape_cast %317 : vector<1x1x32x32xf32> to vector<32x32xf32>
    %cst_334 = arith.constant dense<0.000000e+00> : vector<16x32xf32>
    %319 = tpu.matmul %312, %318, %cst_334 {dimension_numbers = #tpu.dot_dimension_numbers<[1], [0], [0], [1], [0, 0, 1, 1], [], []>} : vector<16x32xf32>, vector<32x32xf32>, vector<16x32xf32> -> vector<16x32xf32>
    %320 = arith.addf %311, %319 : vector<16x32xf32>
    %321 = math.tanh %316 : vector<16x32xf32>
    %cst_335 = arith.constant 0.000000e+00 : f32
    %322 = vector.broadcast %cst_335 : f32 to vector<16x32xf32>
    %323 = arith.subf %322, %320 : vector<16x32xf32>
    %324 = math.exp %323 : vector<16x32xf32>
    %cst_336 = arith.constant 1.000000e+00 : f32
    %325 = vector.broadcast %cst_336 : f32 to vector<16x32xf32>
    %326 = arith.addf %325, %324 : vector<16x32xf32>
    %cst_337 = arith.constant 1.000000e+00 : f32
    %327 = vector.broadcast %cst_337 : f32 to vector<16x32xf32>
    %328 = arith.divf %327, %326 : vector<16x32xf32>
    %329 = arith.mulf %321, %328 : vector<16x32xf32>
    %c3_338 = arith.constant 3 : index
    %c0_339 = arith.constant 0 : index
    %c0_340 = arith.constant 0 : index
    %330 = vector.load %arg11[%c3_338, %c0_339, %c0_340] : memref<4x32x32xf32, #tpu.memory_space<vmem>>, vector<1x32x32xf32>
    %331 = vector.shape_cast %330 : vector<1x32x32xf32> to vector<32x32xf32>
    %cst_341 = arith.constant dense<0.000000e+00> : vector<16x32xf32>
    %332 = tpu.matmul %329, %331, %cst_341 {dimension_numbers = #tpu.dot_dimension_numbers<[1], [0], [0], [1], [0, 0, 1, 1], [], []>} : vector<16x32xf32>, vector<32x32xf32>, vector<16x32xf32> -> vector<16x32xf32>
    %333 = arith.addf %254, %332 : vector<16x32xf32>
    %c3_342 = arith.constant 3 : index
    %c0_343 = arith.constant 0 : index
    %c0_344 = arith.constant 0 : index
    %334 = vector.load %arg12[%c3_342, %c0_343, %c0_344] : memref<4x1x32xf32, #tpu.memory_space<vmem>>, vector<1x1x32xf32>
    %335 = vector.shape_cast %334 : vector<1x1x32xf32> to vector<1x32xf32>
    %336 = vector.broadcast %335 : vector<1x32xf32> to vector<16x32xf32>
    %337 = arith.addf %333, %336 : vector<16x32xf32>
    %338 = vector.broadcast %3 : vector<16x1xf32> to vector<16x32xf32>
    %339 = arith.mulf %337, %338 : vector<16x32xf32>
    %c0_345 = arith.constant 0 : index
    %c0_346 = arith.constant 0 : index
    %340 = vector.load %arg13[%c0_345, %c0_346] : memref<32x2xf32, #tpu.memory_space<vmem>>, vector<32x2xf32>
    %cst_347 = arith.constant dense<0.000000e+00> : vector<16x2xf32>
    %341 = tpu.matmul %339, %340, %cst_347 {dimension_numbers = #tpu.dot_dimension_numbers<[1], [0], [0], [1], [0, 0, 1, 1], [], []>} : vector<16x32xf32>, vector<32x2xf32>, vector<16x2xf32> -> vector<16x2xf32>
    %c0_348 = arith.constant 0 : index
    %c0_349 = arith.constant 0 : index
    %342 = vector.load %arg14[%c0_348, %c0_349] : memref<1x2xf32, #tpu.memory_space<vmem>>, vector<1x2xf32>
    %343 = vector.broadcast %342 : vector<1x2xf32> to vector<16x2xf32>
    %344 = arith.addf %341, %343 : vector<16x2xf32>
    %345 = vector.broadcast %3 : vector<16x1xf32> to vector<16x2xf32>
    %346 = arith.mulf %344, %345 : vector<16x2xf32>
    %347 = vector.broadcast %3 : vector<16x1xf32> to vector<16x2xf32>
    %348 = arith.mulf %5, %347 : vector<16x2xf32>
    %349 = arith.addf %346, %348 : vector<16x2xf32>
    %350 = tpu.concatenate %4, %349 in 1 : vector<16x2xf32>, vector<16x2xf32> -> vector<16x4xf32>
    %c0_350 = arith.constant 0 : index
    %c0_351 = arith.constant 0 : index
    %c0_352 = arith.constant 0 : index
    %351 = vector.load %arg15[%c0_350, %c0_351, %c0_352] : memref<1x16x4xf32, #tpu.memory_space<vmem>>, vector<1x16x4xf32>
    %352 = vector.shape_cast %351 : vector<1x16x4xf32> to vector<16x4xf32>
    %353 = vector.shape_cast %350 : vector<16x4xf32> to vector<1x16x4xf32>
    tpu.vector_store %arg15[%c0_350, %c0_351, %c0_352], %353 {strides = array<i32>} : memref<1x16x4xf32, #tpu.memory_space<vmem>>, vector<1x16x4xf32>,
    return
  }
  func.func @transform_0(%arg0: i32) -> (i32, i32, i32) {
    %c0_i32 = arith.constant 0 : i32
    %c0_i32_0 = arith.constant 0 : i32
    %c0_i32_1 = arith.constant 0 : i32
    return %arg0, %c0_i32, %c0_i32_0 : i32, i32, i32
  }
  func.func @transform_1(%arg0: i32) -> (i32, i32, i32) {
    %c0_i32 = arith.constant 0 : i32
    %c0_i32_0 = arith.constant 0 : i32
    %c0_i32_1 = arith.constant 0 : i32
    return %arg0, %c0_i32, %c0_i32_0 : i32, i32, i32
  }
  func.func @transform_2(%arg0: i32) -> (i32, i32) {
    %c0_i32 = arith.constant 0 : i32
    %c0_i32_0 = arith.constant 0 : i32
    %c0_i32_1 = arith.constant 0 : i32
    return %c0_i32, %c0_i32_0 : i32, i32
  }
  func.func @transform_3(%arg0: i32) -> (i32, i32) {
    %c0_i32 = arith.constant 0 : i32
    %c0_i32_0 = arith.constant 0 : i32
    %c0_i32_1 = arith.constant 0 : i32
    return %c0_i32, %c0_i32_0 : i32, i32
  }
  func.func @transform_4(%arg0: i32) -> (i32, i32, i32, i32) {
    %c0_i32 = arith.constant 0 : i32
    %c0_i32_0 = arith.constant 0 : i32
    %c0_i32_1 = arith.constant 0 : i32
    %c0_i32_2 = arith.constant 0 : i32
    %c0_i32_3 = arith.constant 0 : i32
    return %c0_i32, %c0_i32_0, %c0_i32_1, %c0_i32_2 : i32, i32, i32, i32
  }
  func.func @transform_5(%arg0: i32) -> (i32, i32, i32) {
    %c0_i32 = arith.constant 0 : i32
    %c0_i32_0 = arith.constant 0 : i32
    %c0_i32_1 = arith.constant 0 : i32
    %c0_i32_2 = arith.constant 0 : i32
    return %c0_i32, %c0_i32_0, %c0_i32_1 : i32, i32, i32
  }
  func.func @transform_6(%arg0: i32) -> (i32, i32, i32, i32) {
    %c0_i32 = arith.constant 0 : i32
    %c0_i32_0 = arith.constant 0 : i32
    %c0_i32_1 = arith.constant 0 : i32
    %c0_i32_2 = arith.constant 0 : i32
    %c0_i32_3 = arith.constant 0 : i32
    return %c0_i32, %c0_i32_0, %c0_i32_1, %c0_i32_2 : i32, i32, i32, i32
  }
  func.func @transform_7(%arg0: i32) -> (i32, i32, i32) {
    %c0_i32 = arith.constant 0 : i32
    %c0_i32_0 = arith.constant 0 : i32
    %c0_i32_1 = arith.constant 0 : i32
    %c0_i32_2 = arith.constant 0 : i32
    return %c0_i32, %c0_i32_0, %c0_i32_1 : i32, i32, i32
  }
  func.func @transform_8(%arg0: i32) -> (i32, i32, i32) {
    %c0_i32 = arith.constant 0 : i32
    %c0_i32_0 = arith.constant 0 : i32
    %c0_i32_1 = arith.constant 0 : i32
    %c0_i32_2 = arith.constant 0 : i32
    return %c0_i32, %c0_i32_0, %c0_i32_1 : i32, i32, i32
  }
  func.func @transform_9(%arg0: i32) -> (i32, i32, i32) {
    %c0_i32 = arith.constant 0 : i32
    %c0_i32_0 = arith.constant 0 : i32
    %c0_i32_1 = arith.constant 0 : i32
    %c0_i32_2 = arith.constant 0 : i32
    return %c0_i32, %c0_i32_0, %c0_i32_1 : i32, i32, i32
  }
  func.func @transform_10(%arg0: i32) -> (i32, i32, i32) {
    %c0_i32 = arith.constant 0 : i32
    %c0_i32_0 = arith.constant 0 : i32
    %c0_i32_1 = arith.constant 0 : i32
    %c0_i32_2 = arith.constant 0 : i32
    return %c0_i32, %c0_i32_0, %c0_i32_1 : i32, i32, i32
  }
  func.func @transform_11(%arg0: i32) -> (i32, i32, i32) {
    %c0_i32 = arith.constant 0 : i32
    %c0_i32_0 = arith.constant 0 : i32
    %c0_i32_1 = arith.constant 0 : i32
    %c0_i32_2 = arith.constant 0 : i32
    return %c0_i32, %c0_i32_0, %c0_i32_1 : i32, i32, i32
  }
  func.func @transform_12(%arg0: i32) -> (i32, i32) {
    %c0_i32 = arith.constant 0 : i32
    %c0_i32_0 = arith.constant 0 : i32
    %c0_i32_1 = arith.constant 0 : i32
    return %c0_i32, %c0_i32_0 : i32, i32
  }
  func.func @transform_13(%arg0: i32) -> (i32, i32) {
    %c0_i32 = arith.constant 0 : i32
    %c0_i32_0 = arith.constant 0 : i32
    %c0_i32_1 = arith.constant 0 : i32
    return %c0_i32, %c0_i32_0 : i32, i32
  }
  func.func @transform_14(%arg0: i32) -> (i32, i32, i32) {
    %c0_i32 = arith.constant 0 : i32
    %c0_i32_0 = arith.constant 0 : i32
    %c0_i32_1 = arith.constant 0 : i32
    return %arg0, %c0_i32, %c0_i32_0 : i32, i32, i32
  }
}

</mosaic_0001>

<bundles_post_ra>
// kernel: residual_coupling_block_forward.4
= control target key start
LH: loop header
LB: loop body
LE: loop exit
PB: predicated region body
PF: predicated region fallthrough
CT: control target
= control target key end

     0   :  { %s7240_s0 = inlined_call_operand.vmem [shape: f32[2,16,4], index: 0, kind: input, shape index: {}]   ;;  %s7241_s1 = inlined_call_operand.vmem [shape: f32[2,16,1], index: 1, kind: input, shape index: {}]   ;;  %s7242_s2 = inlined_call_operand.vmem [shape: f32[2,32], index: 2, kind: input, shape index: {}]   ;;  %s7243_s3 = inlined_call_operand.vmem [shape: f32[1,32], index: 3, kind: input, shape index: {}]   ;;  %s7244_s4 = inlined_call_operand.hbm [shape: f32[4,5,32,32], index: 4, kind: input, shape index: {}]   ;;  %s7245_s5 = inlined_call_operand.vmem [shape: f32[4,1,32], index: 5, kind: input, shape index: {}]   ;;  %s7246_s6 = inlined_call_operand.hbm [shape: f32[4,5,32,32], index: 6, kind: input, shape index: {}]   ;;  %s7247_s7 = inlined_call_operand.vmem [shape: f32[4,1,32], index: 7, kind: input, shape index: {}]   ;;  %s7248_s8 = inlined_call_operand.vmem [shape: f32[4,32,32], index: 8, kind: input, shape index: {}]   ;;  %s7249_s9 = inlined_call_operand.vmem [shape: f32[4,1,32], index: 9, kind: input, shape index: {}]   ;;  %s7250_s10 = inlined_call_operand.hbm [shape: f32[4,32,32], index: 10, kind: input, shape index: {}]   ;;  %s7251_s11 = inlined_call_operand.vmem [shape: f32[4,1,32], index: 11, kind: input, shape index: {}]   ;;  %s7252_s12 = inlined_call_operand.vmem [shape: f32[32,2], index: 12, kind: input, shape index: {}]   ;;  %s7253_s13 = inlined_call_operand.vmem [shape: f32[1,2], index: 13, kind: input, shape index: {}]   ;;  %s7254_s14 = inlined_call_operand.vmem [shape: f32[2,16,4], index: 14, kind: output, shape index: {}]  }
   0x1   :  { %7258 = sst [smem:[#allocation11_spill]] %s7253_s13 }
   0x2   :  { %7259 = sst [smem:[#allocation12_spill]] %s7254_s14 }
   0x3   :  { %19 = vsyncpa [#allocation4], 0 }
   0x4   :  { %20 = vsyncpa [#allocation6], 0  ;;  %s6843_s29 = smov 0  }
   0x5 LB: > { %7260 = sst [smem:[#allocation10_spill]] %s6757_s29  ;;  %s6849_s30 = sadd.s32 4294967295, %s6757_s29   ;;  %s6757_s29 = sphi %s6843_s29, %s26_s29  }
   0x6   : > { %p5108_p0 = scmp.ge.s32.totalorder %s6757_s29, 1  ;;  %p361_p1 = scmp.lt.s32.totalorder %s6757_s29, 3 }
   0x7   : > { %p7255_p2 = scmp.eq.s32.totalorder %s6849_s30, 0  ;;  %s6759_s16 = smov [#allocation5]  }
   0x8   : > { %p6854_p3 = pnand %p5108_p0, %p361_p1  ;;  %s395_s17 = sshll.u32 %s6759_s16, 4  ;;  %s396_s17 = int_to_ptr.vmem [resolvable:$true] %s395_s17 }
   0x9   : > { %s6760_s18 = smov [#allocation3]   ;;  %s6761_s21 = smov [#allocation7]  }
   0xa   : > { %s7261_s15 = scalar_select %p6854_p3, 1, 0 }
   0xb   : > { %p6575_p4 = pneg %p6854_p3  ;;  %s379_s19 = sshll.u32 %s6760_s18, 4  ;;  %s6866_s19 = int_to_ptr.vmem [resolvable:$true] %s379_s19 }
   0xc   : > { %s417_s22 = sshll.u32 %s6761_s21, 4  ;;  %s6659_s25 = scalar_lea.hbm %s7246_s6, 10240  ;;  %s6868_s22 = int_to_ptr.vmem [resolvable:$true] %s417_s22 }
   0xd   : > { %p6862_p5 = pnand %p7255_p2, %p6575_p4  ;;  %p6660_p6 = scmp.ne.s32.totalorder %s7246_s6, %s6659_s25 }
   0xe   : > { %p6666_p10 = scmp.lt.u32.totalorder %s6659_s25, %s7246_s6 }
   0xf   : > { %p6878_p7 = pneg %p6862_p5 }
  0x11   : > { %p6662_p8 = pnand %p6878_p7, %p6660_p6 }
  0x13   : > { %p6663_p9 = pneg %p6662_p8 }
  0x15   : > { %p6668_p11 = pnand %p6666_p10, %p6663_p9 }
  0x17   : > { %6671 = shalt.err (!%p6668_p11)
}
  0x18   : > { %s6672_s21 = scalar_lea.vmem %s396_s17, 10240  ;;  %p6680_p1 = scmp.lt.s32.totalorder %s396_s17, %s396_s17 }
  0x19   : > { %p6673_p12 = scmp.ne.s32.totalorder %s396_s17, %s6672_s21  ;;  %p6681_p4 = scmp.lt.s32.totalorder %s6672_s21, %s6672_s21 }
  0x1b   : > { %p6675_p13 = pnand %p6673_p12, %p6878_p7  ;;  %p6682_p2 = por %p6681_p4, %p6680_p1 }
  0x1d   : > { %p6676_p0 = pneg %p6675_p13 }
  0x1f   : > { %p6683_p3 = pnand %p6682_p2, %p6676_p0 }
  0x21   : > { %6686 = shalt.err (!%p6683_p3)
}
  0x22   : > { %s6762_s23 = smov 128   ;;  %s6763_s24 = smov 8  }
  0x23   : > { %6581 = dma.hbm_to_vmem [thread:$0]  (!%p6862_p5), %s7246_s6, 10240, %s396_s17, [#allocation6], %s6762_s23, %s6762_s23, %s6763_s24  }
  0x24   : > { %s6687_s18 = scalar_lea.hbm %s7244_s4, 10240 }
  0x25   : > { %p6688_p2 = scmp.ne.s32.totalorder %s7244_s4, %s6687_s18  ;;  %p6694_p8 = scmp.lt.u32.totalorder %s6687_s18, %s7244_s4 }
  0x27   : > { %p6690_p3 = pnand %p6688_p2, %p6878_p7 }
  0x29   : > { %p6691_p6 = pneg %p6690_p3 }
  0x2b   : > { %p6696_p9 = pnand %p6694_p8, %p6691_p6 }
  0x2d   : > { %6699 = shalt.err (!%p6696_p9)
}
  0x2e   : > { %s6700_s17 = scalar_lea.vmem %s6866_s19, 10240  ;;  %p6708_p13 = scmp.lt.s32.totalorder %s6866_s19, %s6866_s19 }
  0x2f   : > { %p6701_p10 = scmp.ne.s32.totalorder %s6866_s19, %s6700_s17  ;;  %p6709_p0 = scmp.lt.s32.totalorder %s6700_s17, %s6700_s17 }
  0x31   : > { %p6703_p11 = pnand %p6701_p10, %p6878_p7  ;;  %p6710_p1 = por %p6709_p0, %p6708_p13 }
  0x33   : > { %p6704_p12 = pneg %p6703_p11 }
  0x35   : > { %p6711_p4 = pnand %p6710_p1, %p6704_p12 }
  0x37   : > { %6714 = shalt.err (!%p6711_p4)
}
  0x38   : > { %6578 = dma.hbm_to_vmem [thread:$0]  (!%p6862_p5), %s7244_s4, 10240, %s6866_s19, [#allocation4], %s6762_s23, %s6762_s23, %s6763_s24  }
  0x39   : > { %s6715_s26 = scalar_lea.hbm %s7250_s10, 2048 }
  0x3a   : > { %p6716_p2 = scmp.ne.s32.totalorder %s7250_s10, %s6715_s26  ;;  %p6722_p8 = scmp.lt.u32.totalorder %s6715_s26, %s7250_s10 }
  0x3c   : > { %p6718_p3 = pnand %p6716_p2, %p6878_p7 }
  0x3e   : > { %p6719_p6 = pneg %p6718_p3 }
  0x40   : > { %p6724_p9 = pnand %p6722_p8, %p6719_p6 }
  0x42   : > { %6727 = shalt.err (!%p6724_p9)
}
  0x43   : > { %s6728_s19 = scalar_lea.vmem %s6868_s22, 2048  ;;  %p6736_p13 = scmp.lt.s32.totalorder %s6868_s22, %s6868_s22 }
  0x44   : > { %p6729_p10 = scmp.ne.s32.totalorder %s6868_s22, %s6728_s19  ;;  %p6737_p0 = scmp.lt.s32.totalorder %s6728_s19, %s6728_s19 }
  0x46   : > { %p6731_p11 = pnand %p6729_p10, %p6878_p7  ;;  %p6738_p1 = por %p6737_p0, %p6736_p13 }
  0x48   : > { %p6732_p12 = pneg %p6731_p11 }
  0x4a   : > { %p6739_p4 = pnand %p6738_p1, %p6732_p12 }
  0x4c   : > { %6742 = shalt.err (!%p6739_p4)
}
  0x4d   : > { %6584 = dma.hbm_to_vmem [thread:$0]  (!%p6862_p5), %s7250_s10, 2048, %s6868_s22, [#allocation6], %s6762_s23, %s6762_s23, %s6763_s24  }
  0x4e   : > { %p7264_p2 = scmp.ne.s32.totalorder %s7261_s15, 0 }
  0x4f   : > { %p7265_p7 = scmp.eq.s32.totalorder (!%p7264_p2), %s6849_s30, 0 }
  0x50   : > { %458 = sbr.rel (%p7264_p2) target bundleno = 2677 (0xa75), region = 76 }
  0x57   : > { %6748 = dma.done.wait (%p7265_p7), [#allocation4], 10240   ;;  %p7266_p3 = pmov %p7265_p7 }
  0x59   : > { %6750 = vsyncadd (%p7266_p3), [#allocation4], 4294957056  ;;  %p7267_p6 = pmov %p7266_p3 }
  0x5a   : > { %p7268_p8 = pmov %p7266_p3 }
  0x5b   : > { %6752 = dma.done.wait (%p7267_p6), [#allocation6], 12288  }
  0x5c   : > { %6754 = vsyncadd (%p7268_p8), [#allocation6], 4294955008  ;;  %p517_p9 = scmp.lt.s32.totalorder %s6849_s30, 1  ;;  %v6764_v0 = vmov 0   ;;  %vm551_vm0 = vcmask 1041408   ;;  %vm544_vm1 = vcmask 15360  }
  0x5d   : > { %6608 = vset.pattern.permute.xlu0 %v6764_v0  ;;  %v536_v1 = vld [vmem:[%s7242_s2] sm:$0x3]  ;;  %vm642_vm2 = vcmask 261120   ;;  %v6765_v6 = vmov 0.0   ;;  %v755_v8 = vld [vmem:[#allocation5 + $0x8] sm:$0xff]  ;;  %v756_v13 = vld [vmem:[#allocation5 + $0x10] sm:$0xff] }
  0x5e   : > { %s7273_s30 = smov (!%p517_p9, %s6849_s30), 1  ;;  %5554 = vmatprep.subr.msk.mxu0 %vm551_vm0, %v536_v1  ;;  %643 = vst.msk [vmem:[#allocation2] sm:$0xff] %vm642_vm2, %v6765_v6  ;;  %645 = vst.msk [vmem:[#allocation2 + $0x10] sm:$0xff] %vm642_vm2, %v6765_v6  ;;  %v754_v7 = vld [vmem:[#allocation5] sm:$0xff]  ;;  %v668_v11 = vld [vmem:[#allocation3 + $0x8] sm:$0xff]  ;;  %s7269_s16 = sld [smem:[#allocation11_spill]] }
  0x5f   : > { %s6961_s15 = sshll.u32 %s7273_s30, 4  ;;  %5555 = vmatpush3.msk.msra.mxu0 %vm551_vm0, %v536_v1  ;;  %646 = vst.msk [vmem:[#allocation2 + $0x18] sm:$0xff] %vm642_vm2, %v6765_v6  ;;  %644 = vst.msk [vmem:[#allocation2 + $0x8] sm:$0xff] %vm642_vm2, %v6765_v6  ;;  %v667_v9 = vld [vmem:[#allocation3] sm:$0xff]  ;;  %v6095_v10 = vpack.c.bf16 %v755_v8, %v754_v7  ;;  %v757_v14 = vld [vmem:[#allocation5 + $0x18] sm:$0xff]  ;;  %s6766_s30 = smov 126  }
  0x60   : > { %s6967_s28 = scalar_lea.vmem %s7240_s0, %s6961_s15  ;;  %s526_s14 = scalar_lea.vmem %s7241_s1, %s6961_s15  ;;  %v6087_v12 = vpack.c.bf16 %v668_v11, %v667_v9  ;;  %v669_v15 = vld [vmem:[#allocation3 + $0x10] sm:$0xff]  ;;  %v6099_v16 = vpack.c.bf16 %v757_v14, %v756_v13  ;;  %v670_v17 = vld [vmem:[#allocation3 + $0x18] sm:$0xff]  ;;  %v926_v19 = vld [vmem:[#allocation5 + $0x20] sm:$0xff]  ;;  %vm5005_vm3 = vcmask 31744  }
  0x61   : > { %v532_v2 = vld [vmem:[%s6967_s28] sm:$0xff]  ;;  %v533_v3 = vld [vmem:[%s6967_s28 + $0x8] sm:$0xff]  ;;  %6096 = vmatprep.subr.bf16.mxu0 %v6095_v10  ;;  %v6091_v18 = vpack.c.bf16 %v670_v17, %v669_v15  ;;  %v928_v36 = vld [vmem:[#allocation5 + $0x30] sm:$0xff]  ;;  %s6767_s18 = smov 2   ;;  %s7270_s17 = sld [smem:[#allocation12_spill]] }
  0x62   : > { %5556 = vmatprep.mubr.msk.f32.mxu0 %vm544_vm1, %v532_v2  ;;  %v534_v4 = vld [vmem:[%s526_s14] sm:$0xff]  ;;  %v535_v5 = vld [vmem:[%s526_s14 + $0x8] sm:$0xff]  ;;  %6088 = vmatprep.subr.bf16.mxu1 %v6087_v12  ;;  %v929_v37 = vld [vmem:[#allocation5 + $0x38] sm:$0xff] }
  0x63   : > { %632 = vperm.xlu0 %6608, %v534_v4   ;;  %5557 = vmatmul.mubr.msk.f32.vlgmr.msra.gmra.mrb[0].mxu0 %vm544_vm1, %v533_v3  ;;  %v927_v20 = vld [vmem:[#allocation5 + $0x28] sm:$0xff]  ;;  %v838_v21 = vld [vmem:[#allocation3 + $0x20] sm:$0xff]  ;;  %v840_v38 = vld [vmem:[#allocation3 + $0x30] sm:$0xff]  ;;  %v6115_v43 = vpack.c.bf16 %v929_v37, %v928_v36 }
  0x64   : > { %6098 = vmatpush3.bf16.msra.mxu0 %v6095_v10  ;;  %6090 = vmatpush3.bf16.msra.mxu1 %v6087_v12  ;;  %v6111_v22 = vpack.c.bf16 %v927_v20, %v926_v19  ;;  %v839_v23 = vld [vmem:[#allocation3 + $0x28] sm:$0xff]  ;;  %v5123_v29 = vld [vmem:[%s7243_s3] ss:$0 sm:$0xff]  ;;  %v841_v39 = vld [vmem:[#allocation3 + $0x38] sm:$0xff] }
  0x65   : > { %6100 = vmatprep.subr.bf16.mxu0 %v6099_v16  ;;  %6092 = vmatprep.subr.bf16.mxu1 %v6091_v18  ;;  %v6103_v24 = vpack.c.bf16 %v839_v23, %v838_v21  ;;  %v1098_v42 = vld [vmem:[#allocation5 + $0x40] sm:$0xff]  ;;  %v6107_v44 = vpack.c.bf16 %v841_v39, %v840_v38  ;;  %v1099_v45 = vld [vmem:[#allocation5 + $0x48] sm:$0xff]  ;;  %v1100_v51 = vld [vmem:[#allocation5 + $0x50] sm:$0xff] }
  0x66   : > { %v1010_v46 = vld [vmem:[#allocation3 + $0x40] sm:$0xff]  ;;  %v1011_v47 = vld [vmem:[#allocation3 + $0x48] sm:$0xff]  ;;  %v6127_v49 = vpack.c.bf16 %v1099_v45, %v1098_v42  ;;  %v1101_v52 = vld [vmem:[#allocation5 + $0x58] sm:$0xff] }
  0x67   : > { %637 = vperm.xlu0 %6608, %v535_v5   ;;  %v6119_v50 = vpack.c.bf16 %v1011_v47, %v1010_v46  ;;  %v1012_v53 = vld [vmem:[#allocation3 + $0x50] sm:$0xff]  ;;  %v1013_v54 = vld [vmem:[#allocation3 + $0x58] sm:$0xff]  ;;  %v1270_v55 = vld [vmem:[#allocation5 + $0x60] sm:$0xff]  ;;  %v6131_v58 = vpack.c.bf16 %v1101_v52, %v1100_v51  ;;  %s531_s13 = scalar_lea.vmem %s7270_s17, %s6961_s15 }
  0x68   : > { %6102 = vmatpush3.bf16.msra.mxu0 %v6099_v16  ;;  %6094 = vmatpush3.bf16.msra.mxu1 %v6091_v18  ;;  %v1271_v56 = vld [vmem:[#allocation5 + $0x68] sm:$0xff]  ;;  %v6123_v59 = vpack.c.bf16 %v1013_v54, %v1012_v53  ;;  %v1182_v60 = vld [vmem:[#allocation3 + $0x60] sm:$0xff]  ;;  %v1272_v1 = vld [vmem:[#allocation5 + $0x70] sm:$0xff] }
  0x69   : > { %6112 = vmatprep.subr.bf16.mxu0 %v6111_v22  ;;  %6104 = vmatprep.subr.bf16.mxu1 %v6103_v24  ;;  %v1183_v61 = vld [vmem:[#allocation3 + $0x68] sm:$0xff]  ;;  %v6143_v63 = vpack.c.bf16 %v1271_v56, %v1270_v55  ;;  %v1185_v4 = vld [vmem:[#allocation3 + $0x78] sm:$0xff]  ;;  %v1442_v5 = vld [vmem:[#allocation5 + $0x80] sm:$0xff] }
  0x6a   : > { %v6135_v0 = vpack.c.bf16 %v1183_v61, %v1182_v60  ;;  %v1443_v6 = vld [vmem:[#allocation5 + $0x88] sm:$0xff]  ;;  %v1354_v10 = vld [vmem:[#allocation3 + $0x80] sm:$0xff]  ;;  %v1444_v15 = vld [vmem:[#allocation5 + $0x90] sm:$0xff] }
  0x6b   : > { %v1355_v11 = vld [vmem:[#allocation3 + $0x88] sm:$0xff]  ;;  %v6159_v13 = vpack.c.bf16 %v1443_v6, %v1442_v5  ;;  %v1445_v16 = vld [vmem:[#allocation5 + $0x98] sm:$0xff]  ;;  %v1356_v17 = vld [vmem:[#allocation3 + $0x90] sm:$0xff] }
  0x6c   : > { %v6151_v14 = vpack.c.bf16 %v1355_v11, %v1354_v10  ;;  %v1357_v18 = vld [vmem:[#allocation3 + $0x98] sm:$0xff]  ;;  %v6163_v20 = vpack.c.bf16 %v1445_v16, %v1444_v15  ;;  %v1633_v37 = vld [vmem:[%s7248_s8 + $0x10] sm:$0xff]  ;;  %v5127_v51 = vld [vmem:[%s7245_s5] ss:$0 sm:$0xff] }
  0x6d   : > { %v6155_v21 = vpack.c.bf16 %v1357_v18, %v1356_v17  ;;  %v1634_v38 = vld [vmem:[%s7248_s8 + $0x18] sm:$0xff]  ;;  %v1834_v5 = vld [vmem:[#allocation5 + $0xb0] sm:$0xff]  ;;  %v1917_v16 = vld [vmem:[#allocation3 + $0xc8] sm:$0xff] }
  0x6e   : > { %v6179_v39 = vpack.c.bf16 %v1634_v38, %v1633_v37  ;;  %v1835_v6 = vld [vmem:[#allocation5 + $0xb8] sm:$0xff]  ;;  %v5152_v18 = vld [vmem:[%s7249_s9] ss:$0 sm:$0xff]  ;;  %v2177_v38 = vld [vmem:[#allocation5 + $0xe8] sm:$0xff] }
  0x6f   : > { %v1747_v10 = vld [vmem:[#allocation3 + $0xb8] sm:$0xff] }
  0xe2   : > { %v6984_v25 = vpop.permute.xlu0 %632 }
  0xe3   : > { %v4983_v26 = vmul.f32 %v6984_v25, %v532_v2  ;;  %v1273_v2 = vld [vmem:[#allocation5 + $0x78] sm:$0xff] }
  0xe4   : > { %v6147_v8 = vpack.c.bf16 %v1273_v2, %v1272_v1  ;;  %v1833_v1 = vld [vmem:[#allocation5 + $0xa8] sm:$0xff]  ;;  %v1744_v2 = vld [vmem:[#allocation3 + $0xa0] sm:$0xff] }
  0xe5   : > { %4987 = vrot.lane.b32.xlu1 %v4983_v26, %s6766_s30  ;;  %v1540_v26 = vld [vmem:[#allocation7 + $0x8] sm:$0xff] }
  0xe6   : > { %v6987_v27 = vpop.permute.xlu0 %637 }
  0xe7   : > { %v4984_v28 = vmul.f32 %v6987_v27, %v533_v3  ;;  %v1184_v3 = vld [vmem:[#allocation3 + $0x70] sm:$0xff] }
  0xe8   : > { %v6139_v9 = vpack.c.bf16 %v1185_v4, %v1184_v3  ;;  %v1745_v4 = vld [vmem:[#allocation3 + $0xa8] sm:$0xff] }
  0xe9   : > { %4989 = vrot.lane.b32.xlu1 %v4984_v28, %s6766_s30  ;;  %v1631_v28 = vld [vmem:[%s7248_s8] sm:$0xff] }
 0x136   : > { %v5558_v30 = vpop.f32.mrb[0].mxu0 }
 0x137   : > { %v627_v31 = vadd.f32 %v5558_v30, %v5123_v29  ;;  %v621_v32 = vpop.f32.mrb[1].mxu0  ;;  %v1632_v30 = vld [vmem:[%s7248_s8 + $0x8] sm:$0xff] }
 0x138   : > { %v622_v33 = vadd.f32 %v5123_v29, %v621_v32  ;;  %v1542_v32 = vld [vmem:[#allocation7 + $0x18] sm:$0xff] }
 0x139   : > { %v6994_v34 = vmul.f32 %v6987_v27, %v627_v31  ;;  %v1541_v31 = vld [vmem:[#allocation7 + $0x10] sm:$0xff] }
 0x13a   : > { %v6997_v35 = vmul.f32 %v6984_v25, %v622_v33  ;;  %v6175_v33 = vpack.c.bf16 %v1632_v30, %v1631_v28  ;;  %v6171_v36 = vpack.c.bf16 %v1542_v32, %v1541_v31  ;;  %v2007_v30 = vld [vmem:[#allocation5 + $0xd8] sm:$0xff]  ;;  %v1918_v31 = vld [vmem:[#allocation3 + $0xd0] sm:$0xff] }
 0x13b   : > { %648 = vst.msk [vmem:[#allocation2 + $0x10] sm:$0xff] %vm642_vm2, %v6994_v34  ;;  %v1919_v32 = vld [vmem:[#allocation3 + $0xd8] sm:$0xff] }
 0x13c   : > { %647 = vst.msk [vmem:[#allocation2 + $0x8] sm:$0xff] %vm642_vm2, %v6997_v35  ;;  %v6203_v37 = vpack.c.bf16 %v1919_v32, %v1918_v31  ;;  %v5186_v31 = vld [vmem:[%s7248_s8 + $0x38] sm:$0xff] }
 0x142   : > { %v1008_v7 = vld [vmem:[#allocation2 + $0x10] sm:$0xff] }
 0x143   : > { %v665_v40 = vld [vmem:[#allocation2 + $0x6] sm:$0xff]  ;;  %v666_v41 = vld [vmem:[#allocation2 + $0xe] sm:$0xff] }
 0x144   : > { %5567 = vmatprep.mubr.msk.f32.mxu1 %vm642_vm2, %v665_v40  ;;  %5578 = vmatprep.mubr.msk.f32.mxu0 %vm642_vm2, %v665_v40  ;;  %v835_v48 = vld [vmem:[#allocation2 + $0x7] sm:$0xff]  ;;  %v836_v57 = vld [vmem:[#allocation2 + $0xf] sm:$0xff]  ;;  %v5128_v40 = vld [vmem:[%s7247_s7] ss:$0 sm:$0xff] }
 0x145   : > { %5568 = vmatmul.mubr.msk.f32.vlgmr.msra.gmra.mrb[0].mxu1 %vm642_vm2, %v666_v41  ;;  %5579 = vmatmul.mubr.msk.f32.vlgmr.msra.gmra.mrb[2].mxu0 %vm642_vm2, %v666_v41  ;;  %v1007_v62 = vld [vmem:[#allocation2 + $0x8] sm:$0xff]  ;;  %v1180_v19 = vld [vmem:[#allocation2 + $0x11] sm:$0xff] }
 0x146   : > { %6114 = vmatpush3.bf16.msra.mxu0 %v6111_v22  ;;  %6106 = vmatpush3.bf16.msra.mxu1 %v6103_v24  ;;  %v1179_v12 = vld [vmem:[#allocation2 + $0x9] sm:$0xff]  ;;  %v1352_v23 = vld [vmem:[#allocation2 + $0x12] sm:$0xff]  ;;  %v1539_v24 = vld [vmem:[#allocation7] sm:$0xff] }
 0x147   : > { %5589 = vmatprep.mubr.msk.f32.mxu1 %vm642_vm2, %v835_v48  ;;  %5600 = vmatprep.mubr.msk.f32.mxu0 %vm642_vm2, %v835_v48  ;;  %v1351_v22 = vld [vmem:[#allocation2 + $0xa] sm:$0xff]  ;;  %v6167_v29 = vpack.c.bf16 %v1540_v26, %v1539_v24 }
 0x148   : > { %6116 = vmatprep.subr.bf16.mxu0 %v6115_v43  ;;  %6108 = vmatprep.subr.bf16.mxu1 %v6107_v44 }
 0x14a   : > { %6118 = vmatpush3.bf16.msra.mxu0 %v6115_v43  ;;  %6110 = vmatpush3.bf16.msra.mxu1 %v6107_v44 }
 0x14b   : > { %6128 = vmatprep.subr.bf16.mxu0 %v6127_v49  ;;  %6120 = vmatprep.subr.bf16.mxu1 %v6119_v50 }
 0x14d   : > { %5590 = vmatmul.mubr.msk.f32.vlgmr.msra.gmra.mrb[0].mxu1 %vm642_vm2, %v836_v57  ;;  %5601 = vmatmul.mubr.msk.f32.vlgmr.msra.gmra.mrb[2].mxu0 %vm642_vm2, %v836_v57 }
 0x14e   : > { %6130 = vmatpush3.bf16.msra.mxu0 %v6127_v49  ;;  %6122 = vmatpush3.bf16.msra.mxu1 %v6119_v50 }
 0x14f   : > { %5611 = vmatprep.mubr.msk.f32.mxu1 %vm642_vm2, %v1007_v62  ;;  %5622 = vmatprep.mubr.msk.f32.mxu0 %vm642_vm2, %v1007_v62 }
 0x150   : > { %6132 = vmatprep.subr.bf16.mxu0 %v6131_v58  ;;  %6124 = vmatprep.subr.bf16.mxu1 %v6123_v59 }
 0x152   : > { %6134 = vmatpush3.bf16.msra.mxu0 %v6131_v58  ;;  %6126 = vmatpush3.bf16.msra.mxu1 %v6123_v59 }
 0x153   : > { %6144 = vmatprep.subr.bf16.mxu0 %v6143_v63  ;;  %6136 = vmatprep.subr.bf16.mxu1 %v6135_v0 }
 0x155   : > { %5612 = vmatmul.mubr.msk.f32.vlgmr.msra.gmra.mrb[0].mxu1 %vm642_vm2, %v1008_v7  ;;  %5623 = vmatmul.mubr.msk.f32.vlgmr.msra.gmra.mrb[2].mxu0 %vm642_vm2, %v1008_v7  ;;  %v6183_v7 = vpack.c.bf16 %v1745_v4, %v1744_v2  ;;  %v2433_v4 = vld [vmem:[#allocation3 + $0x128] sm:$0xff] }
 0x156   : > { %6146 = vmatpush3.bf16.msra.mxu0 %v6143_v63  ;;  %6138 = vmatpush3.bf16.msra.mxu1 %v6135_v0  ;;  %v1832_v0 = vld [vmem:[#allocation5 + $0xa0] sm:$0xff] }
 0x157   : > { %5633 = vmatprep.mubr.msk.f32.mxu1 %vm642_vm2, %v1179_v12  ;;  %5644 = vmatprep.mubr.msk.f32.mxu0 %vm642_vm2, %v1179_v12  ;;  %v6191_v3 = vpack.c.bf16 %v1833_v1, %v1832_v0  ;;  %v2004_v12 = vld [vmem:[#allocation5 + $0xc0] sm:$0xff] }
 0x158   : > { %6148 = vmatprep.subr.bf16.mxu0 %v6147_v8  ;;  %6140 = vmatprep.subr.bf16.mxu1 %v6139_v9 }
 0x15a   : > { %6150 = vmatpush3.bf16.msra.mxu0 %v6147_v8  ;;  %6142 = vmatpush3.bf16.msra.mxu1 %v6139_v9  ;;  %v6195_v8 = vpack.c.bf16 %v1835_v6, %v1834_v5  ;;  %v1746_v9 = vld [vmem:[#allocation3 + $0xb0] sm:$0xff] }
 0x15b   : > { %6160 = vmatprep.subr.bf16.mxu0 %v6159_v13  ;;  %6152 = vmatprep.subr.bf16.mxu1 %v6151_v14  ;;  %v6187_v11 = vpack.c.bf16 %v1747_v10, %v1746_v9  ;;  %v2523_v9 = vld [vmem:[#allocation5 + $0x138] sm:$0xff]  ;;  %v2434_v10 = vld [vmem:[#allocation3 + $0x130] sm:$0xff] }
 0x15d   : > { %5634 = vmatmul.mubr.msk.f32.vlgmr.msra.gmra.mrb[0].mxu1 %vm642_vm2, %v1180_v19  ;;  %5645 = vmatmul.mubr.msk.f32.vlgmr.msra.gmra.mrb[2].mxu0 %vm642_vm2, %v1180_v19 }
 0x15e   : > { %6162 = vmatpush3.bf16.msra.mxu0 %v6159_v13  ;;  %6154 = vmatpush3.bf16.msra.mxu1 %v6151_v14  ;;  %v2005_v13 = vld [vmem:[#allocation5 + $0xc8] sm:$0xff]  ;;  %v1916_v14 = vld [vmem:[#allocation3 + $0xc0] sm:$0xff] }
 0x15f   : > { %5655 = vmatprep.mubr.msk.f32.mxu1 %vm642_vm2, %v1351_v22  ;;  %5666 = vmatprep.mubr.msk.f32.mxu0 %vm642_vm2, %v1351_v22  ;;  %v6207_v15 = vpack.c.bf16 %v2005_v13, %v2004_v12  ;;  %v6199_v17 = vpack.c.bf16 %v1917_v16, %v1916_v14 }
 0x160   : > { %6164 = vmatprep.subr.bf16.mxu0 %v6163_v20  ;;  %6156 = vmatprep.subr.bf16.mxu1 %v6155_v21 }
 0x162   : > { %6166 = vmatpush3.bf16.msra.mxu0 %v6163_v20  ;;  %6158 = vmatpush3.bf16.msra.mxu1 %v6155_v21 }
 0x163   : > { %6168 = vmatprep.subr.bf16.mxu1 %v6167_v29  ;;  %6176 = vmatprep.subr.bf16.mxu0 %v6175_v33 }
 0x165   : > { %5656 = vmatmul.mubr.msk.f32.vlgmr.msra.gmra.mrb[0].mxu1 %vm642_vm2, %v1352_v23  ;;  %5667 = vmatmul.mubr.msk.f32.vlgmr.msra.gmra.mrb[2].mxu0 %vm642_vm2, %v1352_v23 }
 0x166   : > { %6170 = vmatpush3.bf16.msra.mxu1 %v6167_v29  ;;  %6178 = vmatpush3.bf16.msra.mxu0 %v6175_v33  ;;  %v2006_v29 = vld [vmem:[#allocation5 + $0xd0] sm:$0xff] }
 0x167   : > { %6172 = vmatprep.subr.bf16.mxu1 %v6171_v36  ;;  %6180 = vmatprep.subr.bf16.mxu0 %v6179_v39 }
 0x16a   : > { %6174 = vmatpush3.bf16.msra.mxu1 %v6171_v36  ;;  %6182 = vmatpush3.bf16.msra.mxu0 %v6179_v39  ;;  %v2176_v36 = vld [vmem:[#allocation5 + $0xe0] sm:$0xff] }
 0x16b   : > { %6192 = vmatprep.subr.bf16.mxu0 %v6191_v3  ;;  %6184 = vmatprep.subr.bf16.mxu1 %v6183_v7  ;;  %v2088_v39 = vld [vmem:[#allocation3 + $0xe0] sm:$0xff] }
 0x238   : > { %v5657_v41 = vpop.f32.mrb[0].mxu1  ;;  %v5668_v42 = vpop.f32.mrb[2].mxu0 }
 0x239   : > { %v6473_v43 = vadd.f32 %v5668_v42, %v5128_v40  ;;  %v1430_v44 = vpop.f32.mrb[1].mxu1  ;;  %v1512_v45 = vpop.f32.mrb[3].mxu0  ;;  %v6471_v52 = vadd.f32 %v5657_v41, %v5127_v51  ;;  %v6223_v42 = vpack.c.bf16 %v2177_v38, %v2176_v36 }
 0x23a   : > { %v6474_v46 = vadd.f32 %v5128_v40, %v1512_v45  ;;  %v6472_v53 = vadd.f32 %v5127_v51, %v1430_v44  ;;  %v2089_v40 = vld [vmem:[#allocation3 + $0xe8] sm:$0xff]  ;;  %v2178_v44 = vld [vmem:[#allocation5 + $0xf0] sm:$0xff]  ;;  %v2179_v45 = vld [vmem:[#allocation5 + $0xf8] sm:$0xff] }
 0x23b   : > { %v1526_v47 = vsub.f32 0.0, %v6473_v43  ;;  %v6215_v43 = vpack.c.bf16 %v2089_v40, %v2088_v39  ;;  %v6227_v51 = vpack.c.bf16 %v2179_v45, %v2178_v44  ;;  %v5156_v44 = vld [vmem:[%s7245_s5 + $0x1] ss:$0 sm:$0xff] }
 0x23c   : > { %v1525_v48 = vsub.f32 0.0, %v6474_v46  ;;  %v2090_v46 = vld [vmem:[#allocation3 + $0xf0] sm:$0xff] }
 0x23d   : > { %v1529_v49 = vmul.f32 1.442695, %v1526_v47  ;;  %v2091_v47 = vld [vmem:[#allocation3 + $0xf8] sm:$0xff] }
 0x23e   : > { %v1527_v50 = vmul.f32 1.442695, %v1525_v48  ;;  %v2348_v48 = vld [vmem:[#allocation5 + $0x100] sm:$0xff] }
 0x23f   : > { %6609 = vpow2.f32 %v1529_v49  ;;  %v2349_v49 = vld [vmem:[#allocation5 + $0x108] sm:$0xff] }
 0x240   : > { %6611 = vpow2.f32 %v1527_v50 }
 0x241   : > { %6613 = vtanh.f32 %v6471_v52  ;;  %v6219_v52 = vpack.c.bf16 %v2091_v47, %v2090_v46 }
 0x242   : > { %6615 = vtanh.f32 %v6472_v53  ;;  %v2260_v53 = vld [vmem:[#allocation3 + $0x100] sm:$0xff] }
 0x249   : > { %v6610_v54 = vpop.eup %6609 }
 0x24a   : > { %v6612_v55 = vpop.eup %6611  ;;  %v1532_v56 = vadd.f32 1.0, %v6610_v54  ;;  %v2261_v54 = vld [vmem:[#allocation3 + $0x108] sm:$0xff] }
 0x24b   : > { %v1531_v57 = vadd.f32 1.0, %v6612_v55  ;;  %v6614_v58 = vpop.eup %6613 }
 0x24c   : > { %6617 = vrcp.f32 %v1532_v56  ;;  %v6616_v59 = vpop.eup %6615  ;;  %v6239_v56 = vpack.c.bf16 %v2349_v49, %v2348_v48 }
 0x24d   : > { %6619 = vrcp.f32 %v1531_v57  ;;  %v6231_v57 = vpack.c.bf16 %v2261_v54, %v2260_v53 }
 0x256   : > { %v6618_v60 = vpop.eup %6617 }
 0x257   : > { %v6620_v61 = vpop.eup %6619  ;;  %v1538_v62 = vmul.f32 %v6618_v60, %v6614_v58  ;;  %v2350_v58 = vld [vmem:[#allocation5 + $0x110] sm:$0xff] }
 0x258   : > { %v1537_v63 = vmul.f32 %v6620_v61, %v6616_v59  ;;  %v2351_v59 = vld [vmem:[#allocation5 + $0x118] sm:$0xff]  ;;  %v2262_v60 = vld [vmem:[#allocation3 + $0x110] sm:$0xff] }
 0x259   : > { %v2263_v61 = vld [vmem:[#allocation3 + $0x118] sm:$0xff]  ;;  %v6243_v1 = vpack.c.bf16 %v2351_v59, %v2350_v58  ;;  %v2919_v58 = vld [vmem:[#allocation5 + $0x148] sm:$0xff]  ;;  %v2830_v59 = vld [vmem:[#allocation3 + $0x140] sm:$0xff] }
 0x25a   : > { %5677 = vmatprep.mubr.msk.f32.mxu1 %vm642_vm2, %v1537_v63  ;;  %5688 = vmatprep.mubr.msk.f32.mxu0 %vm642_vm2, %v1537_v63  ;;  %v2521_v63 = vld [vmem:[#allocation5 + $0x128] sm:$0xff]  ;;  %v6235_v2 = vpack.c.bf16 %v2263_v61, %v2262_v60 }
 0x25b   : > { %5678 = vmatmul.mubr.msk.f32.vlgmr.msra.gmra.mrb[2].mxu1 %vm642_vm2, %v1538_v62  ;;  %5689 = vmatmul.mubr.msk.f32.vlgmr.msra.gmra.mrb[4].mxu0 %vm642_vm2, %v1538_v62  ;;  %v2520_v62 = vld [vmem:[#allocation5 + $0x120] sm:$0xff]  ;;  %v2831_v61 = vld [vmem:[#allocation3 + $0x148] sm:$0xff] }
 0x25c   : > { %6194 = vmatpush3.bf16.msra.mxu0 %v6191_v3  ;;  %6186 = vmatpush3.bf16.msra.mxu1 %v6183_v7  ;;  %v2432_v3 = vld [vmem:[#allocation3 + $0x120] sm:$0xff]  ;;  %v6255_v6 = vpack.c.bf16 %v2521_v63, %v2520_v62  ;;  %v2920_v62 = vld [vmem:[#allocation5 + $0x150] sm:$0xff]  ;;  %v2921_v63 = vld [vmem:[#allocation5 + $0x158] sm:$0xff] }
 0x25d   : > { %6196 = vmatprep.subr.bf16.mxu0 %v6195_v8  ;;  %6188 = vmatprep.subr.bf16.mxu1 %v6187_v11  ;;  %v6247_v7 = vpack.c.bf16 %v2433_v4, %v2432_v3  ;;  %v2833_v3 = vld [vmem:[#allocation3 + $0x158] sm:$0xff] }
 0x260   : > { %6198 = vmatpush3.bf16.msra.mxu0 %v6195_v8  ;;  %6190 = vmatpush3.bf16.msra.mxu1 %v6187_v11  ;;  %v2522_v8 = vld [vmem:[#allocation5 + $0x130] sm:$0xff]  ;;  %v2435_v11 = vld [vmem:[#allocation3 + $0x138] sm:$0xff] }
 0x261   : > { %6208 = vmatprep.subr.bf16.mxu0 %v6207_v15  ;;  %6200 = vmatprep.subr.bf16.mxu1 %v6199_v17  ;;  %v6259_v13 = vpack.c.bf16 %v2523_v9, %v2522_v8  ;;  %v6251_v14 = vpack.c.bf16 %v2435_v11, %v2434_v10  ;;  %v3003_v9 = vld [vmem:[#allocation3 + $0x168] sm:$0xff]  ;;  %v5188_v11 = vld [vmem:[%s7249_s9 + $0x1] ss:$0 sm:$0xff] }
 0x32e   : > { %v5690_v19 = vpop.f32.mrb[4].mxu0 }
 0x32f   : > { %v1714_v20 = vadd.f32 %v5690_v19, %v5152_v18  ;;  %v1708_v21 = vpop.f32.mrb[5].mxu0  ;;  %v5183_v19 = vld [vmem:[%s7248_s8 + $0x20] sm:$0xff] }
 0x330   : > { %v1709_v22 = vadd.f32 %v5152_v18, %v1708_v21  ;;  %v2619_v18 = vld [vmem:[#allocation7 + $0x28] sm:$0xff] }
 0x331   : > { %v1718_v23 = vadd.f32 %v1714_v20, %v6994_v34  ;;  %v5184_v21 = vld [vmem:[%s7248_s8 + $0x28] sm:$0xff] }
 0x332   : > { %v1717_v24 = vadd.f32 %v1709_v22, %v6997_v35  ;;  %v6211_v35 = vpack.c.bf16 %v2007_v30, %v2006_v29  ;;  %v2620_v22 = vld [vmem:[#allocation7 + $0x30] sm:$0xff] }
 0x333   : > { %v7051_v26 = vmul.f32 %v1718_v23, %v6987_v27  ;;  %v2621_v23 = vld [vmem:[#allocation7 + $0x38] sm:$0xff]  ;;  %v5185_v30 = vld [vmem:[%s7248_s8 + $0x30] sm:$0xff] }
 0x334   : > { %v7054_v28 = vmul.f32 %v1717_v24, %v6984_v25  ;;  %v6271_v24 = vpack.c.bf16 %v5184_v21, %v5183_v19  ;;  %v6267_v29 = vpack.c.bf16 %v2621_v23, %v2620_v22  ;;  %v6275_v32 = vpack.c.bf16 %v5186_v31, %v5185_v30  ;;  %v3093_v21 = vld [vmem:[#allocation5 + $0x178] sm:$0xff]  ;;  %v3004_v22 = vld [vmem:[#allocation3 + $0x170] sm:$0xff]  ;;  %v3263_v31 = vld [vmem:[#allocation5 + $0x188] sm:$0xff] }
 0x335   : > { %1722 = vst.msk [vmem:[#allocation2 + $0x10] sm:$0xff] %vm642_vm2, %v7051_v26  ;;  %v3005_v23 = vld [vmem:[#allocation3 + $0x178] sm:$0xff] }
 0x336   : > { %1721 = vst.msk [vmem:[#allocation2 + $0x8] sm:$0xff] %vm642_vm2, %v7054_v28  ;;  %v6299_v30 = vpack.c.bf16 %v3005_v23, %v3004_v22  ;;  %v5222_v22 = vld [vmem:[%s7248_s8 + $0x58] sm:$0xff] }
 0x33c   : > { %v2086_v0 = vld [vmem:[#allocation2 + $0x10] sm:$0xff] }
 0x33d   : > { %v1741_v33 = vld [vmem:[#allocation2 + $0x6] sm:$0xff]  ;;  %v1742_v34 = vld [vmem:[#allocation2 + $0xe] sm:$0xff] }
 0x33e   : > { %5699 = vmatprep.mubr.msk.f32.mxu1 %vm642_vm2, %v1741_v33  ;;  %5710 = vmatprep.mubr.msk.f32.mxu0 %vm642_vm2, %v1741_v33  ;;  %v1913_v41 = vld [vmem:[#allocation2 + $0x7] sm:$0xff]  ;;  %v1914_v50 = vld [vmem:[#allocation2 + $0xf] sm:$0xff]  ;;  %v5158_v33 = vld [vmem:[%s7247_s7 + $0x1] ss:$0 sm:$0xff] }
 0x33f   : > { %5700 = vmatmul.mubr.msk.f32.vlgmr.msra.gmra.mrb[4].mxu1 %vm642_vm2, %v1742_v34  ;;  %5711 = vmatmul.mubr.msk.f32.vlgmr.msra.gmra.mrb[6].mxu0 %vm642_vm2, %v1742_v34  ;;  %v2085_v55 = vld [vmem:[#allocation2 + $0x8] sm:$0xff]  ;;  %v2258_v12 = vld [vmem:[#allocation2 + $0x11] sm:$0xff] }
 0x340   : > { %6210 = vmatpush3.bf16.msra.mxu0 %v6207_v15  ;;  %6202 = vmatpush3.bf16.msra.mxu1 %v6199_v17  ;;  %v2257_v5 = vld [vmem:[#allocation2 + $0x9] sm:$0xff]  ;;  %v2430_v16 = vld [vmem:[#allocation2 + $0x12] sm:$0xff]  ;;  %v2618_v17 = vld [vmem:[#allocation7 + $0x20] sm:$0xff] }
 0x341   : > { %5721 = vmatprep.mubr.msk.f32.mxu1 %vm642_vm2, %v1913_v41  ;;  %5732 = vmatprep.mubr.msk.f32.mxu0 %vm642_vm2, %v1913_v41  ;;  %v2429_v15 = vld [vmem:[#allocation2 + $0xa] sm:$0xff]  ;;  %v6263_v20 = vpack.c.bf16 %v2619_v18, %v2618_v17 }
 0x342   : > { %6212 = vmatprep.subr.bf16.mxu0 %v6211_v35  ;;  %6204 = vmatprep.subr.bf16.mxu1 %v6203_v37 }
 0x344   : > { %6214 = vmatpush3.bf16.msra.mxu0 %v6211_v35  ;;  %6206 = vmatpush3.bf16.msra.mxu1 %v6203_v37 }
 0x345   : > { %6224 = vmatprep.subr.bf16.mxu0 %v6223_v42  ;;  %6216 = vmatprep.subr.bf16.mxu1 %v6215_v43 }
 0x347   : > { %5722 = vmatmul.mubr.msk.f32.vlgmr.msra.gmra.mrb[4].mxu1 %vm642_vm2, %v1914_v50  ;;  %5733 = vmatmul.mubr.msk.f32.vlgmr.msra.gmra.mrb[6].mxu0 %vm642_vm2, %v1914_v50 }
 0x348   : > { %6226 = vmatpush3.bf16.msra.mxu0 %v6223_v42  ;;  %6218 = vmatpush3.bf16.msra.mxu1 %v6215_v43 }
 0x349   : > { %5743 = vmatprep.mubr.msk.f32.mxu1 %vm642_vm2, %v2085_v55  ;;  %5754 = vmatprep.mubr.msk.f32.mxu0 %vm642_vm2, %v2085_v55 }
 0x34a   : > { %6228 = vmatprep.subr.bf16.mxu0 %v6227_v51  ;;  %6220 = vmatprep.subr.bf16.mxu1 %v6219_v52 }
 0x34c   : > { %6230 = vmatpush3.bf16.msra.mxu0 %v6227_v51  ;;  %6222 = vmatpush3.bf16.msra.mxu1 %v6219_v52 }
 0x34d   : > { %6240 = vmatprep.subr.bf16.mxu0 %v6239_v56  ;;  %6232 = vmatprep.subr.bf16.mxu1 %v6231_v57 }
 0x34f   : > { %5744 = vmatmul.mubr.msk.f32.vlgmr.msra.gmra.mrb[4].mxu1 %vm642_vm2, %v2086_v0  ;;  %5755 = vmatmul.mubr.msk.f32.vlgmr.msra.gmra.mrb[6].mxu0 %vm642_vm2, %v2086_v0  ;;  %v6279_v0 = vpack.c.bf16 %v2831_v61, %v2830_v59  ;;  %v3519_v61 = vld [vmem:[#allocation3 + $0x1c8] sm:$0xff] }
 0x350   : > { %6242 = vmatpush3.bf16.msra.mxu0 %v6239_v56  ;;  %6234 = vmatpush3.bf16.msra.mxu1 %v6231_v57  ;;  %v2918_v57 = vld [vmem:[#allocation5 + $0x140] sm:$0xff] }
 0x351   : > { %5765 = vmatprep.mubr.msk.f32.mxu1 %vm642_vm2, %v2257_v5  ;;  %5776 = vmatprep.mubr.msk.f32.mxu0 %vm642_vm2, %v2257_v5  ;;  %v6287_v60 = vpack.c.bf16 %v2919_v58, %v2918_v57  ;;  %v3090_v5 = vld [vmem:[#allocation5 + $0x160] sm:$0xff] }
 0x352   : > { %6244 = vmatprep.subr.bf16.mxu0 %v6243_v1  ;;  %6236 = vmatprep.subr.bf16.mxu1 %v6235_v2 }
 0x354   : > { %6246 = vmatpush3.bf16.msra.mxu0 %v6243_v1  ;;  %6238 = vmatpush3.bf16.msra.mxu1 %v6235_v2  ;;  %v6291_v1 = vpack.c.bf16 %v2921_v63, %v2920_v62  ;;  %v2832_v2 = vld [vmem:[#allocation3 + $0x150] sm:$0xff] }
 0x355   : > { %6256 = vmatprep.subr.bf16.mxu0 %v6255_v6  ;;  %6248 = vmatprep.subr.bf16.mxu1 %v6247_v7  ;;  %v6283_v4 = vpack.c.bf16 %v2833_v3, %v2832_v2  ;;  %v3609_v2 = vld [vmem:[#allocation5 + $0x1d8] sm:$0xff]  ;;  %v3520_v3 = vld [vmem:[#allocation3 + $0x1d0] sm:$0xff] }
 0x357   : > { %5766 = vmatmul.mubr.msk.f32.vlgmr.msra.gmra.mrb[4].mxu1 %vm642_vm2, %v2258_v12  ;;  %5777 = vmatmul.mubr.msk.f32.vlgmr.msra.gmra.mrb[6].mxu0 %vm642_vm2, %v2258_v12 }
 0x358   : > { %6258 = vmatpush3.bf16.msra.mxu0 %v6255_v6  ;;  %6250 = vmatpush3.bf16.msra.mxu1 %v6247_v7  ;;  %v3091_v6 = vld [vmem:[#allocation5 + $0x168] sm:$0xff]  ;;  %v3002_v7 = vld [vmem:[#allocation3 + $0x160] sm:$0xff] }
 0x359   : > { %5787 = vmatprep.mubr.msk.f32.mxu1 %vm642_vm2, %v2429_v15  ;;  %5798 = vmatprep.mubr.msk.f32.mxu0 %vm642_vm2, %v2429_v15  ;;  %v6303_v8 = vpack.c.bf16 %v3091_v6, %v3090_v5  ;;  %v6295_v10 = vpack.c.bf16 %v3003_v9, %v3002_v7 }
 0x35a   : > { %6260 = vmatprep.subr.bf16.mxu0 %v6259_v13  ;;  %6252 = vmatprep.subr.bf16.mxu1 %v6251_v14 }
 0x35c   : > { %6262 = vmatpush3.bf16.msra.mxu0 %v6259_v13  ;;  %6254 = vmatpush3.bf16.msra.mxu1 %v6251_v14 }
 0x35d   : > { %6264 = vmatprep.subr.bf16.mxu1 %v6263_v20  ;;  %6272 = vmatprep.subr.bf16.mxu0 %v6271_v24 }
 0x35f   : > { %5788 = vmatmul.mubr.msk.f32.vlgmr.msra.gmra.mrb[4].mxu1 %vm642_vm2, %v2430_v16  ;;  %5799 = vmatmul.mubr.msk.f32.vlgmr.msra.gmra.mrb[6].mxu0 %vm642_vm2, %v2430_v16 }
 0x360   : > { %6266 = vmatpush3.bf16.msra.mxu1 %v6263_v20  ;;  %6274 = vmatpush3.bf16.msra.mxu0 %v6271_v24  ;;  %v3092_v20 = vld [vmem:[#allocation5 + $0x170] sm:$0xff] }
 0x361   : > { %6268 = vmatprep.subr.bf16.mxu1 %v6267_v29  ;;  %6276 = vmatprep.subr.bf16.mxu0 %v6275_v32 }
 0x364   : > { %6270 = vmatpush3.bf16.msra.mxu1 %v6267_v29  ;;  %6278 = vmatpush3.bf16.msra.mxu0 %v6275_v32  ;;  %v3262_v29 = vld [vmem:[#allocation5 + $0x180] sm:$0xff] }
 0x365   : > { %6288 = vmatprep.subr.bf16.mxu0 %v6287_v60  ;;  %6280 = vmatprep.subr.bf16.mxu1 %v6279_v0  ;;  %v3174_v32 = vld [vmem:[#allocation3 + $0x180] sm:$0xff] }
 0x432   : > { %v5789_v34 = vpop.f32.mrb[4].mxu1  ;;  %v5800_v36 = vpop.f32.mrb[6].mxu0 }
 0x433   : > { %v6483_v35 = vadd.f32 %v5800_v36, %v5158_v33  ;;  %v2508_v37 = vpop.f32.mrb[5].mxu1  ;;  %v2590_v38 = vpop.f32.mrb[7].mxu0  ;;  %v6481_v45 = vadd.f32 %v5789_v34, %v5156_v44  ;;  %v6319_v36 = vpack.c.bf16 %v3263_v31, %v3262_v29 }
 0x434   : > { %v6484_v39 = vadd.f32 %v5158_v33, %v2590_v38  ;;  %v6482_v46 = vadd.f32 %v5156_v44, %v2508_v37  ;;  %v3175_v33 = vld [vmem:[#allocation3 + $0x188] sm:$0xff]  ;;  %v3264_v37 = vld [vmem:[#allocation5 + $0x190] sm:$0xff]  ;;  %v3265_v38 = vld [vmem:[#allocation5 + $0x198] sm:$0xff] }
 0x435   : > { %v2604_v40 = vsub.f32 0.0, %v6483_v35  ;;  %v6311_v35 = vpack.c.bf16 %v3175_v33, %v3174_v32  ;;  %v6323_v44 = vpack.c.bf16 %v3265_v38, %v3264_v37  ;;  %v5192_v37 = vld [vmem:[%s7245_s5 + $0x2] ss:$0 sm:$0xff] }
 0x436   : > { %v2603_v41 = vsub.f32 0.0, %v6484_v39  ;;  %v3176_v39 = vld [vmem:[#allocation3 + $0x190] sm:$0xff] }
 0x437   : > { %v2607_v42 = vmul.f32 1.442695, %v2604_v40  ;;  %v3177_v40 = vld [vmem:[#allocation3 + $0x198] sm:$0xff] }
 0x438   : > { %v2605_v43 = vmul.f32 1.442695, %v2603_v41  ;;  %v3434_v41 = vld [vmem:[#allocation5 + $0x1a0] sm:$0xff] }
 0x439   : > { %6621 = vpow2.f32 %v2607_v42  ;;  %v3435_v42 = vld [vmem:[#allocation5 + $0x1a8] sm:$0xff] }
 0x43a   : > { %6623 = vpow2.f32 %v2605_v43 }
 0x43b   : > { %6625 = vtanh.f32 %v6481_v45  ;;  %v6315_v45 = vpack.c.bf16 %v3177_v40, %v3176_v39 }
 0x43c   : > { %6627 = vtanh.f32 %v6482_v46  ;;  %v3346_v46 = vld [vmem:[#allocation3 + $0x1a0] sm:$0xff] }
 0x443   : > { %v6622_v47 = vpop.eup %6621 }
 0x444   : > { %v6624_v48 = vpop.eup %6623  ;;  %v2610_v49 = vadd.f32 1.0, %v6622_v47  ;;  %v3347_v47 = vld [vmem:[#allocation3 + $0x1a8] sm:$0xff] }
 0x445   : > { %v2609_v50 = vadd.f32 1.0, %v6624_v48  ;;  %v6626_v51 = vpop.eup %6625 }
 0x446   : > { %6629 = vrcp.f32 %v2610_v49  ;;  %v6628_v52 = vpop.eup %6627  ;;  %v6335_v49 = vpack.c.bf16 %v3435_v42, %v3434_v41 }
 0x447   : > { %6631 = vrcp.f32 %v2609_v50  ;;  %v6327_v50 = vpack.c.bf16 %v3347_v47, %v3346_v46 }
 0x450   : > { %v6630_v53 = vpop.eup %6629 }
 0x451   : > { %v6632_v54 = vpop.eup %6631  ;;  %v2616_v55 = vmul.f32 %v6630_v53, %v6626_v51  ;;  %v3436_v51 = vld [vmem:[#allocation5 + $0x1b0] sm:$0xff] }
 0x452   : > { %v2615_v56 = vmul.f32 %v6632_v54, %v6628_v52  ;;  %v3437_v52 = vld [vmem:[#allocation5 + $0x1b8] sm:$0xff]  ;;  %v3348_v53 = vld [vmem:[#allocation3 + $0x1b0] sm:$0xff] }
 0x453   : > { %v3349_v54 = vld [vmem:[#allocation3 + $0x1b8] sm:$0xff]  ;;  %v6339_v58 = vpack.c.bf16 %v3437_v52, %v3436_v51  ;;  %v4005_v51 = vld [vmem:[#allocation5 + $0x1e8] sm:$0xff]  ;;  %v3916_v52 = vld [vmem:[#allocation3 + $0x1e0] sm:$0xff] }
 0x454   : > { %5809 = vmatprep.mubr.msk.f32.mxu1 %vm642_vm2, %v2615_v56  ;;  %5820 = vmatprep.mubr.msk.f32.mxu0 %vm642_vm2, %v2615_v56  ;;  %v3607_v56 = vld [vmem:[#allocation5 + $0x1c8] sm:$0xff]  ;;  %v6331_v59 = vpack.c.bf16 %v3349_v54, %v3348_v53 }
 0x455   : > { %5810 = vmatmul.mubr.msk.f32.vlgmr.msra.gmra.mrb[2].mxu1 %vm642_vm2, %v2616_v55  ;;  %5821 = vmatmul.mubr.msk.f32.vlgmr.msra.gmra.mrb[8].mxu0 %vm642_vm2, %v2616_v55  ;;  %v3606_v55 = vld [vmem:[#allocation5 + $0x1c0] sm:$0xff]  ;;  %v3917_v54 = vld [vmem:[#allocation3 + $0x1e8] sm:$0xff] }
 0x456   : > { %6290 = vmatpush3.bf16.msra.mxu0 %v6287_v60  ;;  %6282 = vmatpush3.bf16.msra.mxu1 %v6279_v0  ;;  %v3518_v60 = vld [vmem:[#allocation3 + $0x1c0] sm:$0xff]  ;;  %v6351_v63 = vpack.c.bf16 %v3607_v56, %v3606_v55  ;;  %v4006_v55 = vld [vmem:[#allocation5 + $0x1f0] sm:$0xff]  ;;  %v4007_v56 = vld [vmem:[#allocation5 + $0x1f8] sm:$0xff] }
 0x457   : > { %6292 = vmatprep.subr.bf16.mxu0 %v6291_v1  ;;  %6284 = vmatprep.subr.bf16.mxu1 %v6283_v4  ;;  %v6343_v0 = vpack.c.bf16 %v3519_v61, %v3518_v60  ;;  %v3919_v60 = vld [vmem:[#allocation3 + $0x1f8] sm:$0xff] }
 0x45a   : > { %6294 = vmatpush3.bf16.msra.mxu0 %v6291_v1  ;;  %6286 = vmatpush3.bf16.msra.mxu1 %v6283_v4  ;;  %v3608_v1 = vld [vmem:[#allocation5 + $0x1d0] sm:$0xff]  ;;  %v3521_v4 = vld [vmem:[#allocation3 + $0x1d8] sm:$0xff] }
 0x45b   : > { %6304 = vmatprep.subr.bf16.mxu0 %v6303_v8  ;;  %6296 = vmatprep.subr.bf16.mxu1 %v6295_v10  ;;  %v6355_v6 = vpack.c.bf16 %v3609_v2, %v3608_v1  ;;  %v6347_v7 = vpack.c.bf16 %v3521_v4, %v3520_v3  ;;  %v4089_v2 = vld [vmem:[#allocation3 + $0x208] sm:$0xff]  ;;  %v5224_v4 = vld [vmem:[%s7249_s9 + $0x2] ss:$0 sm:$0xff] }
 0x528   : > { %v5822_v12 = vpop.f32.mrb[8].mxu0 }
 0x529   : > { %v2800_v13 = vadd.f32 %v5822_v12, %v5188_v11  ;;  %v2794_v14 = vpop.f32.mrb[9].mxu0  ;;  %v5219_v12 = vld [vmem:[%s7248_s8 + $0x40] sm:$0xff] }
 0x52a   : > { %v2795_v15 = vadd.f32 %v5188_v11, %v2794_v14  ;;  %v3705_v11 = vld [vmem:[#allocation7 + $0x48] sm:$0xff] }
 0x52b   : > { %v2804_v16 = vadd.f32 %v2800_v13, %v7051_v26  ;;  %v5220_v14 = vld [vmem:[%s7248_s8 + $0x48] sm:$0xff] }
 0x52c   : > { %v2803_v17 = vadd.f32 %v2795_v15, %v7054_v28  ;;  %v6307_v28 = vpack.c.bf16 %v3093_v21, %v3092_v20  ;;  %v3706_v15 = vld [vmem:[#allocation7 + $0x50] sm:$0xff] }
 0x52d   : > { %v7108_v18 = vmul.f32 %v2804_v16, %v6987_v27  ;;  %v3707_v16 = vld [vmem:[#allocation7 + $0x58] sm:$0xff]  ;;  %v5221_v21 = vld [vmem:[%s7248_s8 + $0x50] sm:$0xff] }
 0x52e   : > { %v7111_v19 = vmul.f32 %v2803_v17, %v6984_v25  ;;  %v6367_v17 = vpack.c.bf16 %v5220_v14, %v5219_v12  ;;  %v6363_v20 = vpack.c.bf16 %v3707_v16, %v3706_v15  ;;  %v6371_v23 = vpack.c.bf16 %v5222_v22, %v5221_v21  ;;  %v4179_v14 = vld [vmem:[#allocation5 + $0x218] sm:$0xff]  ;;  %v4090_v15 = vld [vmem:[#allocation3 + $0x210] sm:$0xff]  ;;  %v4348_v21 = vld [vmem:[#allocation5 + $0x220] sm:$0xff] }
 0x52f   : > { %2808 = vst.msk [vmem:[#allocation2 + $0x10] sm:$0xff] %vm642_vm2, %v7108_v18  ;;  %v4091_v16 = vld [vmem:[#allocation3 + $0x218] sm:$0xff]  ;;  %v4349_v22 = vld [vmem:[#allocation5 + $0x228] sm:$0xff] }
 0x530   : > { %2807 = vst.msk [vmem:[#allocation2 + $0x8] sm:$0xff] %vm642_vm2, %v7111_v19 }
 0x536   : > { %v3172_v57 = vld [vmem:[#allocation2 + $0x10] sm:$0xff] }
 0x537   : > { %v2827_v24 = vld [vmem:[#allocation2 + $0x6] sm:$0xff]  ;;  %v2828_v26 = vld [vmem:[#allocation2 + $0xe] sm:$0xff] }
 0x538   : > { %5831 = vmatprep.mubr.msk.f32.mxu1 %vm642_vm2, %v2827_v24  ;;  %5842 = vmatprep.mubr.msk.f32.mxu0 %vm642_vm2, %v2827_v24  ;;  %v2999_v34 = vld [vmem:[#allocation2 + $0x7] sm:$0xff]  ;;  %v3000_v43 = vld [vmem:[#allocation2 + $0xf] sm:$0xff]  ;;  %v5194_v24 = vld [vmem:[%s7247_s7 + $0x2] ss:$0 sm:$0xff] }
 0x539   : > { %5832 = vmatmul.mubr.msk.f32.vlgmr.msra.gmra.mrb[6].mxu1 %vm642_vm2, %v2828_v26  ;;  %5843 = vmatmul.mubr.msk.f32.vlgmr.msra.gmra.mrb[10].mxu0 %vm642_vm2, %v2828_v26  ;;  %v3171_v48 = vld [vmem:[#allocation2 + $0x8] sm:$0xff]  ;;  %v3344_v5 = vld [vmem:[#allocation2 + $0x11] sm:$0xff] }
 0x53a   : > { %6306 = vmatpush3.bf16.msra.mxu0 %v6303_v8  ;;  %6298 = vmatpush3.bf16.msra.mxu1 %v6295_v10  ;;  %v3343_v62 = vld [vmem:[#allocation2 + $0x9] sm:$0xff]  ;;  %v3516_v9 = vld [vmem:[#allocation2 + $0x12] sm:$0xff]  ;;  %v3704_v10 = vld [vmem:[#allocation7 + $0x40] sm:$0xff] }
 0x53b   : > { %5853 = vmatprep.mubr.msk.f32.mxu1 %vm642_vm2, %v2999_v34  ;;  %5864 = vmatprep.mubr.msk.f32.mxu0 %vm642_vm2, %v2999_v34  ;;  %v3515_v8 = vld [vmem:[#allocation2 + $0xa] sm:$0xff]  ;;  %v6359_v13 = vpack.c.bf16 %v3705_v11, %v3704_v10 }
 0x53c   : > { %6308 = vmatprep.subr.bf16.mxu0 %v6307_v28  ;;  %6300 = vmatprep.subr.bf16.mxu1 %v6299_v30 }
 0x53e   : > { %6310 = vmatpush3.bf16.msra.mxu0 %v6307_v28  ;;  %6302 = vmatpush3.bf16.msra.mxu1 %v6299_v30 }
 0x53f   : > { %6320 = vmatprep.subr.bf16.mxu0 %v6319_v36  ;;  %6312 = vmatprep.subr.bf16.mxu1 %v6311_v35 }
 0x541   : > { %5854 = vmatmul.mubr.msk.f32.vlgmr.msra.gmra.mrb[6].mxu1 %vm642_vm2, %v3000_v43  ;;  %5865 = vmatmul.mubr.msk.f32.vlgmr.msra.gmra.mrb[10].mxu0 %vm642_vm2, %v3000_v43 }
 0x542   : > { %6322 = vmatpush3.bf16.msra.mxu0 %v6319_v36  ;;  %6314 = vmatpush3.bf16.msra.mxu1 %v6311_v35 }
 0x543   : > { %5875 = vmatprep.mubr.msk.f32.mxu1 %vm642_vm2, %v3171_v48  ;;  %5886 = vmatprep.mubr.msk.f32.mxu0 %vm642_vm2, %v3171_v48 }
 0x544   : > { %6324 = vmatprep.subr.bf16.mxu0 %v6323_v44  ;;  %6316 = vmatprep.subr.bf16.mxu1 %v6315_v45 }
 0x546   : > { %6326 = vmatpush3.bf16.msra.mxu0 %v6323_v44  ;;  %6318 = vmatpush3.bf16.msra.mxu1 %v6315_v45 }
 0x547   : > { %6336 = vmatprep.subr.bf16.mxu0 %v6335_v49  ;;  %6328 = vmatprep.subr.bf16.mxu1 %v6327_v50 }
 0x549   : > { %5876 = vmatmul.mubr.msk.f32.vlgmr.msra.gmra.mrb[6].mxu1 %vm642_vm2, %v3172_v57  ;;  %5887 = vmatmul.mubr.msk.f32.vlgmr.msra.gmra.mrb[10].mxu0 %vm642_vm2, %v3172_v57  ;;  %v6375_v57 = vpack.c.bf16 %v3917_v54, %v3916_v52  ;;  %v4605_v54 = vld [vmem:[#allocation3 + $0x268] sm:$0xff] }
 0x54a   : > { %6338 = vmatpush3.bf16.msra.mxu0 %v6335_v49  ;;  %6330 = vmatpush3.bf16.msra.mxu1 %v6327_v50  ;;  %v4004_v50 = vld [vmem:[#allocation5 + $0x1e0] sm:$0xff] }
 0x54b   : > { %5897 = vmatprep.mubr.msk.f32.mxu1 %vm642_vm2, %v3343_v62  ;;  %5908 = vmatprep.mubr.msk.f32.mxu0 %vm642_vm2, %v3343_v62  ;;  %v6383_v53 = vpack.c.bf16 %v4005_v51, %v4004_v50  ;;  %v4176_v62 = vld [vmem:[#allocation5 + $0x200] sm:$0xff] }
 0x54c   : > { %6340 = vmatprep.subr.bf16.mxu0 %v6339_v58  ;;  %6332 = vmatprep.subr.bf16.mxu1 %v6331_v59 }
 0x54e   : > { %6342 = vmatpush3.bf16.msra.mxu0 %v6339_v58  ;;  %6334 = vmatpush3.bf16.msra.mxu1 %v6331_v59  ;;  %v6387_v58 = vpack.c.bf16 %v4007_v56, %v4006_v55  ;;  %v3918_v59 = vld [vmem:[#allocation3 + $0x1f0] sm:$0xff] }
 0x54f   : > { %6352 = vmatprep.subr.bf16.mxu0 %v6351_v63  ;;  %6344 = vmatprep.subr.bf16.mxu1 %v6343_v0  ;;  %v6379_v61 = vpack.c.bf16 %v3919_v60, %v3918_v59  ;;  %v4695_v59 = vld [vmem:[#allocation5 + $0x278] sm:$0xff]  ;;  %v4606_v60 = vld [vmem:[#allocation3 + $0x270] sm:$0xff] }
 0x551   : > { %5898 = vmatmul.mubr.msk.f32.vlgmr.msra.gmra.mrb[6].mxu1 %vm642_vm2, %v3344_v5  ;;  %5909 = vmatmul.mubr.msk.f32.vlgmr.msra.gmra.mrb[10].mxu0 %vm642_vm2, %v3344_v5 }
 0x552   : > { %6354 = vmatpush3.bf16.msra.mxu0 %v6351_v63  ;;  %6346 = vmatpush3.bf16.msra.mxu1 %v6343_v0  ;;  %v4177_v63 = vld [vmem:[#allocation5 + $0x208] sm:$0xff]  ;;  %v4088_v0 = vld [vmem:[#allocation3 + $0x200] sm:$0xff] }
 0x553   : > { %5919 = vmatprep.mubr.msk.f32.mxu1 %vm642_vm2, %v3515_v8  ;;  %5930 = vmatprep.mubr.msk.f32.mxu0 %vm642_vm2, %v3515_v8  ;;  %v6399_v1 = vpack.c.bf16 %v4177_v63, %v4176_v62  ;;  %v6391_v3 = vpack.c.bf16 %v4089_v2, %v4088_v0 }
 0x554   : > { %6356 = vmatprep.subr.bf16.mxu0 %v6355_v6  ;;  %6348 = vmatprep.subr.bf16.mxu1 %v6347_v7 }
 0x556   : > { %6358 = vmatpush3.bf16.msra.mxu0 %v6355_v6  ;;  %6350 = vmatpush3.bf16.msra.mxu1 %v6347_v7 }
 0x557   : > { %6360 = vmatprep.subr.bf16.mxu1 %v6359_v13  ;;  %6368 = vmatprep.subr.bf16.mxu0 %v6367_v17 }
 0x559   : > { %5920 = vmatmul.mubr.msk.f32.vlgmr.msra.gmra.mrb[6].mxu1 %vm642_vm2, %v3516_v9  ;;  %5931 = vmatmul.mubr.msk.f32.vlgmr.msra.gmra.mrb[10].mxu0 %vm642_vm2, %v3516_v9 }
 0x55a   : > { %6362 = vmatpush3.bf16.msra.mxu1 %v6359_v13  ;;  %6370 = vmatpush3.bf16.msra.mxu0 %v6367_v17  ;;  %v4178_v13 = vld [vmem:[#allocation5 + $0x210] sm:$0xff] }
 0x55b   : > { %6364 = vmatprep.subr.bf16.mxu1 %v6363_v20  ;;  %6372 = vmatprep.subr.bf16.mxu0 %v6371_v23 }
 0x55e   : > { %6366 = vmatpush3.bf16.msra.mxu1 %v6363_v20  ;;  %6374 = vmatpush3.bf16.msra.mxu0 %v6371_v23  ;;  %v4260_v23 = vld [vmem:[#allocation3 + $0x220] sm:$0xff] }
 0x55f   : > { %6384 = vmatprep.subr.bf16.mxu0 %v6383_v53  ;;  %6376 = vmatprep.subr.bf16.mxu1 %v6375_v57 }
 0x62c   : > { %v5921_v26 = vpop.f32.mrb[6].mxu1  ;;  %v5932_v29 = vpop.f32.mrb[10].mxu0 }
 0x62d   : > { %v6487_v28 = vadd.f32 %v5932_v29, %v5194_v24  ;;  %v3594_v30 = vpop.f32.mrb[7].mxu1  ;;  %v3676_v31 = vpop.f32.mrb[11].mxu0  ;;  %v6485_v38 = vadd.f32 %v5921_v26, %v5192_v37  ;;  %v6415_v29 = vpack.c.bf16 %v4349_v22, %v4348_v21 }
 0x62e   : > { %v6488_v32 = vadd.f32 %v5194_v24, %v3676_v31  ;;  %v6486_v39 = vadd.f32 %v5192_v37, %v3594_v30  ;;  %v4261_v24 = vld [vmem:[#allocation3 + $0x228] sm:$0xff]  ;;  %v4350_v30 = vld [vmem:[#allocation5 + $0x230] sm:$0xff]  ;;  %v4351_v31 = vld [vmem:[#allocation5 + $0x238] sm:$0xff] }
 0x62f   : > { %v3690_v33 = vsub.f32 0.0, %v6487_v28  ;;  %v6407_v28 = vpack.c.bf16 %v4261_v24, %v4260_v23  ;;  %v6419_v37 = vpack.c.bf16 %v4351_v31, %v4350_v30 }
 0x630   : > { %v3689_v34 = vsub.f32 0.0, %v6488_v32  ;;  %v4262_v32 = vld [vmem:[#allocation3 + $0x230] sm:$0xff] }
 0x631   : > { %v3693_v36 = vmul.f32 1.442695, %v3690_v33  ;;  %v4263_v33 = vld [vmem:[#allocation3 + $0x238] sm:$0xff] }
 0x632   : > { %v3691_v35 = vmul.f32 1.442695, %v3689_v34  ;;  %v4520_v34 = vld [vmem:[#allocation5 + $0x240] sm:$0xff] }
 0x633   : > { %6633 = vpow2.f32 %v3693_v36  ;;  %v4521_v36 = vld [vmem:[#allocation5 + $0x248] sm:$0xff] }
 0x634   : > { %6635 = vpow2.f32 %v3691_v35 }
 0x635   : > { %6637 = vtanh.f32 %v6485_v38  ;;  %v6411_v38 = vpack.c.bf16 %v4263_v33, %v4262_v32 }
 0x636   : > { %6639 = vtanh.f32 %v6486_v39  ;;  %v4432_v39 = vld [vmem:[#allocation3 + $0x240] sm:$0xff] }
 0x63d   : > { %v6634_v40 = vpop.eup %6633 }
 0x63e   : > { %v6636_v41 = vpop.eup %6635  ;;  %v3696_v42 = vadd.f32 1.0, %v6634_v40  ;;  %v4433_v40 = vld [vmem:[#allocation3 + $0x248] sm:$0xff] }
 0x63f   : > { %v3695_v43 = vadd.f32 1.0, %v6636_v41  ;;  %v6638_v44 = vpop.eup %6637 }
 0x640   : > { %6641 = vrcp.f32 %v3696_v42  ;;  %v6640_v45 = vpop.eup %6639  ;;  %v6431_v42 = vpack.c.bf16 %v4521_v36, %v4520_v34  ;;  %v4889_v36 = vld [vmem:[%s7252_s12] sm:$0xff] }
 0x641   : > { %6643 = vrcp.f32 %v3695_v43  ;;  %v6423_v43 = vpack.c.bf16 %v4433_v40, %v4432_v39  ;;  %v4892_v39 = vld [vmem:[%s7252_s12 + $0x18] sm:$0xff] }
 0x64a   : > { %v6642_v46 = vpop.eup %6641 }
 0x64b   : > { %v6644_v47 = vpop.eup %6643  ;;  %v3702_v48 = vmul.f32 %v6642_v46, %v6638_v44  ;;  %v4522_v44 = vld [vmem:[#allocation5 + $0x250] sm:$0xff] }
 0x64c   : > { %v3701_v49 = vmul.f32 %v6644_v47, %v6640_v45  ;;  %v4523_v45 = vld [vmem:[#allocation5 + $0x258] sm:$0xff]  ;;  %v4434_v46 = vld [vmem:[#allocation3 + $0x250] sm:$0xff] }
 0x64d   : > { %v4435_v47 = vld [vmem:[#allocation3 + $0x258] sm:$0xff]  ;;  %v6435_v51 = vpack.c.bf16 %v4523_v45, %v4522_v44  ;;  %v5218_v44 = vld [vmem:[%s7251_s11 + $0x2] ss:$0 sm:$0xff] }
 0x64e   : > { %5941 = vmatprep.mubr.msk.f32.mxu1 %vm642_vm2, %v3701_v49  ;;  %5952 = vmatprep.mubr.msk.f32.mxu0 %vm642_vm2, %v3701_v49  ;;  %v4693_v49 = vld [vmem:[#allocation5 + $0x268] sm:$0xff]  ;;  %v6427_v52 = vpack.c.bf16 %v4435_v47, %v4434_v46  ;;  %v5254_v47 = vld [vmem:[%s7251_s11 + $0x3] ss:$0 sm:$0xff] }
 0x64f   : > { %5942 = vmatmul.mubr.msk.f32.vlgmr.msra.gmra.mrb[2].mxu1 %vm642_vm2, %v3702_v48  ;;  %5953 = vmatmul.mubr.msk.f32.vlgmr.msra.gmra.mrb[12].mxu0 %vm642_vm2, %v3702_v48  ;;  %v4692_v48 = vld [vmem:[#allocation5 + $0x260] sm:$0xff] }
 0x650   : > { %6386 = vmatpush3.bf16.msra.mxu0 %v6383_v53  ;;  %6378 = vmatpush3.bf16.msra.mxu1 %v6375_v57  ;;  %v4604_v53 = vld [vmem:[#allocation3 + $0x260] sm:$0xff]  ;;  %v6447_v56 = vpack.c.bf16 %v4693_v49, %v4692_v48 }
 0x651   : > { %6388 = vmatprep.subr.bf16.mxu0 %v6387_v58  ;;  %6380 = vmatprep.subr.bf16.mxu1 %v6379_v61  ;;  %v6439_v57 = vpack.c.bf16 %v4605_v54, %v4604_v53 }
 0x654   : > { %6390 = vmatpush3.bf16.msra.mxu0 %v6387_v58  ;;  %6382 = vmatpush3.bf16.msra.mxu1 %v6379_v61  ;;  %v4694_v58 = vld [vmem:[#allocation5 + $0x270] sm:$0xff]  ;;  %v4607_v61 = vld [vmem:[#allocation3 + $0x278] sm:$0xff] }
 0x655   : > { %6400 = vmatprep.subr.bf16.mxu0 %v6399_v1  ;;  %6392 = vmatprep.subr.bf16.mxu1 %v6391_v3  ;;  %v6451_v63 = vpack.c.bf16 %v4695_v59, %v4694_v58  ;;  %v6443_v0 = vpack.c.bf16 %v4607_v61, %v4606_v60 }
 0x722   : > { %v5954_v5 = vpop.f32.mrb[12].mxu0 }
 0x723   : > { %v3886_v6 = vadd.f32 %v5954_v5, %v5224_v4  ;;  %v3880_v7 = vpop.f32.mrb[13].mxu0  ;;  %v4792_v5 = vld [vmem:[#allocation7 + $0x70] sm:$0xff] }
 0x724   : > { %v3881_v8 = vadd.f32 %v5224_v4, %v3880_v7  ;;  %v4791_v4 = vld [vmem:[#allocation7 + $0x68] sm:$0xff]  ;;  %v4793_v7 = vld [vmem:[#allocation7 + $0x78] sm:$0xff] }
 0x725   : > { %v3890_v9 = vadd.f32 %v3886_v6, %v7108_v18  ;;  %v6403_v18 = vpack.c.bf16 %v4179_v14, %v4178_v13 }
 0x726   : > { %v3889_v10 = vadd.f32 %v3881_v8, %v7111_v19  ;;  %v6395_v19 = vpack.c.bf16 %v4091_v16, %v4090_v15  ;;  %v6459_v8 = vpack.c.bf16 %v4793_v7, %v4792_v5 }
 0x727   : > { %v3892_v11 = vmul.f32 %v3890_v9, %v6987_v27  ;;  %v5230_v9 = vld [vmem:[%s7247_s7 + $0x3] ss:$0 sm:$0xff] }
 0x728   : > { %v3891_v12 = vmul.f32 %v3889_v10, %v6984_v25 }
 0x729   : > { %3894 = vst.msk [vmem:[#allocation2 + $0x10] sm:$0xff] %vm642_vm2, %v3892_v11 }
 0x72a   : > { %3893 = vst.msk [vmem:[#allocation2 + $0x8] sm:$0xff] %vm642_vm2, %v3891_v12 }
 0x730   : > { %v4258_v50 = vld [vmem:[#allocation2 + $0x10] sm:$0xff] }
 0x731   : > { %v3913_v17 = vld [vmem:[#allocation2 + $0x6] sm:$0xff]  ;;  %v3914_v20 = vld [vmem:[#allocation2 + $0xe] sm:$0xff] }
 0x732   : > { %5963 = vmatprep.mubr.msk.f32.mxu1 %vm642_vm2, %v3913_v17  ;;  %5974 = vmatprep.mubr.msk.f32.mxu0 %vm642_vm2, %v3913_v17  ;;  %v4085_v26 = vld [vmem:[#allocation2 + $0x7] sm:$0xff]  ;;  %v4086_v35 = vld [vmem:[#allocation2 + $0xf] sm:$0xff] }
 0x733   : > { %5964 = vmatmul.mubr.msk.f32.vlgmr.msra.gmra.mrb[8].mxu1 %vm642_vm2, %v3914_v20  ;;  %5975 = vmatmul.mubr.msk.f32.vlgmr.msra.gmra.mrb[14].mxu0 %vm642_vm2, %v3914_v20  ;;  %v4257_v41 = vld [vmem:[#allocation2 + $0x8] sm:$0xff]  ;;  %v4430_v62 = vld [vmem:[#allocation2 + $0x11] sm:$0xff] }
 0x734   : > { %6402 = vmatpush3.bf16.msra.mxu0 %v6399_v1  ;;  %6394 = vmatpush3.bf16.msra.mxu1 %v6391_v3  ;;  %v4429_v55 = vld [vmem:[#allocation2 + $0x9] sm:$0xff]  ;;  %v4602_v2 = vld [vmem:[#allocation2 + $0x12] sm:$0xff]  ;;  %v4790_v3 = vld [vmem:[#allocation7 + $0x60] sm:$0xff] }
 0x735   : > { %5985 = vmatprep.mubr.msk.f32.mxu1 %vm642_vm2, %v4085_v26  ;;  %5996 = vmatprep.mubr.msk.f32.mxu0 %vm642_vm2, %v4085_v26  ;;  %v4601_v1 = vld [vmem:[#allocation2 + $0xa] sm:$0xff]  ;;  %v6455_v6 = vpack.c.bf16 %v4791_v4, %v4790_v3 }
 0x736   : > { %6404 = vmatprep.subr.bf16.mxu0 %v6403_v18  ;;  %6396 = vmatprep.subr.bf16.mxu1 %v6395_v19  ;;  %v6657_v3 = vld [vmem:[%s6967_s28 + $0x8] sm:$0xff] }
 0x738   : > { %6406 = vmatpush3.bf16.msra.mxu0 %v6403_v18  ;;  %6398 = vmatpush3.bf16.msra.mxu1 %v6395_v19  ;;  %v5228_v18 = vld [vmem:[%s7245_s5 + $0x3] ss:$0 sm:$0xff] }
 0x739   : > { %6416 = vmatprep.subr.bf16.mxu0 %v6415_v29  ;;  %6408 = vmatprep.subr.bf16.mxu1 %v6407_v28 }
 0x73b   : > { %5986 = vmatmul.mubr.msk.f32.vlgmr.msra.gmra.mrb[8].mxu1 %vm642_vm2, %v4086_v35  ;;  %5997 = vmatmul.mubr.msk.f32.vlgmr.msra.gmra.mrb[14].mxu0 %vm642_vm2, %v4086_v35  ;;  %v4890_v35 = vld [vmem:[%s7252_s12 + $0x8] sm:$0xff] }
 0x73c   : > { %6418 = vmatpush3.bf16.msra.mxu0 %v6415_v29  ;;  %6410 = vmatpush3.bf16.msra.mxu1 %v6407_v28 }
 0x73d   : > { %6007 = vmatprep.mubr.msk.f32.mxu1 %vm642_vm2, %v4257_v41  ;;  %6018 = vmatprep.mubr.msk.f32.mxu0 %vm642_vm2, %v4257_v41  ;;  %v5149_v41 = vld [vmem:[%s7251_s11] ss:$0 sm:$0xff] }
 0x73e   : > { %6420 = vmatprep.subr.bf16.mxu0 %v6419_v37  ;;  %6412 = vmatprep.subr.bf16.mxu1 %v6411_v38 }
 0x740   : > { %6422 = vmatpush3.bf16.msra.mxu0 %v6419_v37  ;;  %6414 = vmatpush3.bf16.msra.mxu1 %v6411_v38  ;;  %v6463_v37 = vpack.c.bf16 %v4890_v35, %v4889_v36  ;;  %v4891_v38 = vld [vmem:[%s7252_s12 + $0x10] sm:$0xff] }
 0x741   : > { %6432 = vmatprep.subr.bf16.mxu0 %v6431_v42  ;;  %6424 = vmatprep.subr.bf16.mxu1 %v6423_v43  ;;  %v6467_v40 = vpack.c.bf16 %v4892_v39, %v4891_v38 }
 0x743   : > { %6008 = vmatmul.mubr.msk.f32.vlgmr.msra.gmra.mrb[8].mxu1 %vm642_vm2, %v4258_v50  ;;  %6019 = vmatmul.mubr.msk.f32.vlgmr.msra.gmra.mrb[14].mxu0 %vm642_vm2, %v4258_v50 }
 0x744   : > { %6434 = vmatpush3.bf16.msra.mxu0 %v6431_v42  ;;  %6426 = vmatpush3.bf16.msra.mxu1 %v6423_v43  ;;  %v5182_v42 = vld [vmem:[%s7251_s11 + $0x1] ss:$0 sm:$0xff] }
 0x745   : > { %6029 = vmatprep.mubr.msk.f32.mxu1 %vm642_vm2, %v4429_v55  ;;  %6040 = vmatprep.mubr.msk.f32.mxu0 %vm642_vm2, %v4429_v55  ;;  %v6478_v43 = vadd.f32 %v5182_v42, %v5149_v41  ;;  %v4988_v55 = vpop.permute.xlu1 %4987 }
 0x746   : > { %6436 = vmatprep.subr.bf16.mxu0 %v6435_v51  ;;  %6428 = vmatprep.subr.bf16.mxu1 %v6427_v52 }
 0x747   : > { %v6479_v45 = vadd.f32 %v6478_v43, %v5218_v44 }
 0x748   : > { %6438 = vmatpush3.bf16.msra.mxu0 %v6435_v51  ;;  %6430 = vmatpush3.bf16.msra.mxu1 %v6427_v52 }
 0x749   : > { %6448 = vmatprep.subr.bf16.mxu0 %v6447_v56  ;;  %6440 = vmatprep.subr.bf16.mxu1 %v6439_v57 }
 0x74b   : > { %6030 = vmatmul.mubr.msk.f32.vlgmr.msra.gmra.mrb[8].mxu1 %vm642_vm2, %v4430_v62  ;;  %6041 = vmatmul.mubr.msk.f32.vlgmr.msra.gmra.mrb[14].mxu0 %vm642_vm2, %v4430_v62  ;;  %v4990_v62 = vpop.permute.xlu1 %4989 }
 0x74c   : > { %6450 = vmatpush3.bf16.msra.mxu0 %v6447_v56  ;;  %6442 = vmatpush3.bf16.msra.mxu1 %v6439_v57  ;;  %v5255_v56 = vld [vmem:[%s7269_s16] ss:$0 sm:$0xff] }
 0x74d   : > { %6051 = vmatprep.mubr.msk.f32.mxu1 %vm642_vm2, %v4601_v1  ;;  %6062 = vmatprep.mubr.msk.f32.mxu0 %vm642_vm2, %v4601_v1 }
 0x74e   : > { %6452 = vmatprep.subr.bf16.mxu0 %v6451_v63  ;;  %6444 = vmatprep.subr.bf16.mxu1 %v6443_v0 }
 0x750   : > { %6454 = vmatpush3.bf16.msra.mxu0 %v6451_v63  ;;  %6446 = vmatpush3.bf16.msra.mxu1 %v6443_v0 }
 0x751   : > { %6456 = vmatprep.subr.bf16.mxu1 %v6455_v6  ;;  %6464 = vmatprep.subr.bf16.mxu0 %v6463_v37 }
 0x753   : > { %6052 = vmatmul.mubr.msk.f32.vlgmr.msra.gmra.mrb[8].mxu1 %vm642_vm2, %v4602_v2  ;;  %6063 = vmatmul.mubr.msk.f32.vlgmr.msra.gmra.mrb[14].mxu0 %vm642_vm2, %v4602_v2 }
 0x754   : > { %6458 = vmatpush3.bf16.msra.mxu1 %v6455_v6  ;;  %6466 = vmatpush3.bf16.msra.mxu0 %v6463_v37 }
 0x755   : > { %6460 = vmatprep.subr.bf16.mxu1 %v6459_v8  ;;  %6468 = vmatprep.subr.bf16.mxu0 %v6467_v40 }
 0x758   : > { %6462 = vmatpush3.bf16.msra.mxu1 %v6459_v8  ;;  %6470 = vmatpush3.bf16.msra.mxu0 %v6467_v40 }
 0x826   : > { %v6053_v10 = vpop.f32.mrb[8].mxu1  ;;  %v6064_v11 = vpop.f32.mrb[14].mxu0 }
 0x827   : > { %v6491_v12 = vadd.f32 %v6064_v11, %v5230_v9  ;;  %v4680_v13 = vpop.f32.mrb[9].mxu1  ;;  %v4762_v14 = vpop.f32.mrb[15].mxu0  ;;  %v6489_v19 = vadd.f32 %v6053_v10, %v5228_v18 }
 0x828   : > { %v6492_v15 = vadd.f32 %v5230_v9, %v4762_v14  ;;  %v6490_v22 = vadd.f32 %v5228_v18, %v4680_v13 }
 0x829   : > { %v4776_v16 = vsub.f32 0.0, %v6491_v12 }
 0x82a   : > { %v4775_v17 = vsub.f32 0.0, %v6492_v15 }
 0x82b   : > { %v4779_v20 = vmul.f32 1.442695, %v4776_v16 }
 0x82c   : > { %v4777_v21 = vmul.f32 1.442695, %v4775_v17 }
 0x82d   : > { %6645 = vpow2.f32 %v4779_v20 }
 0x82e   : > { %6647 = vpow2.f32 %v4777_v21 }
 0x82f   : > { %6649 = vtanh.f32 %v6489_v19 }
 0x830   : > { %6651 = vtanh.f32 %v6490_v22 }
 0x837   : > { %v6646_v23 = vpop.eup %6645 }
 0x838   : > { %v6648_v24 = vpop.eup %6647  ;;  %v4782_v26 = vadd.f32 1.0, %v6646_v23 }
 0x839   : > { %v4781_v29 = vadd.f32 1.0, %v6648_v24  ;;  %v6650_v28 = vpop.eup %6649 }
 0x83a   : > { %6653 = vrcp.f32 %v4782_v26  ;;  %v6652_v30 = vpop.eup %6651 }
 0x83b   : > { %6655 = vrcp.f32 %v4781_v29 }
 0x844   : > { %v6654_v31 = vpop.eup %6653 }
 0x845   : > { %v6656_v32 = vpop.eup %6655  ;;  %v4788_v33 = vmul.f32 %v6654_v31, %v6650_v28 }
 0x846   : > { %v4787_v34 = vmul.f32 %v6656_v32, %v6652_v30 }
 0x848   : > { %6073 = vmatprep.mubr.msk.f32.mxu1 %vm642_vm2, %v4787_v34 }
 0x849   : > { %6074 = vmatmul.mubr.msk.f32.vlgmr.msra.gmra.mrb[2].mxu1 %vm642_vm2, %v4788_v33 }
 0x91c   : > { %v6075_v46 = vpop.f32.mrb[2].mxu1 }
 0x91d   : > { %v6477_v48 = vadd.f32 %v6479_v45, %v6075_v46  ;;  %v4866_v49 = vpop.f32.mrb[3].mxu1 }
 0x91e   : > { %v6480_v50 = vadd.f32 %v6479_v45, %v4866_v49 }
 0x91f   : > { %v4886_v51 = vadd.f32 %v6477_v48, %v5254_v47 }
 0x920   : > { %v4885_v52 = vadd.f32 %v6480_v50, %v5254_v47 }
 0x921   : > { %v4888_v54 = vmul.f32 %v4886_v51, %v6987_v27 }
 0x922   : > { %v4887_v53 = vmul.f32 %v4885_v52, %v6984_v25 }
 0x924   : > { %6084 = vmatprep.mubr.msk.f32.mxu0 %vm642_vm2, %v4887_v53 }
 0x925   : > { %6085 = vmatmul.mubr.msk.f32.vlgmr.msra.gmra.mrb[16].mxu0 %vm642_vm2, %v4888_v54 }
 0x9f8   : > { %v6086_v57 = vpop.f32.mrb[16].mxu0 }
 0x9f9   : > { %v4978_v58 = vadd.f32 %v6086_v57, %v5255_v56  ;;  %v4972_v59 = vpop.f32.mrb[17].mxu0 }
 0x9fa   : > { %v4973_v60 = vadd.f32 %v5255_v56, %v4972_v59 }
 0x9fb   : > { %v4982_v61 = vmul.f32 %v4978_v58, %v6987_v27  ;;  %v6658_v27 = vld [vmem:[%s6967_s28] sm:$0xff] }
 0x9fc   : > { %v4981_v63 = vmul.f32 %v4973_v60, %v6984_v25 }
 0x9fd   : > { %v4994_v0 = vadd.f32 %v4990_v62, %v4982_v61 }
 0x9fe   : > { %v4993_v1 = vadd.f32 %v4988_v55, %v4981_v63 }
 0x9ff   : > { %4999 = vrot.lane.b32.xlu1 %v4994_v0, %s6767_s18 }
 0xa00   : > { %4997 = vrot.lane.b32.xlu0 %v4993_v1, %s6767_s18 }
 0xa71   : > { %v5000_v2 = vpop.permute.xlu1 %4999 }
 0xa72   : > { %v5004_v4 = vsel %vm544_vm1, %v6657_v3, %v5000_v2  ;;  %v4998_v5 = vpop.permute.xlu0 %4997 }
 0xa73   : > { %5007 = vst.msk [vmem:[%s531_s13 + $0x8] sm:$0xff] %vm5005_vm3, %v5004_v4  ;;  %v5003_v6 = vsel %vm544_vm1, %v6658_v27, %v4998_v5 }
 0xa74   : > { %5006 = vst.msk [vmem:[%s531_s13] sm:$0xff] %vm5005_vm3, %v5003_v6 }
 0xa75 PF: > { %s7271_s20 = sld [smem:[#allocation10_spill]] }
 0xa7b   : > { %s26_s29 = sadd.s32 1, %s7271_s20  }
 0xa7c   : > { %p23_p5 = scmp.ge.s32.totalorder %s26_s29, 4  }
 0xa7e   :  { %25 = sbr.rel (!%p23_p5) target bundleno = 5 (0x5), region = 176 }
 0xa85   :  { %5029 = vsyncpa [#allocation4], 1 }
 0xa86   :  { %5031 = vsyncpa [#allocation4 + $0x1], 1 }
 0xa87   :  { %5032 = vsyncpa [#allocation6], 1 }

// kernel: residual_coupling_block_forward.5
= control target key start
LH: loop header
LB: loop body
LE: loop exit
PB: predicated region body
PF: predicated region fallthrough
CT: control target
= control target key end

     0   :  { %s6796_s29 = smov 0   ;;  %s7611_s0 = inlined_call_operand.vmem [shape: f32[2,16,4], index: 0, kind: input, shape index: {}]   ;;  %s7612_s1 = inlined_call_operand.vmem [shape: f32[2,16,1], index: 1, kind: input, shape index: {}]   ;;  %s7613_s2 = inlined_call_operand.vmem [shape: f32[2,32], index: 2, kind: input, shape index: {}]   ;;  %s7614_s3 = inlined_call_operand.vmem [shape: f32[1,32], index: 3, kind: input, shape index: {}]   ;;  %s7615_s4 = inlined_call_operand.vmem [shape: f32[4,5,32,32], index: 4, kind: input, shape index: {}]   ;;  %s7616_s5 = inlined_call_operand.vmem [shape: f32[4,1,32], index: 5, kind: input, shape index: {}]   ;;  %s7617_s6 = inlined_call_operand.vmem [shape: f32[4,5,32,32], index: 6, kind: input, shape index: {}]   ;;  %s7618_s7 = inlined_call_operand.vmem [shape: f32[4,1,32], index: 7, kind: input, shape index: {}]   ;;  %s7619_s8 = inlined_call_operand.vmem [shape: f32[4,32,32], index: 8, kind: input, shape index: {}]   ;;  %s7620_s9 = inlined_call_operand.vmem [shape: f32[4,1,32], index: 9, kind: input, shape index: {}]   ;;  %s7621_s10 = inlined_call_operand.vmem [shape: f32[4,32,32], index: 10, kind: input, shape index: {}]   ;;  %s7622_s11 = inlined_call_operand.vmem [shape: f32[4,1,32], index: 11, kind: input, shape index: {}]   ;;  %s7623_s12 = inlined_call_operand.vmem [shape: f32[32,2], index: 12, kind: input, shape index: {}]   ;;  %s7624_s13 = inlined_call_operand.vmem [shape: f32[1,2], index: 13, kind: input, shape index: {}]   ;;  %s7625_s14 = inlined_call_operand.vmem [shape: f32[2,16,4], index: 14, kind: output, shape index: {}]  }
   0x1 LB: > { %s5031_s30 = sadd.s32 4294967295, %s6715_s29   ;;  %p5035_p0 = scmp.ge.s32.totalorder %s6715_s29, 1  ;;  %s6715_s29 = sphi %s6796_s29, %s24_s29  }
   0x2   : > { %p422_p1 = scmp.lt.s32.totalorder %s6715_s29, 3 }
   0x4   : > { %p423_p2 = pnand %p5035_p0, %p422_p1 }
   0x5   : > { %v492_v0 = vld [vmem:[%s7613_s2] sm:$0x3] (!%p423_p2)  ;;  %vm507_vm0 = vcmask (!%p423_p2), 1041408   ;;  %p473_p3 = scmp.lt.s32.totalorder (!%p423_p2), %s5031_s30, 1  ;;  %v6717_v1 = vmov (!%p423_p2), 0   ;;  %vm500_vm1 = vcmask (!%p423_p2), 15360  }
   0x6   : > { %426 = sbr.rel (%p423_p2) target bundleno = 2596 (0xa24), region = 76  ;;  %5637 = vmatprep.subr.msk.mxu0 (!%p423_p2), %vm507_vm0, %v492_v0  ;;  %6658 = vset.pattern.permute.xlu0 (!%p423_p2), %v6717_v1  ;;  %vm598_vm2 = vcmask (!%p423_p2), 261120   ;;  %v6718_v6 = vmov (!%p423_p2), 0.0   ;;  %v710_v7 = vld [vmem:[%s7617_s6] sm:$0xff] (!%p423_p2)  ;;  %v711_v8 = vld [vmem:[%s7617_s6 + $0x8] sm:$0xff] (!%p423_p2)  ;;  %v712_v13 = vld [vmem:[%s7617_s6 + $0x10] sm:$0xff] (!%p423_p2) }
   0x7   : > { %5638 = vmatpush3.msk.msra.mxu0 (!%p423_p2), %vm507_vm0, %v492_v0  ;;  %599 = vst.msk [vmem:[#allocation2] sm:$0xff] (!%p423_p2), %vm598_vm2, %v6718_v6  ;;  %601 = vst.msk [vmem:[#allocation2 + $0x10] sm:$0xff] (!%p423_p2), %vm598_vm2, %v6718_v6  ;;  %v623_v9 = vld [vmem:[%s7615_s4] sm:$0xff] (!%p423_p2)  ;;  %v6178_v10 = vpack.c.bf16 (!%p423_p2), %v711_v8, %v710_v7  ;;  %v624_v11 = vld [vmem:[%s7615_s4 + $0x8] sm:$0xff] (!%p423_p2)  ;;  %s6719_s22 = smov (!%p423_p2), 126   ;;  %s6720_s27 = smov (!%p423_p2), 2  }
   0x8   : > { %602 = vst.msk [vmem:[#allocation2 + $0x18] sm:$0xff] (!%p423_p2), %vm598_vm2, %v6718_v6  ;;  %600 = vst.msk [vmem:[#allocation2 + $0x8] sm:$0xff] (!%p423_p2), %vm598_vm2, %v6718_v6  ;;  %v6170_v12 = vpack.c.bf16 (!%p423_p2), %v624_v11, %v623_v9  ;;  %v713_v14 = vld [vmem:[%s7617_s6 + $0x18] sm:$0xff] (!%p423_p2)  ;;  %v625_v15 = vld [vmem:[%s7615_s4 + $0x10] sm:$0xff] (!%p423_p2)  ;;  %vm4961_vm3 = vcmask (!%p423_p2), 31744  }
   0x9   : > { %6179 = vmatprep.subr.bf16.mxu0 (!%p423_p2), %v6178_v10  ;;  %v6182_v16 = vpack.c.bf16 (!%p423_p2), %v713_v14, %v712_v13  ;;  %v626_v17 = vld [vmem:[%s7615_s4 + $0x18] sm:$0xff] (!%p423_p2)  ;;  %v5058_v19 = vld [vmem:[%s7617_s6 + $0x20] sm:$0xff] (!%p423_p2)  ;;  %v5059_v20 = vld [vmem:[%s7617_s6 + $0x28] sm:$0xff] (!%p423_p2) }
   0xa   : > { %6171 = vmatprep.subr.bf16.mxu1 (!%p423_p2), %v6170_v12  ;;  %v6174_v18 = vpack.c.bf16 (!%p423_p2), %v626_v17, %v625_v15  ;;  %v5052_v21 = vld [vmem:[%s7615_s4 + $0x20] sm:$0xff] (!%p423_p2)  ;;  %v6194_v22 = vpack.c.bf16 (!%p423_p2), %v5059_v20, %v5058_v19  ;;  %v5053_v23 = vld [vmem:[%s7615_s4 + $0x28] sm:$0xff] (!%p423_p2)  ;;  %v5060_v36 = vld [vmem:[%s7617_s6 + $0x30] sm:$0xff] (!%p423_p2) }
   0xb   : > { %6173 = vmatpush3.bf16.msra.mxu1 (!%p423_p2), %v6170_v12  ;;  %v6186_v24 = vpack.c.bf16 (!%p423_p2), %v5053_v23, %v5052_v21  ;;  %v5042_v29 = vld [vmem:[%s7614_s3] ss:$0 sm:$0xff] (!%p423_p2)  ;;  %v5061_v37 = vld [vmem:[%s7617_s6 + $0x38] sm:$0xff] (!%p423_p2)  ;;  %v5054_v38 = vld [vmem:[%s7615_s4 + $0x30] sm:$0xff] (!%p423_p2) }
   0xc   : > { %6175 = vmatprep.subr.bf16.mxu1 (!%p423_p2), %v6174_v18  ;;  %v5055_v39 = vld [vmem:[%s7615_s4 + $0x38] sm:$0xff] (!%p423_p2)  ;;  %v5070_v42 = vld [vmem:[%s7617_s6 + $0x40] sm:$0xff] (!%p423_p2)  ;;  %v6198_v43 = vpack.c.bf16 (!%p423_p2), %v5061_v37, %v5060_v36  ;;  %v5071_v45 = vld [vmem:[%s7617_s6 + $0x48] sm:$0xff] (!%p423_p2) }
   0xd   : > { %s7627_s30 = smov (!%p473_p3, %s5031_s30), 1  ;;  %v6190_v44 = vpack.c.bf16 %v5055_v39, %v5054_v38  ;;  %v5064_v46 = vld [vmem:[%s7615_s4 + $0x40] sm:$0xff]  ;;  %v5065_v47 = vld [vmem:[%s7615_s4 + $0x48] sm:$0xff]  ;;  %v6210_v49 = vpack.c.bf16 %v5071_v45, %v5070_v42  ;;  %v5072_v51 = vld [vmem:[%s7617_s6 + $0x50] sm:$0xff] }
   0xe   : > { %s6807_s17 = sshll.u32 %s7627_s30, 4  ;;  %v6202_v50 = vpack.c.bf16 %v5065_v47, %v5064_v46  ;;  %v5073_v52 = vld [vmem:[%s7617_s6 + $0x58] sm:$0xff]  ;;  %v5066_v53 = vld [vmem:[%s7615_s4 + $0x50] sm:$0xff]  ;;  %v5082_v55 = vld [vmem:[%s7617_s6 + $0x60] sm:$0xff] }
   0xf   : > { %s6813_s20 = scalar_lea.vmem %s7611_s0, %s6807_s17  ;;  %s482_s23 = scalar_lea.vmem %s7612_s1, %s6807_s17  ;;  %6177 = vmatpush3.bf16.msra.mxu1 %v6174_v18  ;;  %v5067_v54 = vld [vmem:[%s7615_s4 + $0x58] sm:$0xff]  ;;  %v5083_v56 = vld [vmem:[%s7617_s6 + $0x68] sm:$0xff]  ;;  %v6214_v58 = vpack.c.bf16 %v5073_v52, %v5072_v51  ;;  %v5076_v60 = vld [vmem:[%s7615_s4 + $0x60] sm:$0xff] }
  0x10   : > { %v488_v2 = vld [vmem:[%s6813_s20] sm:$0xff]  ;;  %v489_v3 = vld [vmem:[%s6813_s20 + $0x8] sm:$0xff]  ;;  %6187 = vmatprep.subr.bf16.mxu1 %v6186_v24  ;;  %v6206_v59 = vpack.c.bf16 %v5067_v54, %v5066_v53  ;;  %v6226_v63 = vpack.c.bf16 %v5083_v56, %v5082_v55  ;;  %v5084_v1 = vld [vmem:[%s7617_s6 + $0x70] sm:$0xff]  ;;  %s487_s15 = scalar_lea.vmem %s7625_s14, %s6807_s17 }
  0x11   : > { %v490_v4 = vld [vmem:[%s482_s23] sm:$0xff]  ;;  %5639 = vmatprep.mubr.msk.f32.mxu0 %vm500_vm1, %v488_v2  ;;  %v491_v5 = vld [vmem:[%s482_s23 + $0x8] sm:$0xff]  ;;  %v5096_v15 = vld [vmem:[%s7617_s6 + $0x90] sm:$0xff] }
  0x12   : > { %588 = vperm.xlu0 %6658, %v490_v4   ;;  %5640 = vmatmul.mubr.msk.f32.vlgmr.msra.gmra.mrb[0].mxu0 %vm500_vm1, %v489_v3  ;;  %v5077_v61 = vld [vmem:[%s7615_s4 + $0x68] sm:$0xff]  ;;  %v5079_v4 = vld [vmem:[%s7615_s4 + $0x78] sm:$0xff]  ;;  %v5090_v17 = vld [vmem:[%s7615_s4 + $0x90] sm:$0xff] }
  0x13   : > { %6181 = vmatpush3.bf16.msra.mxu0 %v6178_v10  ;;  %v6218_v0 = vpack.c.bf16 %v5077_v61, %v5076_v60  ;;  %v5095_v6 = vld [vmem:[%s7617_s6 + $0x88] sm:$0xff]  ;;  %v5088_v10 = vld [vmem:[%s7615_s4 + $0x80] sm:$0xff]  ;;  %v5091_v18 = vld [vmem:[%s7615_s4 + $0x98] sm:$0xff] }
  0x14   : > { %6183 = vmatprep.subr.bf16.mxu0 %v6182_v16  ;;  %v5089_v11 = vld [vmem:[%s7615_s4 + $0x88] sm:$0xff]  ;;  %v6238_v21 = vpack.c.bf16 %v5091_v18, %v5090_v17  ;;  %v1589_v37 = vld [vmem:[%s7619_s8 + $0x10] sm:$0xff]  ;;  %v1590_v38 = vld [vmem:[%s7619_s8 + $0x18] sm:$0xff] }
  0x15   : > { %v6234_v14 = vpack.c.bf16 %v5089_v11, %v5088_v10  ;;  %v6262_v39 = vpack.c.bf16 %v1590_v38, %v1589_v37  ;;  %v5046_v51 = vld [vmem:[%s7616_s5] ss:$0 sm:$0xff]  ;;  %v5113_v10 = vld [vmem:[%s7615_s4 + $0xb8] sm:$0xff]  ;;  %v5141_v38 = vld [vmem:[%s7617_s6 + $0xe8] sm:$0xff] }
  0x16   : > { %593 = vperm.xlu0 %6658, %v491_v5   ;;  %v5094_v5 = vld [vmem:[%s7617_s6 + $0x80] sm:$0xff] }
  0x17   : > { %6185 = vmatpush3.bf16.msra.mxu0 %v6182_v16  ;;  %v6242_v13 = vpack.c.bf16 %v5095_v6, %v5094_v5  ;;  %v5097_v16 = vld [vmem:[%s7617_s6 + $0x98] sm:$0xff]  ;;  %v5118_v5 = vld [vmem:[%s7617_s6 + $0xb0] sm:$0xff]  ;;  %v5103_v18 = vld [vmem:[%s7620_s9] ss:$0 sm:$0xff] }
  0x18   : > { %6195 = vmatprep.subr.bf16.mxu0 %v6194_v22  ;;  %v6246_v20 = vpack.c.bf16 %v5097_v16, %v5096_v15  ;;  %v5119_v6 = vld [vmem:[%s7617_s6 + $0xb8] sm:$0xff]  ;;  %v5123_v16 = vld [vmem:[%s7615_s4 + $0xc8] sm:$0xff] }
  0x91   : > { %v6863_v25 = vpop.permute.xlu0 %588 }
  0x92   : > { %v4939_v26 = vmul.f32 %v6863_v25, %v488_v2  ;;  %v5085_v2 = vld [vmem:[%s7617_s6 + $0x78] sm:$0xff] }
  0x93   : > { %v6230_v8 = vpack.c.bf16 %v5085_v2, %v5084_v1  ;;  %v5117_v1 = vld [vmem:[%s7617_s6 + $0xa8] sm:$0xff]  ;;  %v5110_v2 = vld [vmem:[%s7615_s4 + $0xa0] sm:$0xff] }
  0x94   : > { %4943 = vrot.lane.b32.xlu1 %v4939_v26, %s6719_s22  ;;  %v1496_v26 = vld [vmem:[%s7621_s10 + $0x8] sm:$0xff] }
  0x95   : > { %v6866_v27 = vpop.permute.xlu0 %593 }
  0x96   : > { %v4940_v28 = vmul.f32 %v6866_v27, %v489_v3  ;;  %v5078_v3 = vld [vmem:[%s7615_s4 + $0x70] sm:$0xff] }
  0x97   : > { %v6222_v9 = vpack.c.bf16 %v5079_v4, %v5078_v3  ;;  %v5111_v4 = vld [vmem:[%s7615_s4 + $0xa8] sm:$0xff] }
  0x98   : > { %4945 = vrot.lane.b32.xlu1 %v4940_v28, %s6719_s22  ;;  %v1587_v28 = vld [vmem:[%s7619_s8] sm:$0xff] }
  0xe5   : > { %v5641_v30 = vpop.f32.mrb[0].mxu0 }
  0xe6   : > { %v583_v31 = vadd.f32 %v5641_v30, %v5042_v29  ;;  %v577_v32 = vpop.f32.mrb[1].mxu0  ;;  %v1588_v30 = vld [vmem:[%s7619_s8 + $0x8] sm:$0xff] }
  0xe7   : > { %v578_v33 = vadd.f32 %v5042_v29, %v577_v32  ;;  %v1498_v32 = vld [vmem:[%s7621_s10 + $0x18] sm:$0xff] }
  0xe8   : > { %v6873_v34 = vmul.f32 %v6866_v27, %v583_v31  ;;  %v1497_v31 = vld [vmem:[%s7621_s10 + $0x10] sm:$0xff] }
  0xe9   : > { %v6876_v35 = vmul.f32 %v6863_v25, %v578_v33  ;;  %v6258_v33 = vpack.c.bf16 %v1588_v30, %v1587_v28  ;;  %v6254_v36 = vpack.c.bf16 %v1498_v32, %v1497_v31  ;;  %v5125_v30 = vld [vmem:[%s7615_s4 + $0xd8] sm:$0xff] }
  0xea   : > { %604 = vst.msk [vmem:[#allocation2 + $0x10] sm:$0xff] %vm598_vm2, %v6873_v34 }
  0xeb   : > { %603 = vst.msk [vmem:[#allocation2 + $0x8] sm:$0xff] %vm598_vm2, %v6876_v35 }
  0xf1   : > { %v964_v7 = vld [vmem:[#allocation2 + $0x10] sm:$0xff] }
  0xf2   : > { %v621_v40 = vld [vmem:[#allocation2 + $0x6] sm:$0xff]  ;;  %v622_v41 = vld [vmem:[#allocation2 + $0xe] sm:$0xff] }
  0xf3   : > { %5650 = vmatprep.mubr.msk.f32.mxu1 %vm598_vm2, %v621_v40  ;;  %5661 = vmatprep.mubr.msk.f32.mxu0 %vm598_vm2, %v621_v40  ;;  %v791_v48 = vld [vmem:[#allocation2 + $0x7] sm:$0xff]  ;;  %v792_v57 = vld [vmem:[#allocation2 + $0xf] sm:$0xff]  ;;  %v5047_v40 = vld [vmem:[%s7618_s7] ss:$0 sm:$0xff] }
  0xf4   : > { %5651 = vmatmul.mubr.msk.f32.vlgmr.msra.gmra.mrb[0].mxu1 %vm598_vm2, %v622_v41  ;;  %5662 = vmatmul.mubr.msk.f32.vlgmr.msra.gmra.mrb[2].mxu0 %vm598_vm2, %v622_v41  ;;  %v963_v62 = vld [vmem:[#allocation2 + $0x8] sm:$0xff]  ;;  %v1136_v19 = vld [vmem:[#allocation2 + $0x11] sm:$0xff] }
  0xf5   : > { %6197 = vmatpush3.bf16.msra.mxu0 %v6194_v22  ;;  %6189 = vmatpush3.bf16.msra.mxu1 %v6186_v24  ;;  %v1135_v12 = vld [vmem:[#allocation2 + $0x9] sm:$0xff]  ;;  %v1308_v23 = vld [vmem:[#allocation2 + $0x12] sm:$0xff]  ;;  %v1495_v24 = vld [vmem:[%s7621_s10] sm:$0xff] }
  0xf6   : > { %5672 = vmatprep.mubr.msk.f32.mxu1 %vm598_vm2, %v791_v48  ;;  %5683 = vmatprep.mubr.msk.f32.mxu0 %vm598_vm2, %v791_v48  ;;  %v1307_v22 = vld [vmem:[#allocation2 + $0xa] sm:$0xff]  ;;  %v6250_v29 = vpack.c.bf16 %v1496_v26, %v1495_v24 }
  0xf7   : > { %6199 = vmatprep.subr.bf16.mxu0 %v6198_v43  ;;  %6191 = vmatprep.subr.bf16.mxu1 %v6190_v44 }
  0xf9   : > { %6201 = vmatpush3.bf16.msra.mxu0 %v6198_v43  ;;  %6193 = vmatpush3.bf16.msra.mxu1 %v6190_v44 }
  0xfa   : > { %6211 = vmatprep.subr.bf16.mxu0 %v6210_v49  ;;  %6203 = vmatprep.subr.bf16.mxu1 %v6202_v50 }
  0xfc   : > { %5673 = vmatmul.mubr.msk.f32.vlgmr.msra.gmra.mrb[0].mxu1 %vm598_vm2, %v792_v57  ;;  %5684 = vmatmul.mubr.msk.f32.vlgmr.msra.gmra.mrb[2].mxu0 %vm598_vm2, %v792_v57 }
  0xfd   : > { %6213 = vmatpush3.bf16.msra.mxu0 %v6210_v49  ;;  %6205 = vmatpush3.bf16.msra.mxu1 %v6202_v50 }
  0xfe   : > { %5694 = vmatprep.mubr.msk.f32.mxu1 %vm598_vm2, %v963_v62  ;;  %5705 = vmatprep.mubr.msk.f32.mxu0 %vm598_vm2, %v963_v62 }
  0xff   : > { %6215 = vmatprep.subr.bf16.mxu0 %v6214_v58  ;;  %6207 = vmatprep.subr.bf16.mxu1 %v6206_v59 }
 0x101   : > { %6217 = vmatpush3.bf16.msra.mxu0 %v6214_v58  ;;  %6209 = vmatpush3.bf16.msra.mxu1 %v6206_v59 }
 0x102   : > { %6227 = vmatprep.subr.bf16.mxu0 %v6226_v63  ;;  %6219 = vmatprep.subr.bf16.mxu1 %v6218_v0 }
 0x104   : > { %5695 = vmatmul.mubr.msk.f32.vlgmr.msra.gmra.mrb[0].mxu1 %vm598_vm2, %v964_v7  ;;  %5706 = vmatmul.mubr.msk.f32.vlgmr.msra.gmra.mrb[2].mxu0 %vm598_vm2, %v964_v7  ;;  %v6266_v7 = vpack.c.bf16 %v5111_v4, %v5110_v2  ;;  %v5159_v4 = vld [vmem:[%s7615_s4 + $0x128] sm:$0xff] }
 0x105   : > { %6229 = vmatpush3.bf16.msra.mxu0 %v6226_v63  ;;  %6221 = vmatpush3.bf16.msra.mxu1 %v6218_v0  ;;  %v5116_v0 = vld [vmem:[%s7617_s6 + $0xa0] sm:$0xff] }
 0x106   : > { %5716 = vmatprep.mubr.msk.f32.mxu1 %vm598_vm2, %v1135_v12  ;;  %5727 = vmatprep.mubr.msk.f32.mxu0 %vm598_vm2, %v1135_v12  ;;  %v6274_v3 = vpack.c.bf16 %v5117_v1, %v5116_v0  ;;  %v5128_v12 = vld [vmem:[%s7617_s6 + $0xc0] sm:$0xff] }
 0x107   : > { %6231 = vmatprep.subr.bf16.mxu0 %v6230_v8  ;;  %6223 = vmatprep.subr.bf16.mxu1 %v6222_v9 }
 0x109   : > { %6233 = vmatpush3.bf16.msra.mxu0 %v6230_v8  ;;  %6225 = vmatpush3.bf16.msra.mxu1 %v6222_v9  ;;  %v6278_v8 = vpack.c.bf16 %v5119_v6, %v5118_v5  ;;  %v5112_v9 = vld [vmem:[%s7615_s4 + $0xb0] sm:$0xff] }
 0x10a   : > { %6243 = vmatprep.subr.bf16.mxu0 %v6242_v13  ;;  %6235 = vmatprep.subr.bf16.mxu1 %v6234_v14  ;;  %v6270_v11 = vpack.c.bf16 %v5113_v10, %v5112_v9  ;;  %v5167_v9 = vld [vmem:[%s7617_s6 + $0x138] sm:$0xff]  ;;  %v5160_v10 = vld [vmem:[%s7615_s4 + $0x130] sm:$0xff] }
 0x10c   : > { %5717 = vmatmul.mubr.msk.f32.vlgmr.msra.gmra.mrb[0].mxu1 %vm598_vm2, %v1136_v19  ;;  %5728 = vmatmul.mubr.msk.f32.vlgmr.msra.gmra.mrb[2].mxu0 %vm598_vm2, %v1136_v19 }
 0x10d   : > { %6245 = vmatpush3.bf16.msra.mxu0 %v6242_v13  ;;  %6237 = vmatpush3.bf16.msra.mxu1 %v6234_v14  ;;  %v5129_v13 = vld [vmem:[%s7617_s6 + $0xc8] sm:$0xff]  ;;  %v5122_v14 = vld [vmem:[%s7615_s4 + $0xc0] sm:$0xff] }
 0x10e   : > { %5738 = vmatprep.mubr.msk.f32.mxu1 %vm598_vm2, %v1307_v22  ;;  %5749 = vmatprep.mubr.msk.f32.mxu0 %vm598_vm2, %v1307_v22  ;;  %v6290_v15 = vpack.c.bf16 %v5129_v13, %v5128_v12  ;;  %v6282_v17 = vpack.c.bf16 %v5123_v16, %v5122_v14 }
 0x10f   : > { %6247 = vmatprep.subr.bf16.mxu0 %v6246_v20  ;;  %6239 = vmatprep.subr.bf16.mxu1 %v6238_v21 }
 0x111   : > { %6249 = vmatpush3.bf16.msra.mxu0 %v6246_v20  ;;  %6241 = vmatpush3.bf16.msra.mxu1 %v6238_v21 }
 0x112   : > { %6251 = vmatprep.subr.bf16.mxu1 %v6250_v29  ;;  %6259 = vmatprep.subr.bf16.mxu0 %v6258_v33 }
 0x114   : > { %5739 = vmatmul.mubr.msk.f32.vlgmr.msra.gmra.mrb[0].mxu1 %vm598_vm2, %v1308_v23  ;;  %5750 = vmatmul.mubr.msk.f32.vlgmr.msra.gmra.mrb[2].mxu0 %vm598_vm2, %v1308_v23 }
 0x115   : > { %6253 = vmatpush3.bf16.msra.mxu1 %v6250_v29  ;;  %6261 = vmatpush3.bf16.msra.mxu0 %v6258_v33  ;;  %v5130_v29 = vld [vmem:[%s7617_s6 + $0xd0] sm:$0xff]  ;;  %v5140_v33 = vld [vmem:[%s7617_s6 + $0xe0] sm:$0xff] }
 0x116   : > { %6255 = vmatprep.subr.bf16.mxu1 %v6254_v36  ;;  %6263 = vmatprep.subr.bf16.mxu0 %v6262_v39 }
 0x119   : > { %6257 = vmatpush3.bf16.msra.mxu1 %v6254_v36  ;;  %6265 = vmatpush3.bf16.msra.mxu0 %v6262_v39  ;;  %v5134_v39 = vld [vmem:[%s7615_s4 + $0xe0] sm:$0xff] }
 0x11a   : > { %6275 = vmatprep.subr.bf16.mxu0 %v6274_v3  ;;  %6267 = vmatprep.subr.bf16.mxu1 %v6266_v7 }
 0x1e7   : > { %v5740_v41 = vpop.f32.mrb[0].mxu1  ;;  %v5751_v42 = vpop.f32.mrb[2].mxu0 }
 0x1e8   : > { %v6556_v43 = vadd.f32 %v5751_v42, %v5047_v40  ;;  %v1386_v44 = vpop.f32.mrb[1].mxu1  ;;  %v1468_v45 = vpop.f32.mrb[3].mxu0  ;;  %v6554_v52 = vadd.f32 %v5740_v41, %v5046_v51  ;;  %v6306_v42 = vpack.c.bf16 %v5141_v38, %v5140_v33 }
 0x1e9   : > { %v6557_v46 = vadd.f32 %v5047_v40, %v1468_v45  ;;  %v6555_v53 = vadd.f32 %v5046_v51, %v1386_v44  ;;  %v5135_v40 = vld [vmem:[%s7615_s4 + $0xe8] sm:$0xff]  ;;  %v5142_v44 = vld [vmem:[%s7617_s6 + $0xf0] sm:$0xff]  ;;  %v5143_v45 = vld [vmem:[%s7617_s6 + $0xf8] sm:$0xff] }
 0x1ea   : > { %v1482_v47 = vsub.f32 0.0, %v6556_v43  ;;  %v6298_v43 = vpack.c.bf16 %v5135_v40, %v5134_v39  ;;  %v6310_v51 = vpack.c.bf16 %v5143_v45, %v5142_v44  ;;  %v5107_v44 = vld [vmem:[%s7616_s5 + $0x1] ss:$0 sm:$0xff] }
 0x1eb   : > { %v1481_v48 = vsub.f32 0.0, %v6557_v46  ;;  %v5136_v46 = vld [vmem:[%s7615_s4 + $0xf0] sm:$0xff] }
 0x1ec   : > { %v1485_v49 = vmul.f32 1.442695, %v1482_v47  ;;  %v5137_v47 = vld [vmem:[%s7615_s4 + $0xf8] sm:$0xff] }
 0x1ed   : > { %v1483_v50 = vmul.f32 1.442695, %v1481_v48  ;;  %v5152_v48 = vld [vmem:[%s7617_s6 + $0x100] sm:$0xff] }
 0x1ee   : > { %6659 = vpow2.f32 %v1485_v49  ;;  %v5153_v49 = vld [vmem:[%s7617_s6 + $0x108] sm:$0xff] }
 0x1ef   : > { %6661 = vpow2.f32 %v1483_v50 }
 0x1f0   : > { %6663 = vtanh.f32 %v6554_v52  ;;  %v6302_v52 = vpack.c.bf16 %v5137_v47, %v5136_v46 }
 0x1f1   : > { %6665 = vtanh.f32 %v6555_v53  ;;  %v5146_v53 = vld [vmem:[%s7615_s4 + $0x100] sm:$0xff] }
 0x1f8   : > { %v6660_v54 = vpop.eup %6659 }
 0x1f9   : > { %v6662_v55 = vpop.eup %6661  ;;  %v1488_v56 = vadd.f32 1.0, %v6660_v54  ;;  %v5147_v54 = vld [vmem:[%s7615_s4 + $0x108] sm:$0xff] }
 0x1fa   : > { %v1487_v57 = vadd.f32 1.0, %v6662_v55  ;;  %v6664_v58 = vpop.eup %6663 }
 0x1fb   : > { %6667 = vrcp.f32 %v1488_v56  ;;  %v6666_v59 = vpop.eup %6665  ;;  %v6322_v56 = vpack.c.bf16 %v5153_v49, %v5152_v48 }
 0x1fc   : > { %6669 = vrcp.f32 %v1487_v57  ;;  %v6314_v57 = vpack.c.bf16 %v5147_v54, %v5146_v53 }
 0x205   : > { %v6668_v60 = vpop.eup %6667 }
 0x206   : > { %v6670_v61 = vpop.eup %6669  ;;  %v1494_v62 = vmul.f32 %v6668_v60, %v6664_v58  ;;  %v5154_v58 = vld [vmem:[%s7617_s6 + $0x110] sm:$0xff] }
 0x207   : > { %v1493_v63 = vmul.f32 %v6670_v61, %v6666_v59  ;;  %v5155_v59 = vld [vmem:[%s7617_s6 + $0x118] sm:$0xff]  ;;  %v5148_v60 = vld [vmem:[%s7615_s4 + $0x110] sm:$0xff] }
 0x208   : > { %v5149_v61 = vld [vmem:[%s7615_s4 + $0x118] sm:$0xff]  ;;  %v6326_v1 = vpack.c.bf16 %v5155_v59, %v5154_v58  ;;  %v5197_v58 = vld [vmem:[%s7617_s6 + $0x148] sm:$0xff]  ;;  %v5190_v59 = vld [vmem:[%s7615_s4 + $0x140] sm:$0xff] }
 0x209   : > { %5760 = vmatprep.mubr.msk.f32.mxu1 %vm598_vm2, %v1493_v63  ;;  %5771 = vmatprep.mubr.msk.f32.mxu0 %vm598_vm2, %v1493_v63  ;;  %v5165_v63 = vld [vmem:[%s7617_s6 + $0x128] sm:$0xff]  ;;  %v6318_v2 = vpack.c.bf16 %v5149_v61, %v5148_v60 }
 0x20a   : > { %5761 = vmatmul.mubr.msk.f32.vlgmr.msra.gmra.mrb[2].mxu1 %vm598_vm2, %v1494_v62  ;;  %5772 = vmatmul.mubr.msk.f32.vlgmr.msra.gmra.mrb[4].mxu0 %vm598_vm2, %v1494_v62  ;;  %v5164_v62 = vld [vmem:[%s7617_s6 + $0x120] sm:$0xff]  ;;  %v5191_v61 = vld [vmem:[%s7615_s4 + $0x148] sm:$0xff] }
 0x20b   : > { %6277 = vmatpush3.bf16.msra.mxu0 %v6274_v3  ;;  %6269 = vmatpush3.bf16.msra.mxu1 %v6266_v7  ;;  %v5158_v3 = vld [vmem:[%s7615_s4 + $0x120] sm:$0xff]  ;;  %v6338_v6 = vpack.c.bf16 %v5165_v63, %v5164_v62  ;;  %v5198_v62 = vld [vmem:[%s7617_s6 + $0x150] sm:$0xff]  ;;  %v5199_v63 = vld [vmem:[%s7617_s6 + $0x158] sm:$0xff] }
 0x20c   : > { %6279 = vmatprep.subr.bf16.mxu0 %v6278_v8  ;;  %6271 = vmatprep.subr.bf16.mxu1 %v6270_v11  ;;  %v6330_v7 = vpack.c.bf16 %v5159_v4, %v5158_v3  ;;  %v5193_v3 = vld [vmem:[%s7615_s4 + $0x158] sm:$0xff] }
 0x20f   : > { %6281 = vmatpush3.bf16.msra.mxu0 %v6278_v8  ;;  %6273 = vmatpush3.bf16.msra.mxu1 %v6270_v11  ;;  %v5166_v8 = vld [vmem:[%s7617_s6 + $0x130] sm:$0xff]  ;;  %v5161_v11 = vld [vmem:[%s7615_s4 + $0x138] sm:$0xff] }
 0x210   : > { %6291 = vmatprep.subr.bf16.mxu0 %v6290_v15  ;;  %6283 = vmatprep.subr.bf16.mxu1 %v6282_v17  ;;  %v6342_v13 = vpack.c.bf16 %v5167_v9, %v5166_v8  ;;  %v6334_v14 = vpack.c.bf16 %v5161_v11, %v5160_v10  ;;  %v5203_v9 = vld [vmem:[%s7615_s4 + $0x168] sm:$0xff]  ;;  %v5183_v11 = vld [vmem:[%s7620_s9 + $0x1] ss:$0 sm:$0xff] }
 0x2dd   : > { %v5773_v19 = vpop.f32.mrb[4].mxu0 }
 0x2de   : > { %v1670_v20 = vadd.f32 %v5773_v19, %v5103_v18  ;;  %v1664_v21 = vpop.f32.mrb[5].mxu0  ;;  %v5178_v19 = vld [vmem:[%s7619_s8 + $0x20] sm:$0xff] }
 0x2df   : > { %v1665_v22 = vadd.f32 %v5103_v18, %v1664_v21  ;;  %v5171_v18 = vld [vmem:[%s7621_s10 + $0x28] sm:$0xff] }
 0x2e0   : > { %v1674_v23 = vadd.f32 %v1670_v20, %v6873_v34  ;;  %v5131_v34 = vld [vmem:[%s7617_s6 + $0xd8] sm:$0xff]  ;;  %v5179_v21 = vld [vmem:[%s7619_s8 + $0x28] sm:$0xff] }
 0x2e1   : > { %v1673_v24 = vadd.f32 %v1665_v22, %v6876_v35  ;;  %v5124_v35 = vld [vmem:[%s7615_s4 + $0xd0] sm:$0xff]  ;;  %v6294_v36 = vpack.c.bf16 %v5131_v34, %v5130_v29 }
 0x2e2   : > { %v7062_v26 = vmul.f32 %v1674_v23, %v6866_v27  ;;  %v6286_v37 = vpack.c.bf16 %v5125_v30, %v5124_v35  ;;  %v5172_v22 = vld [vmem:[%s7621_s10 + $0x30] sm:$0xff]  ;;  %v5173_v23 = vld [vmem:[%s7621_s10 + $0x38] sm:$0xff] }
 0x2e3   : > { %v7065_v28 = vmul.f32 %v1673_v24, %v6863_v25  ;;  %v6354_v24 = vpack.c.bf16 %v5179_v21, %v5178_v19  ;;  %v6350_v29 = vpack.c.bf16 %v5173_v23, %v5172_v22  ;;  %v5180_v34 = vld [vmem:[%s7619_s8 + $0x30] sm:$0xff]  ;;  %v5181_v35 = vld [vmem:[%s7619_s8 + $0x38] sm:$0xff] }
 0x2e4   : > { %1678 = vst.msk [vmem:[#allocation2 + $0x10] sm:$0xff] %vm598_vm2, %v7062_v26  ;;  %v6358_v30 = vpack.c.bf16 %v5181_v35, %v5180_v34  ;;  %v5205_v21 = vld [vmem:[%s7615_s4 + $0x178] sm:$0xff]  ;;  %v5221_v35 = vld [vmem:[%s7617_s6 + $0x188] sm:$0xff] }
 0x2e5   : > { %1677 = vst.msk [vmem:[#allocation2 + $0x8] sm:$0xff] %vm598_vm2, %v7065_v28 }
 0x2eb   : > { %v2042_v0 = vld [vmem:[#allocation2 + $0x10] sm:$0xff] }
 0x2ec   : > { %v1697_v31 = vld [vmem:[#allocation2 + $0x6] sm:$0xff]  ;;  %v1698_v32 = vld [vmem:[#allocation2 + $0xe] sm:$0xff] }
 0x2ed   : > { %5782 = vmatprep.mubr.msk.f32.mxu1 %vm598_vm2, %v1697_v31  ;;  %5793 = vmatprep.mubr.msk.f32.mxu0 %vm598_vm2, %v1697_v31  ;;  %v1869_v41 = vld [vmem:[#allocation2 + $0x7] sm:$0xff]  ;;  %v1870_v50 = vld [vmem:[#allocation2 + $0xf] sm:$0xff]  ;;  %v5109_v31 = vld [vmem:[%s7618_s7 + $0x1] ss:$0 sm:$0xff] }
 0x2ee   : > { %5783 = vmatmul.mubr.msk.f32.vlgmr.msra.gmra.mrb[4].mxu1 %vm598_vm2, %v1698_v32  ;;  %5794 = vmatmul.mubr.msk.f32.vlgmr.msra.gmra.mrb[6].mxu0 %vm598_vm2, %v1698_v32  ;;  %v2041_v55 = vld [vmem:[#allocation2 + $0x8] sm:$0xff]  ;;  %v2214_v12 = vld [vmem:[#allocation2 + $0x11] sm:$0xff] }
 0x2ef   : > { %6293 = vmatpush3.bf16.msra.mxu0 %v6290_v15  ;;  %6285 = vmatpush3.bf16.msra.mxu1 %v6282_v17  ;;  %v2213_v5 = vld [vmem:[#allocation2 + $0x9] sm:$0xff]  ;;  %v2386_v16 = vld [vmem:[#allocation2 + $0x12] sm:$0xff]  ;;  %v5170_v17 = vld [vmem:[%s7621_s10 + $0x20] sm:$0xff] }
 0x2f0   : > { %5804 = vmatprep.mubr.msk.f32.mxu1 %vm598_vm2, %v1869_v41  ;;  %5815 = vmatprep.mubr.msk.f32.mxu0 %vm598_vm2, %v1869_v41  ;;  %v2385_v15 = vld [vmem:[#allocation2 + $0xa] sm:$0xff]  ;;  %v6346_v20 = vpack.c.bf16 %v5171_v18, %v5170_v17 }
 0x2f1   : > { %6295 = vmatprep.subr.bf16.mxu0 %v6294_v36  ;;  %6287 = vmatprep.subr.bf16.mxu1 %v6286_v37 }
 0x2f3   : > { %6297 = vmatpush3.bf16.msra.mxu0 %v6294_v36  ;;  %6289 = vmatpush3.bf16.msra.mxu1 %v6286_v37 }
 0x2f4   : > { %6307 = vmatprep.subr.bf16.mxu0 %v6306_v42  ;;  %6299 = vmatprep.subr.bf16.mxu1 %v6298_v43 }
 0x2f6   : > { %5805 = vmatmul.mubr.msk.f32.vlgmr.msra.gmra.mrb[4].mxu1 %vm598_vm2, %v1870_v50  ;;  %5816 = vmatmul.mubr.msk.f32.vlgmr.msra.gmra.mrb[6].mxu0 %vm598_vm2, %v1870_v50 }
 0x2f7   : > { %6309 = vmatpush3.bf16.msra.mxu0 %v6306_v42  ;;  %6301 = vmatpush3.bf16.msra.mxu1 %v6298_v43 }
 0x2f8   : > { %5826 = vmatprep.mubr.msk.f32.mxu1 %vm598_vm2, %v2041_v55  ;;  %5837 = vmatprep.mubr.msk.f32.mxu0 %vm598_vm2, %v2041_v55 }
 0x2f9   : > { %6311 = vmatprep.subr.bf16.mxu0 %v6310_v51  ;;  %6303 = vmatprep.subr.bf16.mxu1 %v6302_v52 }
 0x2fb   : > { %6313 = vmatpush3.bf16.msra.mxu0 %v6310_v51  ;;  %6305 = vmatpush3.bf16.msra.mxu1 %v6302_v52 }
 0x2fc   : > { %6323 = vmatprep.subr.bf16.mxu0 %v6322_v56  ;;  %6315 = vmatprep.subr.bf16.mxu1 %v6314_v57 }
 0x2fe   : > { %5827 = vmatmul.mubr.msk.f32.vlgmr.msra.gmra.mrb[4].mxu1 %vm598_vm2, %v2042_v0  ;;  %5838 = vmatmul.mubr.msk.f32.vlgmr.msra.gmra.mrb[6].mxu0 %vm598_vm2, %v2042_v0  ;;  %v6362_v0 = vpack.c.bf16 %v5191_v61, %v5190_v59  ;;  %v5239_v61 = vld [vmem:[%s7615_s4 + $0x1c8] sm:$0xff] }
 0x2ff   : > { %6325 = vmatpush3.bf16.msra.mxu0 %v6322_v56  ;;  %6317 = vmatpush3.bf16.msra.mxu1 %v6314_v57  ;;  %v5196_v57 = vld [vmem:[%s7617_s6 + $0x140] sm:$0xff] }
 0x300   : > { %5848 = vmatprep.mubr.msk.f32.mxu1 %vm598_vm2, %v2213_v5  ;;  %5859 = vmatprep.mubr.msk.f32.mxu0 %vm598_vm2, %v2213_v5  ;;  %v6370_v60 = vpack.c.bf16 %v5197_v58, %v5196_v57  ;;  %v5208_v5 = vld [vmem:[%s7617_s6 + $0x160] sm:$0xff] }
 0x301   : > { %6327 = vmatprep.subr.bf16.mxu0 %v6326_v1  ;;  %6319 = vmatprep.subr.bf16.mxu1 %v6318_v2 }
 0x303   : > { %6329 = vmatpush3.bf16.msra.mxu0 %v6326_v1  ;;  %6321 = vmatpush3.bf16.msra.mxu1 %v6318_v2  ;;  %v6374_v1 = vpack.c.bf16 %v5199_v63, %v5198_v62  ;;  %v5192_v2 = vld [vmem:[%s7615_s4 + $0x150] sm:$0xff] }
 0x304   : > { %6339 = vmatprep.subr.bf16.mxu0 %v6338_v6  ;;  %6331 = vmatprep.subr.bf16.mxu1 %v6330_v7  ;;  %v6366_v4 = vpack.c.bf16 %v5193_v3, %v5192_v2  ;;  %v5247_v2 = vld [vmem:[%s7617_s6 + $0x1d8] sm:$0xff]  ;;  %v5240_v3 = vld [vmem:[%s7615_s4 + $0x1d0] sm:$0xff] }
 0x306   : > { %5849 = vmatmul.mubr.msk.f32.vlgmr.msra.gmra.mrb[4].mxu1 %vm598_vm2, %v2214_v12  ;;  %5860 = vmatmul.mubr.msk.f32.vlgmr.msra.gmra.mrb[6].mxu0 %vm598_vm2, %v2214_v12 }
 0x307   : > { %6341 = vmatpush3.bf16.msra.mxu0 %v6338_v6  ;;  %6333 = vmatpush3.bf16.msra.mxu1 %v6330_v7  ;;  %v5209_v6 = vld [vmem:[%s7617_s6 + $0x168] sm:$0xff]  ;;  %v5202_v7 = vld [vmem:[%s7615_s4 + $0x160] sm:$0xff] }
 0x308   : > { %5870 = vmatprep.mubr.msk.f32.mxu1 %vm598_vm2, %v2385_v15  ;;  %5881 = vmatprep.mubr.msk.f32.mxu0 %vm598_vm2, %v2385_v15  ;;  %v6386_v8 = vpack.c.bf16 %v5209_v6, %v5208_v5  ;;  %v6378_v10 = vpack.c.bf16 %v5203_v9, %v5202_v7 }
 0x309   : > { %6343 = vmatprep.subr.bf16.mxu0 %v6342_v13  ;;  %6335 = vmatprep.subr.bf16.mxu1 %v6334_v14 }
 0x30b   : > { %6345 = vmatpush3.bf16.msra.mxu0 %v6342_v13  ;;  %6337 = vmatpush3.bf16.msra.mxu1 %v6334_v14 }
 0x30c   : > { %6347 = vmatprep.subr.bf16.mxu1 %v6346_v20  ;;  %6355 = vmatprep.subr.bf16.mxu0 %v6354_v24 }
 0x30e   : > { %5871 = vmatmul.mubr.msk.f32.vlgmr.msra.gmra.mrb[4].mxu1 %vm598_vm2, %v2386_v16  ;;  %5882 = vmatmul.mubr.msk.f32.vlgmr.msra.gmra.mrb[6].mxu0 %vm598_vm2, %v2386_v16 }
 0x30f   : > { %6349 = vmatpush3.bf16.msra.mxu1 %v6346_v20  ;;  %6357 = vmatpush3.bf16.msra.mxu0 %v6354_v24  ;;  %v5210_v20 = vld [vmem:[%s7617_s6 + $0x170] sm:$0xff]  ;;  %v5220_v24 = vld [vmem:[%s7617_s6 + $0x180] sm:$0xff] }
 0x310   : > { %6351 = vmatprep.subr.bf16.mxu1 %v6350_v29  ;;  %6359 = vmatprep.subr.bf16.mxu0 %v6358_v30 }
 0x313   : > { %6353 = vmatpush3.bf16.msra.mxu1 %v6350_v29  ;;  %6361 = vmatpush3.bf16.msra.mxu0 %v6358_v30  ;;  %v5214_v30 = vld [vmem:[%s7615_s4 + $0x180] sm:$0xff] }
 0x314   : > { %6371 = vmatprep.subr.bf16.mxu0 %v6370_v60  ;;  %6363 = vmatprep.subr.bf16.mxu1 %v6362_v0 }
 0x3e1   : > { %v5872_v32 = vpop.f32.mrb[4].mxu1  ;;  %v5883_v33 = vpop.f32.mrb[6].mxu0 }
 0x3e2   : > { %v6566_v36 = vadd.f32 %v5883_v33, %v5109_v31  ;;  %v2464_v37 = vpop.f32.mrb[5].mxu1  ;;  %v2546_v38 = vpop.f32.mrb[7].mxu0  ;;  %v6564_v45 = vadd.f32 %v5872_v32, %v5107_v44  ;;  %v6402_v33 = vpack.c.bf16 %v5221_v35, %v5220_v24 }
 0x3e3   : > { %v6567_v39 = vadd.f32 %v5109_v31, %v2546_v38  ;;  %v6565_v46 = vadd.f32 %v5107_v44, %v2464_v37  ;;  %v5215_v31 = vld [vmem:[%s7615_s4 + $0x188] sm:$0xff]  ;;  %v5222_v37 = vld [vmem:[%s7617_s6 + $0x190] sm:$0xff]  ;;  %v5223_v38 = vld [vmem:[%s7617_s6 + $0x198] sm:$0xff] }
 0x3e4   : > { %v2560_v40 = vsub.f32 0.0, %v6566_v36  ;;  %v6394_v36 = vpack.c.bf16 %v5215_v31, %v5214_v30  ;;  %v6406_v44 = vpack.c.bf16 %v5223_v38, %v5222_v37  ;;  %v5187_v37 = vld [vmem:[%s7616_s5 + $0x2] ss:$0 sm:$0xff] }
 0x3e5   : > { %v2559_v41 = vsub.f32 0.0, %v6567_v39  ;;  %v5216_v39 = vld [vmem:[%s7615_s4 + $0x190] sm:$0xff] }
 0x3e6   : > { %v2563_v42 = vmul.f32 1.442695, %v2560_v40  ;;  %v5217_v40 = vld [vmem:[%s7615_s4 + $0x198] sm:$0xff] }
 0x3e7   : > { %v2561_v43 = vmul.f32 1.442695, %v2559_v41  ;;  %v5232_v41 = vld [vmem:[%s7617_s6 + $0x1a0] sm:$0xff] }
 0x3e8   : > { %6671 = vpow2.f32 %v2563_v42  ;;  %v5233_v42 = vld [vmem:[%s7617_s6 + $0x1a8] sm:$0xff] }
 0x3e9   : > { %6673 = vpow2.f32 %v2561_v43 }
 0x3ea   : > { %6675 = vtanh.f32 %v6564_v45  ;;  %v6398_v45 = vpack.c.bf16 %v5217_v40, %v5216_v39 }
 0x3eb   : > { %6677 = vtanh.f32 %v6565_v46  ;;  %v5226_v46 = vld [vmem:[%s7615_s4 + $0x1a0] sm:$0xff] }
 0x3f2   : > { %v6672_v47 = vpop.eup %6671 }
 0x3f3   : > { %v6674_v48 = vpop.eup %6673  ;;  %v2566_v49 = vadd.f32 1.0, %v6672_v47  ;;  %v5227_v47 = vld [vmem:[%s7615_s4 + $0x1a8] sm:$0xff] }
 0x3f4   : > { %v2565_v50 = vadd.f32 1.0, %v6674_v48  ;;  %v6676_v51 = vpop.eup %6675 }
 0x3f5   : > { %6679 = vrcp.f32 %v2566_v49  ;;  %v6678_v52 = vpop.eup %6677  ;;  %v6418_v49 = vpack.c.bf16 %v5233_v42, %v5232_v41 }
 0x3f6   : > { %6681 = vrcp.f32 %v2565_v50  ;;  %v6410_v50 = vpack.c.bf16 %v5227_v47, %v5226_v46 }
 0x3ff   : > { %v6680_v53 = vpop.eup %6679 }
 0x400   : > { %v6682_v54 = vpop.eup %6681  ;;  %v2572_v55 = vmul.f32 %v6680_v53, %v6676_v51  ;;  %v5234_v51 = vld [vmem:[%s7617_s6 + $0x1b0] sm:$0xff] }
 0x401   : > { %v2571_v56 = vmul.f32 %v6682_v54, %v6678_v52  ;;  %v5235_v52 = vld [vmem:[%s7617_s6 + $0x1b8] sm:$0xff]  ;;  %v5228_v53 = vld [vmem:[%s7615_s4 + $0x1b0] sm:$0xff] }
 0x402   : > { %v5229_v54 = vld [vmem:[%s7615_s4 + $0x1b8] sm:$0xff]  ;;  %v6422_v58 = vpack.c.bf16 %v5235_v52, %v5234_v51  ;;  %v5277_v51 = vld [vmem:[%s7617_s6 + $0x1e8] sm:$0xff]  ;;  %v5270_v52 = vld [vmem:[%s7615_s4 + $0x1e0] sm:$0xff] }
 0x403   : > { %5892 = vmatprep.mubr.msk.f32.mxu1 %vm598_vm2, %v2571_v56  ;;  %5903 = vmatprep.mubr.msk.f32.mxu0 %vm598_vm2, %v2571_v56  ;;  %v5245_v56 = vld [vmem:[%s7617_s6 + $0x1c8] sm:$0xff]  ;;  %v6414_v59 = vpack.c.bf16 %v5229_v54, %v5228_v53 }
 0x404   : > { %5893 = vmatmul.mubr.msk.f32.vlgmr.msra.gmra.mrb[2].mxu1 %vm598_vm2, %v2572_v55  ;;  %5904 = vmatmul.mubr.msk.f32.vlgmr.msra.gmra.mrb[8].mxu0 %vm598_vm2, %v2572_v55  ;;  %v5244_v55 = vld [vmem:[%s7617_s6 + $0x1c0] sm:$0xff]  ;;  %v5271_v54 = vld [vmem:[%s7615_s4 + $0x1e8] sm:$0xff] }
 0x405   : > { %6373 = vmatpush3.bf16.msra.mxu0 %v6370_v60  ;;  %6365 = vmatpush3.bf16.msra.mxu1 %v6362_v0  ;;  %v5238_v60 = vld [vmem:[%s7615_s4 + $0x1c0] sm:$0xff]  ;;  %v6434_v63 = vpack.c.bf16 %v5245_v56, %v5244_v55  ;;  %v5278_v55 = vld [vmem:[%s7617_s6 + $0x1f0] sm:$0xff]  ;;  %v5279_v56 = vld [vmem:[%s7617_s6 + $0x1f8] sm:$0xff] }
 0x406   : > { %6375 = vmatprep.subr.bf16.mxu0 %v6374_v1  ;;  %6367 = vmatprep.subr.bf16.mxu1 %v6366_v4  ;;  %v6426_v0 = vpack.c.bf16 %v5239_v61, %v5238_v60  ;;  %v5273_v60 = vld [vmem:[%s7615_s4 + $0x1f8] sm:$0xff] }
 0x409   : > { %6377 = vmatpush3.bf16.msra.mxu0 %v6374_v1  ;;  %6369 = vmatpush3.bf16.msra.mxu1 %v6366_v4  ;;  %v5246_v1 = vld [vmem:[%s7617_s6 + $0x1d0] sm:$0xff]  ;;  %v5241_v4 = vld [vmem:[%s7615_s4 + $0x1d8] sm:$0xff] }
 0x40a   : > { %6387 = vmatprep.subr.bf16.mxu0 %v6386_v8  ;;  %6379 = vmatprep.subr.bf16.mxu1 %v6378_v10  ;;  %v6438_v6 = vpack.c.bf16 %v5247_v2, %v5246_v1  ;;  %v6430_v7 = vpack.c.bf16 %v5241_v4, %v5240_v3  ;;  %v5283_v2 = vld [vmem:[%s7615_s4 + $0x208] sm:$0xff]  ;;  %v5263_v4 = vld [vmem:[%s7620_s9 + $0x2] ss:$0 sm:$0xff] }
 0x4d7   : > { %v5905_v12 = vpop.f32.mrb[8].mxu0 }
 0x4d8   : > { %v2756_v13 = vadd.f32 %v5905_v12, %v5183_v11  ;;  %v2750_v14 = vpop.f32.mrb[9].mxu0  ;;  %v5258_v12 = vld [vmem:[%s7619_s8 + $0x40] sm:$0xff] }
 0x4d9   : > { %v2751_v15 = vadd.f32 %v5183_v11, %v2750_v14  ;;  %v5251_v11 = vld [vmem:[%s7621_s10 + $0x48] sm:$0xff] }
 0x4da   : > { %v2760_v16 = vadd.f32 %v2756_v13, %v7062_v26  ;;  %v5211_v26 = vld [vmem:[%s7617_s6 + $0x178] sm:$0xff]  ;;  %v5259_v14 = vld [vmem:[%s7619_s8 + $0x48] sm:$0xff] }
 0x4db   : > { %v2759_v17 = vadd.f32 %v2751_v15, %v7065_v28  ;;  %v5204_v28 = vld [vmem:[%s7615_s4 + $0x170] sm:$0xff]  ;;  %v6390_v29 = vpack.c.bf16 %v5211_v26, %v5210_v20 }
 0x4dc   : > { %v7251_v18 = vmul.f32 %v2760_v16, %v6866_v27  ;;  %v6382_v34 = vpack.c.bf16 %v5205_v21, %v5204_v28  ;;  %v5252_v15 = vld [vmem:[%s7621_s10 + $0x50] sm:$0xff]  ;;  %v5253_v16 = vld [vmem:[%s7621_s10 + $0x58] sm:$0xff] }
 0x4dd   : > { %v7254_v19 = vmul.f32 %v2759_v17, %v6863_v25  ;;  %v6450_v17 = vpack.c.bf16 %v5259_v14, %v5258_v12  ;;  %v6446_v20 = vpack.c.bf16 %v5253_v16, %v5252_v15  ;;  %v5260_v26 = vld [vmem:[%s7619_s8 + $0x50] sm:$0xff]  ;;  %v5261_v28 = vld [vmem:[%s7619_s8 + $0x58] sm:$0xff] }
 0x4de   : > { %2764 = vst.msk [vmem:[#allocation2 + $0x10] sm:$0xff] %vm598_vm2, %v7251_v18  ;;  %v6454_v21 = vpack.c.bf16 %v5261_v28, %v5260_v26  ;;  %v5291_v14 = vld [vmem:[%s7617_s6 + $0x218] sm:$0xff]  ;;  %v5301_v28 = vld [vmem:[%s7617_s6 + $0x228] sm:$0xff] }
 0x4df   : > { %2763 = vst.msk [vmem:[#allocation2 + $0x8] sm:$0xff] %vm598_vm2, %v7254_v19 }
 0x4e5   : > { %v3128_v57 = vld [vmem:[#allocation2 + $0x10] sm:$0xff] }
 0x4e6   : > { %v2783_v22 = vld [vmem:[#allocation2 + $0x6] sm:$0xff]  ;;  %v2784_v23 = vld [vmem:[#allocation2 + $0xe] sm:$0xff] }
 0x4e7   : > { %5914 = vmatprep.mubr.msk.f32.mxu1 %vm598_vm2, %v2783_v22  ;;  %5925 = vmatprep.mubr.msk.f32.mxu0 %vm598_vm2, %v2783_v22  ;;  %v2955_v32 = vld [vmem:[#allocation2 + $0x7] sm:$0xff]  ;;  %v2956_v43 = vld [vmem:[#allocation2 + $0xf] sm:$0xff]  ;;  %v5189_v22 = vld [vmem:[%s7618_s7 + $0x2] ss:$0 sm:$0xff] }
 0x4e8   : > { %5915 = vmatmul.mubr.msk.f32.vlgmr.msra.gmra.mrb[6].mxu1 %vm598_vm2, %v2784_v23  ;;  %5926 = vmatmul.mubr.msk.f32.vlgmr.msra.gmra.mrb[10].mxu0 %vm598_vm2, %v2784_v23  ;;  %v3127_v48 = vld [vmem:[#allocation2 + $0x8] sm:$0xff]  ;;  %v3300_v5 = vld [vmem:[#allocation2 + $0x11] sm:$0xff] }
 0x4e9   : > { %6389 = vmatpush3.bf16.msra.mxu0 %v6386_v8  ;;  %6381 = vmatpush3.bf16.msra.mxu1 %v6378_v10  ;;  %v3299_v62 = vld [vmem:[#allocation2 + $0x9] sm:$0xff]  ;;  %v3472_v9 = vld [vmem:[#allocation2 + $0x12] sm:$0xff]  ;;  %v5250_v10 = vld [vmem:[%s7621_s10 + $0x40] sm:$0xff] }
 0x4ea   : > { %5936 = vmatprep.mubr.msk.f32.mxu1 %vm598_vm2, %v2955_v32  ;;  %5947 = vmatprep.mubr.msk.f32.mxu0 %vm598_vm2, %v2955_v32  ;;  %v3471_v8 = vld [vmem:[#allocation2 + $0xa] sm:$0xff]  ;;  %v6442_v13 = vpack.c.bf16 %v5251_v11, %v5250_v10 }
 0x4eb   : > { %6391 = vmatprep.subr.bf16.mxu0 %v6390_v29  ;;  %6383 = vmatprep.subr.bf16.mxu1 %v6382_v34 }
 0x4ed   : > { %6393 = vmatpush3.bf16.msra.mxu0 %v6390_v29  ;;  %6385 = vmatpush3.bf16.msra.mxu1 %v6382_v34 }
 0x4ee   : > { %6403 = vmatprep.subr.bf16.mxu0 %v6402_v33  ;;  %6395 = vmatprep.subr.bf16.mxu1 %v6394_v36 }
 0x4f0   : > { %5937 = vmatmul.mubr.msk.f32.vlgmr.msra.gmra.mrb[6].mxu1 %vm598_vm2, %v2956_v43  ;;  %5948 = vmatmul.mubr.msk.f32.vlgmr.msra.gmra.mrb[10].mxu0 %vm598_vm2, %v2956_v43 }
 0x4f1   : > { %6405 = vmatpush3.bf16.msra.mxu0 %v6402_v33  ;;  %6397 = vmatpush3.bf16.msra.mxu1 %v6394_v36 }
 0x4f2   : > { %5958 = vmatprep.mubr.msk.f32.mxu1 %vm598_vm2, %v3127_v48  ;;  %5969 = vmatprep.mubr.msk.f32.mxu0 %vm598_vm2, %v3127_v48 }
 0x4f3   : > { %6407 = vmatprep.subr.bf16.mxu0 %v6406_v44  ;;  %6399 = vmatprep.subr.bf16.mxu1 %v6398_v45 }
 0x4f5   : > { %6409 = vmatpush3.bf16.msra.mxu0 %v6406_v44  ;;  %6401 = vmatpush3.bf16.msra.mxu1 %v6398_v45 }
 0x4f6   : > { %6419 = vmatprep.subr.bf16.mxu0 %v6418_v49  ;;  %6411 = vmatprep.subr.bf16.mxu1 %v6410_v50 }
 0x4f8   : > { %5959 = vmatmul.mubr.msk.f32.vlgmr.msra.gmra.mrb[6].mxu1 %vm598_vm2, %v3128_v57  ;;  %5970 = vmatmul.mubr.msk.f32.vlgmr.msra.gmra.mrb[10].mxu0 %vm598_vm2, %v3128_v57  ;;  %v6458_v57 = vpack.c.bf16 %v5271_v54, %v5270_v52  ;;  %v5319_v54 = vld [vmem:[%s7615_s4 + $0x268] sm:$0xff] }
 0x4f9   : > { %6421 = vmatpush3.bf16.msra.mxu0 %v6418_v49  ;;  %6413 = vmatpush3.bf16.msra.mxu1 %v6410_v50  ;;  %v5276_v50 = vld [vmem:[%s7617_s6 + $0x1e0] sm:$0xff] }
 0x4fa   : > { %5980 = vmatprep.mubr.msk.f32.mxu1 %vm598_vm2, %v3299_v62  ;;  %5991 = vmatprep.mubr.msk.f32.mxu0 %vm598_vm2, %v3299_v62  ;;  %v6466_v53 = vpack.c.bf16 %v5277_v51, %v5276_v50  ;;  %v5288_v62 = vld [vmem:[%s7617_s6 + $0x200] sm:$0xff] }
 0x4fb   : > { %6423 = vmatprep.subr.bf16.mxu0 %v6422_v58  ;;  %6415 = vmatprep.subr.bf16.mxu1 %v6414_v59 }
 0x4fd   : > { %6425 = vmatpush3.bf16.msra.mxu0 %v6422_v58  ;;  %6417 = vmatpush3.bf16.msra.mxu1 %v6414_v59  ;;  %v6470_v58 = vpack.c.bf16 %v5279_v56, %v5278_v55  ;;  %v5272_v59 = vld [vmem:[%s7615_s4 + $0x1f0] sm:$0xff] }
 0x4fe   : > { %6435 = vmatprep.subr.bf16.mxu0 %v6434_v63  ;;  %6427 = vmatprep.subr.bf16.mxu1 %v6426_v0  ;;  %v6462_v61 = vpack.c.bf16 %v5273_v60, %v5272_v59  ;;  %v5327_v59 = vld [vmem:[%s7617_s6 + $0x278] sm:$0xff]  ;;  %v5320_v60 = vld [vmem:[%s7615_s4 + $0x270] sm:$0xff] }
 0x500   : > { %5981 = vmatmul.mubr.msk.f32.vlgmr.msra.gmra.mrb[6].mxu1 %vm598_vm2, %v3300_v5  ;;  %5992 = vmatmul.mubr.msk.f32.vlgmr.msra.gmra.mrb[10].mxu0 %vm598_vm2, %v3300_v5 }
 0x501   : > { %6437 = vmatpush3.bf16.msra.mxu0 %v6434_v63  ;;  %6429 = vmatpush3.bf16.msra.mxu1 %v6426_v0  ;;  %v5289_v63 = vld [vmem:[%s7617_s6 + $0x208] sm:$0xff]  ;;  %v5282_v0 = vld [vmem:[%s7615_s4 + $0x200] sm:$0xff] }
 0x502   : > { %6002 = vmatprep.mubr.msk.f32.mxu1 %vm598_vm2, %v3471_v8  ;;  %6013 = vmatprep.mubr.msk.f32.mxu0 %vm598_vm2, %v3471_v8  ;;  %v6482_v1 = vpack.c.bf16 %v5289_v63, %v5288_v62  ;;  %v6474_v3 = vpack.c.bf16 %v5283_v2, %v5282_v0 }
 0x503   : > { %6439 = vmatprep.subr.bf16.mxu0 %v6438_v6  ;;  %6431 = vmatprep.subr.bf16.mxu1 %v6430_v7 }
 0x505   : > { %6441 = vmatpush3.bf16.msra.mxu0 %v6438_v6  ;;  %6433 = vmatpush3.bf16.msra.mxu1 %v6430_v7 }
 0x506   : > { %6443 = vmatprep.subr.bf16.mxu1 %v6442_v13  ;;  %6451 = vmatprep.subr.bf16.mxu0 %v6450_v17 }
 0x508   : > { %6003 = vmatmul.mubr.msk.f32.vlgmr.msra.gmra.mrb[6].mxu1 %vm598_vm2, %v3472_v9  ;;  %6014 = vmatmul.mubr.msk.f32.vlgmr.msra.gmra.mrb[10].mxu0 %vm598_vm2, %v3472_v9 }
 0x509   : > { %6445 = vmatpush3.bf16.msra.mxu1 %v6442_v13  ;;  %6453 = vmatpush3.bf16.msra.mxu0 %v6450_v17  ;;  %v5290_v13 = vld [vmem:[%s7617_s6 + $0x210] sm:$0xff]  ;;  %v5300_v17 = vld [vmem:[%s7617_s6 + $0x220] sm:$0xff] }
 0x50a   : > { %6447 = vmatprep.subr.bf16.mxu1 %v6446_v20  ;;  %6455 = vmatprep.subr.bf16.mxu0 %v6454_v21 }
 0x50d   : > { %6449 = vmatpush3.bf16.msra.mxu1 %v6446_v20  ;;  %6457 = vmatpush3.bf16.msra.mxu0 %v6454_v21  ;;  %v6486_v20 = vpack.c.bf16 %v5291_v14, %v5290_v13  ;;  %v5294_v21 = vld [vmem:[%s7615_s4 + $0x220] sm:$0xff] }
 0x50e   : > { %6467 = vmatprep.subr.bf16.mxu0 %v6466_v53  ;;  %6459 = vmatprep.subr.bf16.mxu1 %v6458_v57 }
 0x5db   : > { %v6004_v23 = vpop.f32.mrb[6].mxu1  ;;  %v6015_v24 = vpop.f32.mrb[10].mxu0 }
 0x5dc   : > { %v6570_v29 = vadd.f32 %v6015_v24, %v5189_v22  ;;  %v3550_v34 = vpop.f32.mrb[7].mxu1  ;;  %v3632_v35 = vpop.f32.mrb[11].mxu0  ;;  %v6568_v38 = vadd.f32 %v6004_v23, %v5187_v37  ;;  %v6498_v24 = vpack.c.bf16 %v5301_v28, %v5300_v17 }
 0x5dd   : > { %v6571_v30 = vadd.f32 %v5189_v22, %v3632_v35  ;;  %v6569_v39 = vadd.f32 %v5187_v37, %v3550_v34  ;;  %v5295_v22 = vld [vmem:[%s7615_s4 + $0x228] sm:$0xff]  ;;  %v5302_v34 = vld [vmem:[%s7617_s6 + $0x230] sm:$0xff]  ;;  %v5303_v35 = vld [vmem:[%s7617_s6 + $0x238] sm:$0xff] }
 0x5de   : > { %v3646_v31 = vsub.f32 0.0, %v6570_v29  ;;  %v6490_v29 = vpack.c.bf16 %v5295_v22, %v5294_v21  ;;  %v6502_v37 = vpack.c.bf16 %v5303_v35, %v5302_v34 }
 0x5df   : > { %v3645_v32 = vsub.f32 0.0, %v6571_v30  ;;  %v5296_v30 = vld [vmem:[%s7615_s4 + $0x230] sm:$0xff] }
 0x5e0   : > { %v3649_v33 = vmul.f32 1.442695, %v3646_v31  ;;  %v5297_v31 = vld [vmem:[%s7615_s4 + $0x238] sm:$0xff] }
 0x5e1   : > { %v3647_v36 = vmul.f32 1.442695, %v3645_v32  ;;  %v5312_v32 = vld [vmem:[%s7617_s6 + $0x240] sm:$0xff] }
 0x5e2   : > { %6683 = vpow2.f32 %v3649_v33  ;;  %v5313_v33 = vld [vmem:[%s7617_s6 + $0x248] sm:$0xff] }
 0x5e3   : > { %6685 = vpow2.f32 %v3647_v36 }
 0x5e4   : > { %6687 = vtanh.f32 %v6568_v38  ;;  %v6494_v38 = vpack.c.bf16 %v5297_v31, %v5296_v30 }
 0x5e5   : > { %6689 = vtanh.f32 %v6569_v39  ;;  %v5306_v39 = vld [vmem:[%s7615_s4 + $0x240] sm:$0xff] }
 0x5ec   : > { %v6684_v40 = vpop.eup %6683 }
 0x5ed   : > { %v6686_v41 = vpop.eup %6685  ;;  %v3652_v42 = vadd.f32 1.0, %v6684_v40  ;;  %v5307_v40 = vld [vmem:[%s7615_s4 + $0x248] sm:$0xff] }
 0x5ee   : > { %v3651_v43 = vadd.f32 1.0, %v6686_v41  ;;  %v6688_v44 = vpop.eup %6687 }
 0x5ef   : > { %6691 = vrcp.f32 %v3652_v42  ;;  %v6690_v45 = vpop.eup %6689  ;;  %v6514_v42 = vpack.c.bf16 %v5313_v33, %v5312_v32  ;;  %v4845_v33 = vld [vmem:[%s7623_s12] sm:$0xff] }
 0x5f0   : > { %6693 = vrcp.f32 %v3651_v43  ;;  %v6506_v43 = vpack.c.bf16 %v5307_v40, %v5306_v39  ;;  %v4848_v39 = vld [vmem:[%s7623_s12 + $0x18] sm:$0xff] }
 0x5f9   : > { %v6692_v46 = vpop.eup %6691 }
 0x5fa   : > { %v6694_v47 = vpop.eup %6693  ;;  %v3658_v48 = vmul.f32 %v6692_v46, %v6688_v44  ;;  %v5314_v44 = vld [vmem:[%s7617_s6 + $0x250] sm:$0xff] }
 0x5fb   : > { %v3657_v49 = vmul.f32 %v6694_v47, %v6690_v45  ;;  %v5315_v45 = vld [vmem:[%s7617_s6 + $0x258] sm:$0xff]  ;;  %v5308_v46 = vld [vmem:[%s7615_s4 + $0x250] sm:$0xff] }
 0x5fc   : > { %v5309_v47 = vld [vmem:[%s7615_s4 + $0x258] sm:$0xff]  ;;  %v6518_v51 = vpack.c.bf16 %v5315_v45, %v5314_v44  ;;  %v5257_v44 = vld [vmem:[%s7622_s11 + $0x2] ss:$0 sm:$0xff] }
 0x5fd   : > { %6024 = vmatprep.mubr.msk.f32.mxu1 %vm598_vm2, %v3657_v49  ;;  %6035 = vmatprep.mubr.msk.f32.mxu0 %vm598_vm2, %v3657_v49  ;;  %v5325_v49 = vld [vmem:[%s7617_s6 + $0x268] sm:$0xff]  ;;  %v6510_v52 = vpack.c.bf16 %v5309_v47, %v5308_v46  ;;  %v5337_v47 = vld [vmem:[%s7622_s11 + $0x3] ss:$0 sm:$0xff] }
 0x5fe   : > { %6025 = vmatmul.mubr.msk.f32.vlgmr.msra.gmra.mrb[2].mxu1 %vm598_vm2, %v3658_v48  ;;  %6036 = vmatmul.mubr.msk.f32.vlgmr.msra.gmra.mrb[12].mxu0 %vm598_vm2, %v3658_v48  ;;  %v5324_v48 = vld [vmem:[%s7617_s6 + $0x260] sm:$0xff] }
 0x5ff   : > { %6469 = vmatpush3.bf16.msra.mxu0 %v6466_v53  ;;  %6461 = vmatpush3.bf16.msra.mxu1 %v6458_v57  ;;  %v5318_v53 = vld [vmem:[%s7615_s4 + $0x260] sm:$0xff]  ;;  %v6530_v56 = vpack.c.bf16 %v5325_v49, %v5324_v48 }
 0x600   : > { %6471 = vmatprep.subr.bf16.mxu0 %v6470_v58  ;;  %6463 = vmatprep.subr.bf16.mxu1 %v6462_v61  ;;  %v6522_v57 = vpack.c.bf16 %v5319_v54, %v5318_v53 }
 0x603   : > { %6473 = vmatpush3.bf16.msra.mxu0 %v6470_v58  ;;  %6465 = vmatpush3.bf16.msra.mxu1 %v6462_v61  ;;  %v5326_v58 = vld [vmem:[%s7617_s6 + $0x270] sm:$0xff]  ;;  %v5321_v61 = vld [vmem:[%s7615_s4 + $0x278] sm:$0xff] }
 0x604   : > { %6483 = vmatprep.subr.bf16.mxu0 %v6482_v1  ;;  %6475 = vmatprep.subr.bf16.mxu1 %v6474_v3  ;;  %v6534_v63 = vpack.c.bf16 %v5327_v59, %v5326_v58  ;;  %v6526_v0 = vpack.c.bf16 %v5321_v61, %v5320_v60 }
 0x6d1   : > { %v6037_v5 = vpop.f32.mrb[12].mxu0 }
 0x6d2   : > { %v3842_v6 = vadd.f32 %v6037_v5, %v5263_v4  ;;  %v3836_v7 = vpop.f32.mrb[13].mxu0  ;;  %v5332_v5 = vld [vmem:[%s7621_s10 + $0x70] sm:$0xff] }
 0x6d3   : > { %v3837_v8 = vadd.f32 %v5263_v4, %v3836_v7  ;;  %v5331_v4 = vld [vmem:[%s7621_s10 + $0x68] sm:$0xff]  ;;  %v5333_v7 = vld [vmem:[%s7621_s10 + $0x78] sm:$0xff] }
 0x6d4   : > { %v3846_v9 = vadd.f32 %v3842_v6, %v7251_v18  ;;  %v5284_v18 = vld [vmem:[%s7615_s4 + $0x210] sm:$0xff] }
 0x6d5   : > { %v3845_v10 = vadd.f32 %v3837_v8, %v7254_v19  ;;  %v5285_v19 = vld [vmem:[%s7615_s4 + $0x218] sm:$0xff]  ;;  %v6542_v8 = vpack.c.bf16 %v5333_v7, %v5332_v5 }
 0x6d6   : > { %v3848_v11 = vmul.f32 %v3846_v9, %v6866_v27  ;;  %v6478_v26 = vpack.c.bf16 %v5285_v19, %v5284_v18  ;;  %v5269_v9 = vld [vmem:[%s7618_s7 + $0x3] ss:$0 sm:$0xff] }
 0x6d7   : > { %v3847_v12 = vmul.f32 %v3845_v10, %v6863_v25 }
 0x6d8   : > { %3850 = vst.msk [vmem:[#allocation2 + $0x10] sm:$0xff] %vm598_vm2, %v3848_v11 }
 0x6d9   : > { %3849 = vst.msk [vmem:[#allocation2 + $0x8] sm:$0xff] %vm598_vm2, %v3847_v12 }
 0x6df   : > { %v4214_v50 = vld [vmem:[#allocation2 + $0x10] sm:$0xff] }
 0x6e0   : > { %v3869_v15 = vld [vmem:[#allocation2 + $0x6] sm:$0xff]  ;;  %v3870_v16 = vld [vmem:[#allocation2 + $0xe] sm:$0xff] }
 0x6e1   : > { %6046 = vmatprep.mubr.msk.f32.mxu1 %vm598_vm2, %v3869_v15  ;;  %6057 = vmatprep.mubr.msk.f32.mxu0 %vm598_vm2, %v3869_v15  ;;  %v4041_v23 = vld [vmem:[#allocation2 + $0x7] sm:$0xff]  ;;  %v4042_v36 = vld [vmem:[#allocation2 + $0xf] sm:$0xff] }
 0x6e2   : > { %6047 = vmatmul.mubr.msk.f32.vlgmr.msra.gmra.mrb[8].mxu1 %vm598_vm2, %v3870_v16  ;;  %6058 = vmatmul.mubr.msk.f32.vlgmr.msra.gmra.mrb[14].mxu0 %vm598_vm2, %v3870_v16  ;;  %v4213_v41 = vld [vmem:[#allocation2 + $0x8] sm:$0xff]  ;;  %v4386_v62 = vld [vmem:[#allocation2 + $0x11] sm:$0xff] }
 0x6e3   : > { %6485 = vmatpush3.bf16.msra.mxu0 %v6482_v1  ;;  %6477 = vmatpush3.bf16.msra.mxu1 %v6474_v3  ;;  %v4385_v55 = vld [vmem:[#allocation2 + $0x9] sm:$0xff]  ;;  %v4558_v2 = vld [vmem:[#allocation2 + $0x12] sm:$0xff]  ;;  %v5330_v3 = vld [vmem:[%s7621_s10 + $0x60] sm:$0xff] }
 0x6e4   : > { %6068 = vmatprep.mubr.msk.f32.mxu1 %vm598_vm2, %v4041_v23  ;;  %6079 = vmatprep.mubr.msk.f32.mxu0 %vm598_vm2, %v4041_v23  ;;  %v4557_v1 = vld [vmem:[#allocation2 + $0xa] sm:$0xff]  ;;  %v6538_v6 = vpack.c.bf16 %v5331_v4, %v5330_v3 }
 0x6e5   : > { %6487 = vmatprep.subr.bf16.mxu0 %v6486_v20  ;;  %6479 = vmatprep.subr.bf16.mxu1 %v6478_v26  ;;  %v6707_v3 = vld [vmem:[%s6813_s20 + $0x8] sm:$0xff] }
 0x6e7   : > { %6489 = vmatpush3.bf16.msra.mxu0 %v6486_v20  ;;  %6481 = vmatpush3.bf16.msra.mxu1 %v6478_v26  ;;  %v5267_v20 = vld [vmem:[%s7616_s5 + $0x3] ss:$0 sm:$0xff] }
 0x6e8   : > { %6499 = vmatprep.subr.bf16.mxu0 %v6498_v24  ;;  %6491 = vmatprep.subr.bf16.mxu1 %v6490_v29 }
 0x6ea   : > { %6069 = vmatmul.mubr.msk.f32.vlgmr.msra.gmra.mrb[8].mxu1 %vm598_vm2, %v4042_v36  ;;  %6080 = vmatmul.mubr.msk.f32.vlgmr.msra.gmra.mrb[14].mxu0 %vm598_vm2, %v4042_v36  ;;  %v4846_v36 = vld [vmem:[%s7623_s12 + $0x8] sm:$0xff] }
 0x6eb   : > { %6501 = vmatpush3.bf16.msra.mxu0 %v6498_v24  ;;  %6493 = vmatpush3.bf16.msra.mxu1 %v6490_v29 }
 0x6ec   : > { %6090 = vmatprep.mubr.msk.f32.mxu1 %vm598_vm2, %v4213_v41  ;;  %6101 = vmatprep.mubr.msk.f32.mxu0 %vm598_vm2, %v4213_v41  ;;  %v5100_v41 = vld [vmem:[%s7622_s11] ss:$0 sm:$0xff] }
 0x6ed   : > { %6503 = vmatprep.subr.bf16.mxu0 %v6502_v37  ;;  %6495 = vmatprep.subr.bf16.mxu1 %v6494_v38 }
 0x6ef   : > { %6505 = vmatpush3.bf16.msra.mxu0 %v6502_v37  ;;  %6497 = vmatpush3.bf16.msra.mxu1 %v6494_v38  ;;  %v6546_v37 = vpack.c.bf16 %v4846_v36, %v4845_v33  ;;  %v4847_v38 = vld [vmem:[%s7623_s12 + $0x10] sm:$0xff] }
 0x6f0   : > { %6515 = vmatprep.subr.bf16.mxu0 %v6514_v42  ;;  %6507 = vmatprep.subr.bf16.mxu1 %v6506_v43  ;;  %v6550_v40 = vpack.c.bf16 %v4848_v39, %v4847_v38 }
 0x6f2   : > { %6091 = vmatmul.mubr.msk.f32.vlgmr.msra.gmra.mrb[8].mxu1 %vm598_vm2, %v4214_v50  ;;  %6102 = vmatmul.mubr.msk.f32.vlgmr.msra.gmra.mrb[14].mxu0 %vm598_vm2, %v4214_v50 }
 0x6f3   : > { %6517 = vmatpush3.bf16.msra.mxu0 %v6514_v42  ;;  %6509 = vmatpush3.bf16.msra.mxu1 %v6506_v43  ;;  %v5177_v42 = vld [vmem:[%s7622_s11 + $0x1] ss:$0 sm:$0xff] }
 0x6f4   : > { %6112 = vmatprep.mubr.msk.f32.mxu1 %vm598_vm2, %v4385_v55  ;;  %6123 = vmatprep.mubr.msk.f32.mxu0 %vm598_vm2, %v4385_v55  ;;  %v6561_v43 = vadd.f32 %v5177_v42, %v5100_v41  ;;  %v4944_v55 = vpop.permute.xlu1 %4943 }
 0x6f5   : > { %6519 = vmatprep.subr.bf16.mxu0 %v6518_v51  ;;  %6511 = vmatprep.subr.bf16.mxu1 %v6510_v52 }
 0x6f6   : > { %v6562_v45 = vadd.f32 %v6561_v43, %v5257_v44 }
 0x6f7   : > { %6521 = vmatpush3.bf16.msra.mxu0 %v6518_v51  ;;  %6513 = vmatpush3.bf16.msra.mxu1 %v6510_v52 }
 0x6f8   : > { %6531 = vmatprep.subr.bf16.mxu0 %v6530_v56  ;;  %6523 = vmatprep.subr.bf16.mxu1 %v6522_v57 }
 0x6fa   : > { %6113 = vmatmul.mubr.msk.f32.vlgmr.msra.gmra.mrb[8].mxu1 %vm598_vm2, %v4386_v62  ;;  %6124 = vmatmul.mubr.msk.f32.vlgmr.msra.gmra.mrb[14].mxu0 %vm598_vm2, %v4386_v62  ;;  %v4946_v62 = vpop.permute.xlu1 %4945 }
 0x6fb   : > { %6533 = vmatpush3.bf16.msra.mxu0 %v6530_v56  ;;  %6525 = vmatpush3.bf16.msra.mxu1 %v6522_v57  ;;  %v5338_v56 = vld [vmem:[%s7624_s13] ss:$0 sm:$0xff] }
 0x6fc   : > { %6134 = vmatprep.mubr.msk.f32.mxu1 %vm598_vm2, %v4557_v1  ;;  %6145 = vmatprep.mubr.msk.f32.mxu0 %vm598_vm2, %v4557_v1 }
 0x6fd   : > { %6535 = vmatprep.subr.bf16.mxu0 %v6534_v63  ;;  %6527 = vmatprep.subr.bf16.mxu1 %v6526_v0 }
 0x6ff   : > { %6537 = vmatpush3.bf16.msra.mxu0 %v6534_v63  ;;  %6529 = vmatpush3.bf16.msra.mxu1 %v6526_v0 }
 0x700   : > { %6539 = vmatprep.subr.bf16.mxu1 %v6538_v6  ;;  %6547 = vmatprep.subr.bf16.mxu0 %v6546_v37 }
 0x702   : > { %6135 = vmatmul.mubr.msk.f32.vlgmr.msra.gmra.mrb[8].mxu1 %vm598_vm2, %v4558_v2  ;;  %6146 = vmatmul.mubr.msk.f32.vlgmr.msra.gmra.mrb[14].mxu0 %vm598_vm2, %v4558_v2 }
 0x703   : > { %6541 = vmatpush3.bf16.msra.mxu1 %v6538_v6  ;;  %6549 = vmatpush3.bf16.msra.mxu0 %v6546_v37 }
 0x704   : > { %6543 = vmatprep.subr.bf16.mxu1 %v6542_v8  ;;  %6551 = vmatprep.subr.bf16.mxu0 %v6550_v40 }
 0x707   : > { %6545 = vmatpush3.bf16.msra.mxu1 %v6542_v8  ;;  %6553 = vmatpush3.bf16.msra.mxu0 %v6550_v40 }
 0x7d5   : > { %v6136_v10 = vpop.f32.mrb[8].mxu1  ;;  %v6147_v11 = vpop.f32.mrb[14].mxu0 }
 0x7d6   : > { %v6574_v12 = vadd.f32 %v6147_v11, %v5269_v9  ;;  %v4636_v13 = vpop.f32.mrb[9].mxu1  ;;  %v4718_v14 = vpop.f32.mrb[15].mxu0  ;;  %v6572_v26 = vadd.f32 %v6136_v10, %v5267_v20 }
 0x7d7   : > { %v6575_v18 = vadd.f32 %v5269_v9, %v4718_v14  ;;  %v6573_v28 = vadd.f32 %v5267_v20, %v4636_v13 }
 0x7d8   : > { %v4732_v19 = vsub.f32 0.0, %v6574_v12 }
 0x7d9   : > { %v4731_v15 = vsub.f32 0.0, %v6575_v18 }
 0x7da   : > { %v4735_v16 = vmul.f32 1.442695, %v4732_v19 }
 0x7db   : > { %v4733_v17 = vmul.f32 1.442695, %v4731_v15 }
 0x7dc   : > { %6695 = vpow2.f32 %v4735_v16 }
 0x7dd   : > { %6697 = vpow2.f32 %v4733_v17 }
 0x7de   : > { %6699 = vtanh.f32 %v6572_v26 }
 0x7df   : > { %6701 = vtanh.f32 %v6573_v28 }
 0x7e6   : > { %v6696_v21 = vpop.eup %6695 }
 0x7e7   : > { %v6698_v22 = vpop.eup %6697  ;;  %v4738_v23 = vadd.f32 1.0, %v6696_v21 }
 0x7e8   : > { %v4737_v24 = vadd.f32 1.0, %v6698_v22  ;;  %v6700_v29 = vpop.eup %6699 }
 0x7e9   : > { %6703 = vrcp.f32 %v4738_v23  ;;  %v6702_v34 = vpop.eup %6701 }
 0x7ea   : > { %6705 = vrcp.f32 %v4737_v24 }
 0x7f3   : > { %v6704_v35 = vpop.eup %6703 }
 0x7f4   : > { %v6706_v30 = vpop.eup %6705  ;;  %v4744_v31 = vmul.f32 %v6704_v35, %v6700_v29 }
 0x7f5   : > { %v4743_v32 = vmul.f32 %v6706_v30, %v6702_v34 }
 0x7f7   : > { %6156 = vmatprep.mubr.msk.f32.mxu1 %vm598_vm2, %v4743_v32 }
 0x7f8   : > { %6157 = vmatmul.mubr.msk.f32.vlgmr.msra.gmra.mrb[2].mxu1 %vm598_vm2, %v4744_v31 }
 0x8cb   : > { %v6158_v46 = vpop.f32.mrb[2].mxu1 }
 0x8cc   : > { %v6560_v48 = vadd.f32 %v6562_v45, %v6158_v46  ;;  %v4822_v49 = vpop.f32.mrb[3].mxu1 }
 0x8cd   : > { %v6563_v50 = vadd.f32 %v6562_v45, %v4822_v49 }
 0x8ce   : > { %v4842_v51 = vadd.f32 %v6560_v48, %v5337_v47 }
 0x8cf   : > { %v4841_v52 = vadd.f32 %v6563_v50, %v5337_v47 }
 0x8d0   : > { %v4844_v54 = vmul.f32 %v4842_v51, %v6866_v27 }
 0x8d1   : > { %v4843_v53 = vmul.f32 %v4841_v52, %v6863_v25 }
 0x8d3   : > { %6167 = vmatprep.mubr.msk.f32.mxu0 %vm598_vm2, %v4843_v53 }
 0x8d4   : > { %6168 = vmatmul.mubr.msk.f32.vlgmr.msra.gmra.mrb[16].mxu0 %vm598_vm2, %v4844_v54 }
 0x9a7   : > { %v6169_v57 = vpop.f32.mrb[16].mxu0 }
 0x9a8   : > { %v4934_v58 = vadd.f32 %v6169_v57, %v5338_v56  ;;  %v4928_v59 = vpop.f32.mrb[17].mxu0 }
 0x9a9   : > { %v4929_v60 = vadd.f32 %v5338_v56, %v4928_v59 }
 0x9aa   : > { %v4938_v61 = vmul.f32 %v4934_v58, %v6866_v27  ;;  %v6708_v27 = vld [vmem:[%s6813_s20] sm:$0xff] }
 0x9ab   : > { %v4937_v63 = vmul.f32 %v4929_v60, %v6863_v25 }
 0x9ac   : > { %v4950_v0 = vadd.f32 %v4946_v62, %v4938_v61 }
 0x9ad   : > { %v4949_v1 = vadd.f32 %v4944_v55, %v4937_v63 }
 0x9ae   : > { %4955 = vrot.lane.b32.xlu1 %v4950_v0, %s6720_s27 }
 0x9af   : > { %4953 = vrot.lane.b32.xlu0 %v4949_v1, %s6720_s27 }
 0xa20   : > { %v4956_v2 = vpop.permute.xlu1 %4955 }
 0xa21   : > { %v4960_v4 = vsel %vm500_vm1, %v6707_v3, %v4956_v2  ;;  %v4954_v5 = vpop.permute.xlu0 %4953 }
 0xa22   : > { %4963 = vst.msk [vmem:[%s487_s15 + $0x8] sm:$0xff] %vm4961_vm3, %v4960_v4  ;;  %v4959_v6 = vsel %vm500_vm1, %v6708_v27, %v4954_v5 }
 0xa23   : > { %4962 = vst.msk [vmem:[%s487_s15] sm:$0xff] %vm4961_vm3, %v4959_v6 }
 0xa24 PF: > { %s24_s29 = sadd.s32 1, %s6715_s29  }
 0xa25   : > { %p21_p4 = scmp.ge.s32.totalorder %s24_s29, 4  }
 0xa27   :  { %23 = sbr.rel (!%p21_p4) target bundleno = 1 (0x1), region = 163 }

</bundles_post_ra>
